<compile_context>
chip_gen: v5e
topology: v5e:2x2
jax: 0.10.0
libtpu: 0.0.40
codegen_flags: <defaults>
</compile_context>

<pallas_src>
import functools

import jax
import jax.numpy as jnp
from jax.experimental import pallas as pl
from jax.experimental.pallas import tpu as pltpu


# ------------------------------- Pallas kernel ------------------------------ #

def _dw3x3(pad_ref, wts, ho, wo, stride):
    """3x3 depthwise conv; the 9 taps are read straight from the padded
    VMEM scratch ref (addressed loads, no materialised slices)."""
    c = pad_ref.shape[2]
    acc = jnp.zeros((ho, wo, c), jnp.float32)
    for ky in range(3):
        for kx in range(3):
            if stride == 1:
                tap = pad_ref[pl.ds(ky, ho), pl.ds(kx, wo), :]
            else:
                tap = pad_ref[pl.ds(ky, ho, stride), pl.ds(kx, wo, stride), :]
            acc = acc + tap * wts[ky, kx]          # (C,) broadcast along lanes
    return acc


def _mbv2_fused_kernel(x_ref,
                       w1a_ref, b1a_ref, dw1_ref, b1b_ref, w1c_ref, b1c_ref,
                       w2a_ref, b2a_ref, dw2_ref, b2b_ref, w2c_ref, b2c_ref,
                       o_ref, pad1_ref, pad2_ref, *, stride):
    h, w, e1 = pad1_ref.shape[0] - 2, pad1_ref.shape[1] - 2, pad1_ref.shape[2]
    ho, wo, e2 = pad2_ref.shape[0] - 2, pad2_ref.shape[1] - 2, pad2_ref.shape[2]

    x = x_ref[0]                                   # (H*W, Cin), row-major HWC

    # ---------------- layer1: 1x1 expand (BN scale folded) + ReLU6 -----------
    t = jnp.dot(x, w1a_ref[...], preferred_element_type=jnp.float32)
    t = jnp.clip(t + b1a_ref[...], 0.0, 6.0)       # (H*W, E1)

    # ---------------- layer1: 3x3 depthwise (pad=1, stride) + BN + ReLU6 -----
    pad1_ref[...] = jnp.zeros_like(pad1_ref)       # halo stays zero
    pad1_ref[pl.ds(1, h), pl.ds(1, w), :] = t.reshape(h, w, e1)
    d = _dw3x3(pad1_ref, dw1_ref[...], ho, wo, stride)
    d = jnp.clip(d + b1b_ref[...], 0.0, 6.0)       # (Ho, Wo, E1)

    # ---------------- layer1: 1x1 project (BN folded) [+ residual] -----------
    y = jnp.dot(d.reshape(ho * wo, e1), w1c_ref[...],
                preferred_element_type=jnp.float32) + b1c_ref[...]
    if stride == 1:
        y = y + x                                  # inverted-residual skip
    x1 = jnp.clip(y, 0.0, 6.0)                     # (Ho*Wo, Cout)

    # ---------------- layer2 (stride 1) --------------------------------------
    t = jnp.dot(x1, w2a_ref[...], preferred_element_type=jnp.float32)
    t = jnp.clip(t + b2a_ref[...], 0.0, 6.0)       # (Ho*Wo, E2)
    pad2_ref[...] = jnp.zeros_like(pad2_ref)
    pad2_ref[pl.ds(1, ho), pl.ds(1, wo), :] = t.reshape(ho, wo, e2)
    d = _dw3x3(pad2_ref, dw2_ref[...], ho, wo, 1)
    d = jnp.clip(d + b2b_ref[...], 0.0, 6.0)
    y = jnp.dot(d.reshape(ho * wo, e2), w2c_ref[...],
                preferred_element_type=jnp.float32) + b2c_ref[...] + x1
    o_ref[0] = jnp.clip(y, 0.0, 6.0).astype(o_ref.dtype)


# ------------------------------ kernel wrapper ------------------------------ #

def mobile_v2_block(x_nchw, p, downsample_rate=1):
    n, cin, h, w = x_nchw.shape
    s = int(downsample_rate)
    e1 = p["l1_pw1_w"].shape[1]
    e2 = p["l2_pw1_w"].shape[1]
    cout = p["l1_pw2_w"].shape[1]
    ho = (h + 2 - 3) // s + 1
    wo = (w + 2 - 3) // s + 1
    f32 = jnp.float32

    # Fold eval-mode BN scales into the conv weights (trace-time, free).
    w1a = (p["l1_pw1_w"] * p["l1_bn1_s"]).astype(f32)     # (Cin, E1)
    dw1 = (p["l1_dw_w"] * p["l1_bn2_s"]).astype(f32)      # (3, 3, E1)
    w1c = (p["l1_pw2_w"] * p["l1_bn3_s"]).astype(f32)     # (E1, Cout)
    w2a = (p["l2_pw1_w"] * p["l2_bn1_s"]).astype(f32)
    dw2 = (p["l2_dw_w"] * p["l2_bn2_s"]).astype(f32)
    w2c = (p["l2_pw2_w"] * p["l2_bn3_s"]).astype(f32)
    b1a, b1b, b1c = p["l1_bn1_b"], p["l1_bn2_b"], p["l1_bn3_b"]
    b2a, b2b, b2c = p["l2_bn1_b"], p["l2_bn2_b"], p["l2_bn3_b"]

    # NCHW -> (N, H*W, C) row-major once at entry (tiny XLA copy).
    x_rm = jnp.transpose(x_nchw, (0, 2, 3, 1)).astype(f32).reshape(n, h * w, cin)

    full2 = lambda b: (0, 0)
    full3 = lambda b: (0, 0, 0)
    out = pl.pallas_call(
        functools.partial(_mbv2_fused_kernel, stride=s),
        out_shape=jax.ShapeDtypeStruct((n, ho * wo, cout), f32),
        grid=(n,),
        in_specs=[
            pl.BlockSpec((1, h * w, cin), lambda b: (b, 0, 0)),      # x
            pl.BlockSpec((cin, e1), full2), pl.BlockSpec((1, e1), full2),
            pl.BlockSpec((3, 3, e1), full3), pl.BlockSpec((1, e1), full2),
            pl.BlockSpec((e1, cout), full2), pl.BlockSpec((1, cout), full2),
            pl.BlockSpec((cout, e2), full2), pl.BlockSpec((1, e2), full2),
            pl.BlockSpec((3, 3, e2), full3), pl.BlockSpec((1, e2), full2),
            pl.BlockSpec((e2, cout), full2), pl.BlockSpec((1, cout), full2),
        ],
        out_specs=pl.BlockSpec((1, ho * wo, cout), lambda b: (b, 0, 0)),
        scratch_shapes=[pltpu.VMEM((h + 2, w + 2, e1), f32),   # layer1 halo buf
                        pltpu.VMEM((ho + 2, wo + 2, e2), f32)],  # layer2 halo buf
        compiler_params=pltpu.CompilerParams(
            dimension_semantics=("parallel",),
            vmem_limit_bytes=32 * 1024 * 1024),
    )(x_rm, w1a, b1a, dw1, b1b, w1c, b1c, w2a, b2a, dw2, b2b, w2c, b2c)

    # (N, Ho*Wo, Cout) -> NCHW (tiny XLA copy at exit).
    return jnp.transpose(out.reshape(n, ho, wo, cout), (0, 3, 1, 2))


# --------------------------- deterministic params --------------------------- #

def _fold_bn(key, c):
    k1, k2, k3, k4 = jax.random.split(key, 4)
    gamma = jax.random.uniform(k1, (c,), minval=0.5, maxval=1.5)
    beta = 0.1 * jax.random.normal(k2, (c,))
    mean = 0.1 * jax.random.normal(k3, (c,))
    var = jax.random.uniform(k4, (c,), minval=0.5, maxval=1.5)
    scale = gamma / jnp.sqrt(var + 1e-5)
    bias = beta - mean * scale
    return (scale.reshape(1, c).astype(jnp.float32),
            bias.reshape(1, c).astype(jnp.float32))


def init_params(key, in_ch, out_ch, expansion=6):
    e1, e2 = in_ch * expansion, out_ch * expansion
    ks = jax.random.split(key, 12)
    p = {}
    p["l1_pw1_w"] = 0.1 * jax.random.normal(ks[0], (in_ch, e1), jnp.float32)
    p["l1_bn1_s"], p["l1_bn1_b"] = _fold_bn(ks[1], e1)
    p["l1_dw_w"] = 0.1 * jax.random.normal(ks[2], (3, 3, e1), jnp.float32)
    p["l1_bn2_s"], p["l1_bn2_b"] = _fold_bn(ks[3], e1)
    p["l1_pw2_w"] = 0.1 * jax.random.normal(ks[4], (e1, out_ch), jnp.float32)
    p["l1_bn3_s"], p["l1_bn3_b"] = _fold_bn(ks[5], out_ch)
    p["l2_pw1_w"] = 0.1 * jax.random.normal(ks[6], (out_ch, e2), jnp.float32)
    p["l2_bn1_s"], p["l2_bn1_b"] = _fold_bn(ks[7], e2)
    p["l2_dw_w"] = 0.1 * jax.random.normal(ks[8], (3, 3, e2), jnp.float32)
    p["l2_bn2_s"], p["l2_bn2_b"] = _fold_bn(ks[9], e2)
    p["l2_pw2_w"] = 0.1 * jax.random.normal(ks[10], (e2, out_ch), jnp.float32)
    p["l2_bn3_s"], p["l2_bn3_b"] = _fold_bn(ks[11], out_ch)
    return p


# ----------------------------- pure-JAX reference ---------------------------- #

def _ref_forward(x_nchw, p, downsample_rate=1):
    x = jnp.transpose(x_nchw, (0, 2, 3, 1)).astype(jnp.float32)

    def pw(v, w, s, b):
        return jnp.einsum("nhwc,cd->nhwd", v, w) * s.reshape(-1) + b.reshape(-1)

    def dw(v, w, s, b, stride):
        c = v.shape[-1]
        y = jax.lax.conv_general_dilated(
            v, w.reshape(3, 3, 1, c),
            window_strides=(stride, stride), padding=((1, 1), (1, 1)),
            dimension_numbers=("NHWC", "HWIO", "NHWC"),
            feature_group_count=c)
        return y * s.reshape(-1) + b.reshape(-1)

    r6 = lambda v: jnp.clip(v, 0.0, 6.0)
    h = r6(pw(x, p["l1_pw1_w"], p["l1_bn1_s"], p["l1_bn1_b"]))
    h = r6(dw(h, p["l1_dw_w"], p["l1_bn2_s"], p["l1_bn2_b"], downsample_rate))
    h = pw(h, p["l1_pw2_w"], p["l1_bn3_s"], p["l1_bn3_b"])
    if downsample_rate == 1:
        h = h + x
    x1 = r6(h)
    h = r6(pw(x1, p["l2_pw1_w"], p["l2_bn1_s"], p["l2_bn1_b"]))
    h = r6(dw(h, p["l2_dw_w"], p["l2_bn2_s"], p["l2_bn2_b"], 1))
    h = pw(h, p["l2_pw2_w"], p["l2_bn3_s"], p["l2_bn3_b"]) + x1
    return jnp.transpose(r6(h), (0, 3, 1, 2))


# ----------------------------------- main ------------------------------------ #

if __name__ == "__main__":
    key = jax.random.PRNGKey(0)
    kx, kp = jax.random.split(key)

    in_ch = out_ch = 4          # residual in layer1 requires in_ch == out_ch
    downsample_rate = 1
    x = jax.random.normal(kx, (2, in_ch, 16, 16), jnp.float32)
    params = init_params(kp, in_ch, out_ch, expansion=6)

    fwd = jax.jit(functools.partial(mobile_v2_block,
                                    downsample_rate=downsample_rate))
    out = jax.block_until_ready(fwd(x, params))

    ref = _ref_forward(x, params, downsample_rate=downsample_rate)
    assert out.shape == (2, out_ch, 16, 16), out.shape
    if not jnp.allclose(out, ref, atol=5e-4, rtol=5e-4):
        raise AssertionError("Pallas output mismatch vs pure-JAX reference")

    print("KERNEL_OK")
</pallas_src>

<mosaic_0001>
module attributes {stable_mosaic.version = 11 : i64} {
  func.func @_mbv2_fused_kernel(%arg0: i32, %arg1: memref<1x256x4xf32, #tpu.memory_space<vmem>>, %arg2: memref<4x24xf32, #tpu.memory_space<vmem>>, %arg3: memref<1x24xf32, #tpu.memory_space<vmem>>, %arg4: memref<3x3x24xf32, #tpu.memory_space<vmem>>, %arg5: memref<1x24xf32, #tpu.memory_space<vmem>>, %arg6: memref<24x4xf32, #tpu.memory_space<vmem>>, %arg7: memref<1x4xf32, #tpu.memory_space<vmem>>, %arg8: memref<4x24xf32, #tpu.memory_space<vmem>>, %arg9: memref<1x24xf32, #tpu.memory_space<vmem>>, %arg10: memref<3x3x24xf32, #tpu.memory_space<vmem>>, %arg11: memref<1x24xf32, #tpu.memory_space<vmem>>, %arg12: memref<24x4xf32, #tpu.memory_space<vmem>>, %arg13: memref<1x4xf32, #tpu.memory_space<vmem>>, %arg14: memref<1x256x4xf32, #tpu.memory_space<vmem>>, %arg15: memref<18x18x24xf32, #tpu.memory_space<vmem>>, %arg16: memref<18x18x24xf32, #tpu.memory_space<vmem>>) attributes {dimension_semantics = [#tpu.dimension_semantics<parallel>], iteration_bounds = array<i64: 2>, scalar_prefetch = 0 : i64, scratch_operands = 2 : i64, tpu.core_type = #tpu.core_type<tc>, window_params = [{transform_indices = @transform_0, window_bounds = array<i64: 1, 256, 4>}, {pipeline_mode = #tpu.pipeline_mode<synchronous>, transform_indices = @transform_1, window_bounds = array<i64: 4, 24>}, {pipeline_mode = #tpu.pipeline_mode<synchronous>, transform_indices = @transform_2, window_bounds = array<i64: 1, 24>}, {pipeline_mode = #tpu.pipeline_mode<synchronous>, transform_indices = @transform_3, window_bounds = array<i64: 3, 3, 24>}, {pipeline_mode = #tpu.pipeline_mode<synchronous>, transform_indices = @transform_4, window_bounds = array<i64: 1, 24>}, {pipeline_mode = #tpu.pipeline_mode<synchronous>, transform_indices = @transform_5, window_bounds = array<i64: 24, 4>}, {pipeline_mode = #tpu.pipeline_mode<synchronous>, transform_indices = @transform_6, window_bounds = array<i64: 1, 4>}, {pipeline_mode = #tpu.pipeline_mode<synchronous>, transform_indices = @transform_7, window_bounds = array<i64: 4, 24>}, {pipeline_mode = #tpu.pipeline_mode<synchronous>, transform_indices = @transform_8, window_bounds = array<i64: 1, 24>}, {pipeline_mode = #tpu.pipeline_mode<synchronous>, transform_indices = @transform_9, window_bounds = array<i64: 3, 3, 24>}, {pipeline_mode = #tpu.pipeline_mode<synchronous>, transform_indices = @transform_10, window_bounds = array<i64: 1, 24>}, {pipeline_mode = #tpu.pipeline_mode<synchronous>, transform_indices = @transform_11, window_bounds = array<i64: 24, 4>}, {pipeline_mode = #tpu.pipeline_mode<synchronous>, transform_indices = @transform_12, window_bounds = array<i64: 1, 4>}, {transform_indices = @transform_13, window_bounds = array<i64: 1, 256, 4>}]} {
    %c0 = arith.constant 0 : index
    %c0_0 = arith.constant 0 : index
    %c0_1 = arith.constant 0 : index
    %0 = vector.load %arg1[%c0, %c0_0, %c0_1] : memref<1x256x4xf32, #tpu.memory_space<vmem>>, vector<1x256x4xf32>
    %1 = vector.shape_cast %0 : vector<1x256x4xf32> to vector<256x4xf32>
    %c0_2 = arith.constant 0 : index
    %c0_3 = arith.constant 0 : index
    %2 = vector.load %arg2[%c0_2, %c0_3] : memref<4x24xf32, #tpu.memory_space<vmem>>, vector<4x24xf32>
    %cst = arith.constant dense<0.000000e+00> : vector<256x24xf32>
    %3 = tpu.matmul %1, %2, %cst {dimension_numbers = #tpu.dot_dimension_numbers<[1], [0], [0], [1], [0, 0, 1, 1], [], []>} : vector<256x4xf32>, vector<4x24xf32>, vector<256x24xf32> -> vector<256x24xf32>
    %c0_4 = arith.constant 0 : index
    %c0_5 = arith.constant 0 : index
    %4 = vector.load %arg3[%c0_4, %c0_5] : memref<1x24xf32, #tpu.memory_space<vmem>>, vector<1x24xf32>
    %5 = vector.broadcast %4 : vector<1x24xf32> to vector<256x24xf32>
    %6 = arith.addf %3, %5 : vector<256x24xf32>
    %cst_6 = arith.constant 0.000000e+00 : f32
    %cst_7 = arith.constant 6.000000e+00 : f32
    %7 = vector.broadcast %cst_6 : f32 to vector<256x24xf32>
    %8 = arith.maximumf %7, %6 : vector<256x24xf32>
    %9 = vector.broadcast %cst_7 : f32 to vector<256x24xf32>
    %10 = arith.minimumf %9, %8 : vector<256x24xf32>
    %cst_8 = arith.constant 0.000000e+00 : f32
    %11 = vector.broadcast %cst_8 : f32 to vector<18x18x24xf32>
    %c0_9 = arith.constant 0 : index
    %c0_10 = arith.constant 0 : index
    %c0_11 = arith.constant 0 : index
    %12 = vector.load %arg15[%c0_9, %c0_10, %c0_11] : memref<18x18x24xf32, #tpu.memory_space<vmem>>, vector<18x18x24xf32>
    tpu.vector_store %arg15[%c0_9, %c0_10, %c0_11], %11 {strides = array<i32>} : memref<18x18x24xf32, #tpu.memory_space<vmem>>, vector<18x18x24xf32>,
    %13 = vector.shape_cast %10 : vector<256x24xf32> to vector<16x16x24xf32>
    %c1 = arith.constant 1 : index
    %c1_12 = arith.constant 1 : index
    %c0_13 = arith.constant 0 : index
    %14 = vector.load %arg15[%c1, %c1_12, %c0_13] : memref<18x18x24xf32, #tpu.memory_space<vmem>>, vector<16x16x24xf32>
    tpu.vector_store %arg15[%c1, %c1_12, %c0_13], %13 {strides = array<i32>} : memref<18x18x24xf32, #tpu.memory_space<vmem>>, vector<16x16x24xf32>,
    %c0_14 = arith.constant 0 : index
    %c0_15 = arith.constant 0 : index
    %c0_16 = arith.constant 0 : index
    %15 = vector.load %arg4[%c0_14, %c0_15, %c0_16] : memref<3x3x24xf32, #tpu.memory_space<vmem>>, vector<3x3x24xf32>
    %cst_17 = arith.constant 0.000000e+00 : f32
    %16 = vector.broadcast %cst_17 : f32 to vector<16x16x24xf32>
    %c0_18 = arith.constant 0 : index
    %c0_19 = arith.constant 0 : index
    %c0_20 = arith.constant 0 : index
    %17 = vector.load %arg15[%c0_18, %c0_19, %c0_20] : memref<18x18x24xf32, #tpu.memory_space<vmem>>, vector<16x16x24xf32>
    %18 = vector.extract_strided_slice %15 {offsets = [0, 0, 0], sizes = [1, 1, 24], strides = [1, 1, 1]} : vector<3x3x24xf32> to vector<1x1x24xf32>
    %19 = vector.shape_cast %18 : vector<1x1x24xf32> to vector<24xf32>
    %20 = vector.shape_cast %19 : vector<24xf32> to vector<1x1x24xf32>
    %21 = vector.broadcast %20 : vector<1x1x24xf32> to vector<16x16x24xf32>
    %22 = arith.mulf %17, %21 : vector<16x16x24xf32>
    %23 = arith.addf %16, %22 : vector<16x16x24xf32>
    %c0_21 = arith.constant 0 : index
    %c1_22 = arith.constant 1 : index
    %c0_23 = arith.constant 0 : index
    %24 = vector.load %arg15[%c0_21, %c1_22, %c0_23] : memref<18x18x24xf32, #tpu.memory_space<vmem>>, vector<16x16x24xf32>
    %25 = vector.extract_strided_slice %15 {offsets = [0, 1, 0], sizes = [1, 1, 24], strides = [1, 1, 1]} : vector<3x3x24xf32> to vector<1x1x24xf32>
    %26 = vector.shape_cast %25 : vector<1x1x24xf32> to vector<24xf32>
    %27 = vector.shape_cast %26 : vector<24xf32> to vector<1x1x24xf32>
    %28 = vector.broadcast %27 : vector<1x1x24xf32> to vector<16x16x24xf32>
    %29 = arith.mulf %24, %28 : vector<16x16x24xf32>
    %30 = arith.addf %23, %29 : vector<16x16x24xf32>
    %c0_24 = arith.constant 0 : index
    %c2 = arith.constant 2 : index
    %c0_25 = arith.constant 0 : index
    %31 = vector.load %arg15[%c0_24, %c2, %c0_25] : memref<18x18x24xf32, #tpu.memory_space<vmem>>, vector<16x16x24xf32>
    %32 = vector.extract_strided_slice %15 {offsets = [0, 2, 0], sizes = [1, 1, 24], strides = [1, 1, 1]} : vector<3x3x24xf32> to vector<1x1x24xf32>
    %33 = vector.shape_cast %32 : vector<1x1x24xf32> to vector<24xf32>
    %34 = vector.shape_cast %33 : vector<24xf32> to vector<1x1x24xf32>
    %35 = vector.broadcast %34 : vector<1x1x24xf32> to vector<16x16x24xf32>
    %36 = arith.mulf %31, %35 : vector<16x16x24xf32>
    %37 = arith.addf %30, %36 : vector<16x16x24xf32>
    %c1_26 = arith.constant 1 : index
    %c0_27 = arith.constant 0 : index
    %c0_28 = arith.constant 0 : index
    %38 = vector.load %arg15[%c1_26, %c0_27, %c0_28] : memref<18x18x24xf32, #tpu.memory_space<vmem>>, vector<16x16x24xf32>
    %39 = vector.extract_strided_slice %15 {offsets = [1, 0, 0], sizes = [1, 1, 24], strides = [1, 1, 1]} : vector<3x3x24xf32> to vector<1x1x24xf32>
    %40 = vector.shape_cast %39 : vector<1x1x24xf32> to vector<24xf32>
    %41 = vector.shape_cast %40 : vector<24xf32> to vector<1x1x24xf32>
    %42 = vector.broadcast %41 : vector<1x1x24xf32> to vector<16x16x24xf32>
    %43 = arith.mulf %38, %42 : vector<16x16x24xf32>
    %44 = arith.addf %37, %43 : vector<16x16x24xf32>
    %c1_29 = arith.constant 1 : index
    %c1_30 = arith.constant 1 : index
    %c0_31 = arith.constant 0 : index
    %45 = vector.load %arg15[%c1_29, %c1_30, %c0_31] : memref<18x18x24xf32, #tpu.memory_space<vmem>>, vector<16x16x24xf32>
    %46 = vector.extract_strided_slice %15 {offsets = [1, 1, 0], sizes = [1, 1, 24], strides = [1, 1, 1]} : vector<3x3x24xf32> to vector<1x1x24xf32>
    %47 = vector.shape_cast %46 : vector<1x1x24xf32> to vector<24xf32>
    %48 = vector.shape_cast %47 : vector<24xf32> to vector<1x1x24xf32>
    %49 = vector.broadcast %48 : vector<1x1x24xf32> to vector<16x16x24xf32>
    %50 = arith.mulf %45, %49 : vector<16x16x24xf32>
    %51 = arith.addf %44, %50 : vector<16x16x24xf32>
    %c1_32 = arith.constant 1 : index
    %c2_33 = arith.constant 2 : index
    %c0_34 = arith.constant 0 : index
    %52 = vector.load %arg15[%c1_32, %c2_33, %c0_34] : memref<18x18x24xf32, #tpu.memory_space<vmem>>, vector<16x16x24xf32>
    %53 = vector.extract_strided_slice %15 {offsets = [1, 2, 0], sizes = [1, 1, 24], strides = [1, 1, 1]} : vector<3x3x24xf32> to vector<1x1x24xf32>
    %54 = vector.shape_cast %53 : vector<1x1x24xf32> to vector<24xf32>
    %55 = vector.shape_cast %54 : vector<24xf32> to vector<1x1x24xf32>
    %56 = vector.broadcast %55 : vector<1x1x24xf32> to vector<16x16x24xf32>
    %57 = arith.mulf %52, %56 : vector<16x16x24xf32>
    %58 = arith.addf %51, %57 : vector<16x16x24xf32>
    %c2_35 = arith.constant 2 : index
    %c0_36 = arith.constant 0 : index
    %c0_37 = arith.constant 0 : index
    %59 = vector.load %arg15[%c2_35, %c0_36, %c0_37] : memref<18x18x24xf32, #tpu.memory_space<vmem>>, vector<16x16x24xf32>
    %60 = vector.extract_strided_slice %15 {offsets = [2, 0, 0], sizes = [1, 1, 24], strides = [1, 1, 1]} : vector<3x3x24xf32> to vector<1x1x24xf32>
    %61 = vector.shape_cast %60 : vector<1x1x24xf32> to vector<24xf32>
    %62 = vector.shape_cast %61 : vector<24xf32> to vector<1x1x24xf32>
    %63 = vector.broadcast %62 : vector<1x1x24xf32> to vector<16x16x24xf32>
    %64 = arith.mulf %59, %63 : vector<16x16x24xf32>
    %65 = arith.addf %58, %64 : vector<16x16x24xf32>
    %c2_38 = arith.constant 2 : index
    %c1_39 = arith.constant 1 : index
    %c0_40 = arith.constant 0 : index
    %66 = vector.load %arg15[%c2_38, %c1_39, %c0_40] : memref<18x18x24xf32, #tpu.memory_space<vmem>>, vector<16x16x24xf32>
    %67 = vector.extract_strided_slice %15 {offsets = [2, 1, 0], sizes = [1, 1, 24], strides = [1, 1, 1]} : vector<3x3x24xf32> to vector<1x1x24xf32>
    %68 = vector.shape_cast %67 : vector<1x1x24xf32> to vector<24xf32>
    %69 = vector.shape_cast %68 : vector<24xf32> to vector<1x1x24xf32>
    %70 = vector.broadcast %69 : vector<1x1x24xf32> to vector<16x16x24xf32>
    %71 = arith.mulf %66, %70 : vector<16x16x24xf32>
    %72 = arith.addf %65, %71 : vector<16x16x24xf32>
    %c2_41 = arith.constant 2 : index
    %c2_42 = arith.constant 2 : index
    %c0_43 = arith.constant 0 : index
    %73 = vector.load %arg15[%c2_41, %c2_42, %c0_43] : memref<18x18x24xf32, #tpu.memory_space<vmem>>, vector<16x16x24xf32>
    %74 = vector.extract_strided_slice %15 {offsets = [2, 2, 0], sizes = [1, 1, 24], strides = [1, 1, 1]} : vector<3x3x24xf32> to vector<1x1x24xf32>
    %75 = vector.shape_cast %74 : vector<1x1x24xf32> to vector<24xf32>
    %76 = vector.shape_cast %75 : vector<24xf32> to vector<1x1x24xf32>
    %77 = vector.broadcast %76 : vector<1x1x24xf32> to vector<16x16x24xf32>
    %78 = arith.mulf %73, %77 : vector<16x16x24xf32>
    %79 = arith.addf %72, %78 : vector<16x16x24xf32>
    %c0_44 = arith.constant 0 : index
    %c0_45 = arith.constant 0 : index
    %80 = vector.load %arg5[%c0_44, %c0_45] : memref<1x24xf32, #tpu.memory_space<vmem>>, vector<1x24xf32>
    %81 = vector.shape_cast %80 : vector<1x24xf32> to vector<1x1x24xf32>
    %82 = vector.broadcast %81 : vector<1x1x24xf32> to vector<16x16x24xf32>
    %83 = arith.addf %79, %82 : vector<16x16x24xf32>
    %cst_46 = arith.constant 0.000000e+00 : f32
    %cst_47 = arith.constant 6.000000e+00 : f32
    %84 = vector.broadcast %cst_46 : f32 to vector<16x16x24xf32>
    %85 = arith.maximumf %84, %83 : vector<16x16x24xf32>
    %86 = vector.broadcast %cst_47 : f32 to vector<16x16x24xf32>
    %87 = arith.minimumf %86, %85 : vector<16x16x24xf32>
    %88 = vector.shape_cast %87 : vector<16x16x24xf32> to vector<256x24xf32>
    %c0_48 = arith.constant 0 : index
    %c0_49 = arith.constant 0 : index
    %89 = vector.load %arg6[%c0_48, %c0_49] : memref<24x4xf32, #tpu.memory_space<vmem>>, vector<24x4xf32>
    %cst_50 = arith.constant dense<0.000000e+00> : vector<256x4xf32>
    %90 = tpu.matmul %88, %89, %cst_50 {dimension_numbers = #tpu.dot_dimension_numbers<[1], [0], [0], [1], [0, 0, 1, 1], [], []>} : vector<256x24xf32>, vector<24x4xf32>, vector<256x4xf32> -> vector<256x4xf32>
    %c0_51 = arith.constant 0 : index
    %c0_52 = arith.constant 0 : index
    %91 = vector.load %arg7[%c0_51, %c0_52] : memref<1x4xf32, #tpu.memory_space<vmem>>, vector<1x4xf32>
    %92 = vector.broadcast %91 : vector<1x4xf32> to vector<256x4xf32>
    %93 = arith.addf %90, %92 : vector<256x4xf32>
    %94 = arith.addf %93, %1 : vector<256x4xf32>
    %cst_53 = arith.constant 0.000000e+00 : f32
    %cst_54 = arith.constant 6.000000e+00 : f32
    %95 = vector.broadcast %cst_53 : f32 to vector<256x4xf32>
    %96 = arith.maximumf %95, %94 : vector<256x4xf32>
    %97 = vector.broadcast %cst_54 : f32 to vector<256x4xf32>
    %98 = arith.minimumf %97, %96 : vector<256x4xf32>
    %c0_55 = arith.constant 0 : index
    %c0_56 = arith.constant 0 : index
    %99 = vector.load %arg8[%c0_55, %c0_56] : memref<4x24xf32, #tpu.memory_space<vmem>>, vector<4x24xf32>
    %cst_57 = arith.constant dense<0.000000e+00> : vector<256x24xf32>
    %100 = tpu.matmul %98, %99, %cst_57 {dimension_numbers = #tpu.dot_dimension_numbers<[1], [0], [0], [1], [0, 0, 1, 1], [], []>} : vector<256x4xf32>, vector<4x24xf32>, vector<256x24xf32> -> vector<256x24xf32>
    %c0_58 = arith.constant 0 : index
    %c0_59 = arith.constant 0 : index
    %101 = vector.load %arg9[%c0_58, %c0_59] : memref<1x24xf32, #tpu.memory_space<vmem>>, vector<1x24xf32>
    %102 = vector.broadcast %101 : vector<1x24xf32> to vector<256x24xf32>
    %103 = arith.addf %100, %102 : vector<256x24xf32>
    %cst_60 = arith.constant 0.000000e+00 : f32
    %cst_61 = arith.constant 6.000000e+00 : f32
    %104 = vector.broadcast %cst_60 : f32 to vector<256x24xf32>
    %105 = arith.maximumf %104, %103 : vector<256x24xf32>
    %106 = vector.broadcast %cst_61 : f32 to vector<256x24xf32>
    %107 = arith.minimumf %106, %105 : vector<256x24xf32>
    %cst_62 = arith.constant 0.000000e+00 : f32
    %108 = vector.broadcast %cst_62 : f32 to vector<18x18x24xf32>
    %c0_63 = arith.constant 0 : index
    %c0_64 = arith.constant 0 : index
    %c0_65 = arith.constant 0 : index
    %109 = vector.load %arg16[%c0_63, %c0_64, %c0_65] : memref<18x18x24xf32, #tpu.memory_space<vmem>>, vector<18x18x24xf32>
    tpu.vector_store %arg16[%c0_63, %c0_64, %c0_65], %108 {strides = array<i32>} : memref<18x18x24xf32, #tpu.memory_space<vmem>>, vector<18x18x24xf32>,
    %110 = vector.shape_cast %107 : vector<256x24xf32> to vector<16x16x24xf32>
    %c1_66 = arith.constant 1 : index
    %c1_67 = arith.constant 1 : index
    %c0_68 = arith.constant 0 : index
    %111 = vector.load %arg16[%c1_66, %c1_67, %c0_68] : memref<18x18x24xf32, #tpu.memory_space<vmem>>, vector<16x16x24xf32>
    tpu.vector_store %arg16[%c1_66, %c1_67, %c0_68], %110 {strides = array<i32>} : memref<18x18x24xf32, #tpu.memory_space<vmem>>, vector<16x16x24xf32>,
    %c0_69 = arith.constant 0 : index
    %c0_70 = arith.constant 0 : index
    %c0_71 = arith.constant 0 : index
    %112 = vector.load %arg10[%c0_69, %c0_70, %c0_71] : memref<3x3x24xf32, #tpu.memory_space<vmem>>, vector<3x3x24xf32>
    %cst_72 = arith.constant 0.000000e+00 : f32
    %113 = vector.broadcast %cst_72 : f32 to vector<16x16x24xf32>
    %c0_73 = arith.constant 0 : index
    %c0_74 = arith.constant 0 : index
    %c0_75 = arith.constant 0 : index
    %114 = vector.load %arg16[%c0_73, %c0_74, %c0_75] : memref<18x18x24xf32, #tpu.memory_space<vmem>>, vector<16x16x24xf32>
    %115 = vector.extract_strided_slice %112 {offsets = [0, 0, 0], sizes = [1, 1, 24], strides = [1, 1, 1]} : vector<3x3x24xf32> to vector<1x1x24xf32>
    %116 = vector.shape_cast %115 : vector<1x1x24xf32> to vector<24xf32>
    %117 = vector.shape_cast %116 : vector<24xf32> to vector<1x1x24xf32>
    %118 = vector.broadcast %117 : vector<1x1x24xf32> to vector<16x16x24xf32>
    %119 = arith.mulf %114, %118 : vector<16x16x24xf32>
    %120 = arith.addf %113, %119 : vector<16x16x24xf32>
    %c0_76 = arith.constant 0 : index
    %c1_77 = arith.constant 1 : index
    %c0_78 = arith.constant 0 : index
    %121 = vector.load %arg16[%c0_76, %c1_77, %c0_78] : memref<18x18x24xf32, #tpu.memory_space<vmem>>, vector<16x16x24xf32>
    %122 = vector.extract_strided_slice %112 {offsets = [0, 1, 0], sizes = [1, 1, 24], strides = [1, 1, 1]} : vector<3x3x24xf32> to vector<1x1x24xf32>
    %123 = vector.shape_cast %122 : vector<1x1x24xf32> to vector<24xf32>
    %124 = vector.shape_cast %123 : vector<24xf32> to vector<1x1x24xf32>
    %125 = vector.broadcast %124 : vector<1x1x24xf32> to vector<16x16x24xf32>
    %126 = arith.mulf %121, %125 : vector<16x16x24xf32>
    %127 = arith.addf %120, %126 : vector<16x16x24xf32>
    %c0_79 = arith.constant 0 : index
    %c2_80 = arith.constant 2 : index
    %c0_81 = arith.constant 0 : index
    %128 = vector.load %arg16[%c0_79, %c2_80, %c0_81] : memref<18x18x24xf32, #tpu.memory_space<vmem>>, vector<16x16x24xf32>
    %129 = vector.extract_strided_slice %112 {offsets = [0, 2, 0], sizes = [1, 1, 24], strides = [1, 1, 1]} : vector<3x3x24xf32> to vector<1x1x24xf32>
    %130 = vector.shape_cast %129 : vector<1x1x24xf32> to vector<24xf32>
    %131 = vector.shape_cast %130 : vector<24xf32> to vector<1x1x24xf32>
    %132 = vector.broadcast %131 : vector<1x1x24xf32> to vector<16x16x24xf32>
    %133 = arith.mulf %128, %132 : vector<16x16x24xf32>
    %134 = arith.addf %127, %133 : vector<16x16x24xf32>
    %c1_82 = arith.constant 1 : index
    %c0_83 = arith.constant 0 : index
    %c0_84 = arith.constant 0 : index
    %135 = vector.load %arg16[%c1_82, %c0_83, %c0_84] : memref<18x18x24xf32, #tpu.memory_space<vmem>>, vector<16x16x24xf32>
    %136 = vector.extract_strided_slice %112 {offsets = [1, 0, 0], sizes = [1, 1, 24], strides = [1, 1, 1]} : vector<3x3x24xf32> to vector<1x1x24xf32>
    %137 = vector.shape_cast %136 : vector<1x1x24xf32> to vector<24xf32>
    %138 = vector.shape_cast %137 : vector<24xf32> to vector<1x1x24xf32>
    %139 = vector.broadcast %138 : vector<1x1x24xf32> to vector<16x16x24xf32>
    %140 = arith.mulf %135, %139 : vector<16x16x24xf32>
    %141 = arith.addf %134, %140 : vector<16x16x24xf32>
    %c1_85 = arith.constant 1 : index
    %c1_86 = arith.constant 1 : index
    %c0_87 = arith.constant 0 : index
    %142 = vector.load %arg16[%c1_85, %c1_86, %c0_87] : memref<18x18x24xf32, #tpu.memory_space<vmem>>, vector<16x16x24xf32>
    %143 = vector.extract_strided_slice %112 {offsets = [1, 1, 0], sizes = [1, 1, 24], strides = [1, 1, 1]} : vector<3x3x24xf32> to vector<1x1x24xf32>
    %144 = vector.shape_cast %143 : vector<1x1x24xf32> to vector<24xf32>
    %145 = vector.shape_cast %144 : vector<24xf32> to vector<1x1x24xf32>
    %146 = vector.broadcast %145 : vector<1x1x24xf32> to vector<16x16x24xf32>
    %147 = arith.mulf %142, %146 : vector<16x16x24xf32>
    %148 = arith.addf %141, %147 : vector<16x16x24xf32>
    %c1_88 = arith.constant 1 : index
    %c2_89 = arith.constant 2 : index
    %c0_90 = arith.constant 0 : index
    %149 = vector.load %arg16[%c1_88, %c2_89, %c0_90] : memref<18x18x24xf32, #tpu.memory_space<vmem>>, vector<16x16x24xf32>
    %150 = vector.extract_strided_slice %112 {offsets = [1, 2, 0], sizes = [1, 1, 24], strides = [1, 1, 1]} : vector<3x3x24xf32> to vector<1x1x24xf32>
    %151 = vector.shape_cast %150 : vector<1x1x24xf32> to vector<24xf32>
    %152 = vector.shape_cast %151 : vector<24xf32> to vector<1x1x24xf32>
    %153 = vector.broadcast %152 : vector<1x1x24xf32> to vector<16x16x24xf32>
    %154 = arith.mulf %149, %153 : vector<16x16x24xf32>
    %155 = arith.addf %148, %154 : vector<16x16x24xf32>
    %c2_91 = arith.constant 2 : index
    %c0_92 = arith.constant 0 : index
    %c0_93 = arith.constant 0 : index
    %156 = vector.load %arg16[%c2_91, %c0_92, %c0_93] : memref<18x18x24xf32, #tpu.memory_space<vmem>>, vector<16x16x24xf32>
    %157 = vector.extract_strided_slice %112 {offsets = [2, 0, 0], sizes = [1, 1, 24], strides = [1, 1, 1]} : vector<3x3x24xf32> to vector<1x1x24xf32>
    %158 = vector.shape_cast %157 : vector<1x1x24xf32> to vector<24xf32>
    %159 = vector.shape_cast %158 : vector<24xf32> to vector<1x1x24xf32>
    %160 = vector.broadcast %159 : vector<1x1x24xf32> to vector<16x16x24xf32>
    %161 = arith.mulf %156, %160 : vector<16x16x24xf32>
    %162 = arith.addf %155, %161 : vector<16x16x24xf32>
    %c2_94 = arith.constant 2 : index
    %c1_95 = arith.constant 1 : index
    %c0_96 = arith.constant 0 : index
    %163 = vector.load %arg16[%c2_94, %c1_95, %c0_96] : memref<18x18x24xf32, #tpu.memory_space<vmem>>, vector<16x16x24xf32>
    %164 = vector.extract_strided_slice %112 {offsets = [2, 1, 0], sizes = [1, 1, 24], strides = [1, 1, 1]} : vector<3x3x24xf32> to vector<1x1x24xf32>
    %165 = vector.shape_cast %164 : vector<1x1x24xf32> to vector<24xf32>
    %166 = vector.shape_cast %165 : vector<24xf32> to vector<1x1x24xf32>
    %167 = vector.broadcast %166 : vector<1x1x24xf32> to vector<16x16x24xf32>
    %168 = arith.mulf %163, %167 : vector<16x16x24xf32>
    %169 = arith.addf %162, %168 : vector<16x16x24xf32>
    %c2_97 = arith.constant 2 : index
    %c2_98 = arith.constant 2 : index
    %c0_99 = arith.constant 0 : index
    %170 = vector.load %arg16[%c2_97, %c2_98, %c0_99] : memref<18x18x24xf32, #tpu.memory_space<vmem>>, vector<16x16x24xf32>
    %171 = vector.extract_strided_slice %112 {offsets = [2, 2, 0], sizes = [1, 1, 24], strides = [1, 1, 1]} : vector<3x3x24xf32> to vector<1x1x24xf32>
    %172 = vector.shape_cast %171 : vector<1x1x24xf32> to vector<24xf32>
    %173 = vector.shape_cast %172 : vector<24xf32> to vector<1x1x24xf32>
    %174 = vector.broadcast %173 : vector<1x1x24xf32> to vector<16x16x24xf32>
    %175 = arith.mulf %170, %174 : vector<16x16x24xf32>
    %176 = arith.addf %169, %175 : vector<16x16x24xf32>
    %c0_100 = arith.constant 0 : index
    %c0_101 = arith.constant 0 : index
    %177 = vector.load %arg11[%c0_100, %c0_101] : memref<1x24xf32, #tpu.memory_space<vmem>>, vector<1x24xf32>
    %178 = vector.shape_cast %177 : vector<1x24xf32> to vector<1x1x24xf32>
    %179 = vector.broadcast %178 : vector<1x1x24xf32> to vector<16x16x24xf32>
    %180 = arith.addf %176, %179 : vector<16x16x24xf32>
    %cst_102 = arith.constant 0.000000e+00 : f32
    %cst_103 = arith.constant 6.000000e+00 : f32
    %181 = vector.broadcast %cst_102 : f32 to vector<16x16x24xf32>
    %182 = arith.maximumf %181, %180 : vector<16x16x24xf32>
    %183 = vector.broadcast %cst_103 : f32 to vector<16x16x24xf32>
    %184 = arith.minimumf %183, %182 : vector<16x16x24xf32>
    %185 = vector.shape_cast %184 : vector<16x16x24xf32> to vector<256x24xf32>
    %c0_104 = arith.constant 0 : index
    %c0_105 = arith.constant 0 : index
    %186 = vector.load %arg12[%c0_104, %c0_105] : memref<24x4xf32, #tpu.memory_space<vmem>>, vector<24x4xf32>
    %cst_106 = arith.constant dense<0.000000e+00> : vector<256x4xf32>
    %187 = tpu.matmul %185, %186, %cst_106 {dimension_numbers = #tpu.dot_dimension_numbers<[1], [0], [0], [1], [0, 0, 1, 1], [], []>} : vector<256x24xf32>, vector<24x4xf32>, vector<256x4xf32> -> vector<256x4xf32>
    %c0_107 = arith.constant 0 : index
    %c0_108 = arith.constant 0 : index
    %188 = vector.load %arg13[%c0_107, %c0_108] : memref<1x4xf32, #tpu.memory_space<vmem>>, vector<1x4xf32>
    %189 = vector.broadcast %188 : vector<1x4xf32> to vector<256x4xf32>
    %190 = arith.addf %187, %189 : vector<256x4xf32>
    %191 = arith.addf %190, %98 : vector<256x4xf32>
    %cst_109 = arith.constant 0.000000e+00 : f32
    %cst_110 = arith.constant 6.000000e+00 : f32
    %192 = vector.broadcast %cst_109 : f32 to vector<256x4xf32>
    %193 = arith.maximumf %192, %191 : vector<256x4xf32>
    %194 = vector.broadcast %cst_110 : f32 to vector<256x4xf32>
    %195 = arith.minimumf %194, %193 : vector<256x4xf32>
    %c0_111 = arith.constant 0 : index
    %c0_112 = arith.constant 0 : index
    %c0_113 = arith.constant 0 : index
    %196 = vector.load %arg14[%c0_111, %c0_112, %c0_113] : memref<1x256x4xf32, #tpu.memory_space<vmem>>, vector<1x256x4xf32>
    %197 = vector.shape_cast %196 : vector<1x256x4xf32> to vector<256x4xf32>
    %198 = vector.shape_cast %195 : vector<256x4xf32> to vector<1x256x4xf32>
    tpu.vector_store %arg14[%c0_111, %c0_112, %c0_113], %198 {strides = array<i32>} : memref<1x256x4xf32, #tpu.memory_space<vmem>>, vector<1x256x4xf32>,
    return
  }
  func.func @transform_0(%arg0: i32) -> (i32, i32, i32) {
    %c0_i32 = arith.constant 0 : i32
    %c0_i32_0 = arith.constant 0 : i32
    %c0_i32_1 = arith.constant 0 : i32
    return %arg0, %c0_i32, %c0_i32_0 : i32, i32, i32
  }
  func.func @transform_1(%arg0: i32) -> (i32, i32) {
    %c0_i32 = arith.constant 0 : i32
    %c0_i32_0 = arith.constant 0 : i32
    %c0_i32_1 = arith.constant 0 : i32
    return %c0_i32, %c0_i32_0 : i32, i32
  }
  func.func @transform_2(%arg0: i32) -> (i32, i32) {
    %c0_i32 = arith.constant 0 : i32
    %c0_i32_0 = arith.constant 0 : i32
    %c0_i32_1 = arith.constant 0 : i32
    return %c0_i32, %c0_i32_0 : i32, i32
  }
  func.func @transform_3(%arg0: i32) -> (i32, i32, i32) {
    %c0_i32 = arith.constant 0 : i32
    %c0_i32_0 = arith.constant 0 : i32
    %c0_i32_1 = arith.constant 0 : i32
    %c0_i32_2 = arith.constant 0 : i32
    return %c0_i32, %c0_i32_0, %c0_i32_1 : i32, i32, i32
  }
  func.func @transform_4(%arg0: i32) -> (i32, i32) {
    %c0_i32 = arith.constant 0 : i32
    %c0_i32_0 = arith.constant 0 : i32
    %c0_i32_1 = arith.constant 0 : i32
    return %c0_i32, %c0_i32_0 : i32, i32
  }
  func.func @transform_5(%arg0: i32) -> (i32, i32) {
    %c0_i32 = arith.constant 0 : i32
    %c0_i32_0 = arith.constant 0 : i32
    %c0_i32_1 = arith.constant 0 : i32
    return %c0_i32, %c0_i32_0 : i32, i32
  }
  func.func @transform_6(%arg0: i32) -> (i32, i32) {
    %c0_i32 = arith.constant 0 : i32
    %c0_i32_0 = arith.constant 0 : i32
    %c0_i32_1 = arith.constant 0 : i32
    return %c0_i32, %c0_i32_0 : i32, i32
  }
  func.func @transform_7(%arg0: i32) -> (i32, i32) {
    %c0_i32 = arith.constant 0 : i32
    %c0_i32_0 = arith.constant 0 : i32
    %c0_i32_1 = arith.constant 0 : i32
    return %c0_i32, %c0_i32_0 : i32, i32
  }
  func.func @transform_8(%arg0: i32) -> (i32, i32) {
    %c0_i32 = arith.constant 0 : i32
    %c0_i32_0 = arith.constant 0 : i32
    %c0_i32_1 = arith.constant 0 : i32
    return %c0_i32, %c0_i32_0 : i32, i32
  }
  func.func @transform_9(%arg0: i32) -> (i32, i32, i32) {
    %c0_i32 = arith.constant 0 : i32
    %c0_i32_0 = arith.constant 0 : i32
    %c0_i32_1 = arith.constant 0 : i32
    %c0_i32_2 = arith.constant 0 : i32
    return %c0_i32, %c0_i32_0, %c0_i32_1 : i32, i32, i32
  }
  func.func @transform_10(%arg0: i32) -> (i32, i32) {
    %c0_i32 = arith.constant 0 : i32
    %c0_i32_0 = arith.constant 0 : i32
    %c0_i32_1 = arith.constant 0 : i32
    return %c0_i32, %c0_i32_0 : i32, i32
  }
  func.func @transform_11(%arg0: i32) -> (i32, i32) {
    %c0_i32 = arith.constant 0 : i32
    %c0_i32_0 = arith.constant 0 : i32
    %c0_i32_1 = arith.constant 0 : i32
    return %c0_i32, %c0_i32_0 : i32, i32
  }
  func.func @transform_12(%arg0: i32) -> (i32, i32) {
    %c0_i32 = arith.constant 0 : i32
    %c0_i32_0 = arith.constant 0 : i32
    %c0_i32_1 = arith.constant 0 : i32
    return %c0_i32, %c0_i32_0 : i32, i32
  }
  func.func @transform_13(%arg0: i32) -> (i32, i32, i32) {
    %c0_i32 = arith.constant 0 : i32
    %c0_i32_0 = arith.constant 0 : i32
    %c0_i32_1 = arith.constant 0 : i32
    return %arg0, %c0_i32, %c0_i32_0 : i32, i32, i32
  }
}

</mosaic_0001>

<bundles_post_ra>
// kernel: mobile_v2_block.1
= control target key start
LH: loop header
LB: loop body
LE: loop exit
PB: predicated region body
PF: predicated region fallthrough
CT: control target
= control target key end

     0   :  { %s4153_s25 = smov 0   ;;  %s6268_s0 = inlined_call_operand.vmem [shape: f32[2,256,4], index: 0, kind: input, shape index: {}]   ;;  %s6269_s1 = inlined_call_operand.vmem [shape: f32[4,24], index: 1, kind: input, shape index: {}]   ;;  %s6270_s2 = inlined_call_operand.vmem [shape: f32[1,24], index: 2, kind: input, shape index: {}]   ;;  %s6271_s3 = inlined_call_operand.vmem [shape: f32[3,3,24], index: 3, kind: input, shape index: {}]   ;;  %s6272_s4 = inlined_call_operand.vmem [shape: f32[1,24], index: 4, kind: input, shape index: {}]   ;;  %s6273_s5 = inlined_call_operand.vmem [shape: f32[24,4], index: 5, kind: input, shape index: {}]   ;;  %s6274_s6 = inlined_call_operand.vmem [shape: f32[1,4], index: 6, kind: input, shape index: {}]   ;;  %s6275_s7 = inlined_call_operand.vmem [shape: f32[4,24], index: 7, kind: input, shape index: {}]   ;;  %s6276_s8 = inlined_call_operand.vmem [shape: f32[1,24], index: 8, kind: input, shape index: {}]   ;;  %s6277_s9 = inlined_call_operand.vmem [shape: f32[3,3,24], index: 9, kind: input, shape index: {}]   ;;  %s6278_s10 = inlined_call_operand.vmem [shape: f32[1,24], index: 10, kind: input, shape index: {}]   ;;  %s6279_s11 = inlined_call_operand.vmem [shape: f32[24,4], index: 11, kind: input, shape index: {}]   ;;  %s6280_s12 = inlined_call_operand.vmem [shape: f32[1,4], index: 12, kind: input, shape index: {}]   ;;  %s6281_s13 = inlined_call_operand.vmem [shape: f32[2,256,4], index: 13, kind: output, shape index: {}]  }
   0x1 LB: > { %s3878_s26 = sadd.s32 4294967295, %s4080_s25   ;;  %p3882_p0 = scmp.ge.s32.totalorder %s4080_s25, 1  ;;  %s4080_s25 = sphi %s4153_s25, %s23_s25  }
   0x2   : > { %p387_p1 = scmp.lt.s32.totalorder %s4080_s25, 3 }
   0x4   : > { %p388_p2 = pnand %p3882_p0, %p387_p1 }
   0x6   : > { %391 = sbr.rel (%p388_p2) target bundleno = 913 (0x391), region = 72 }
   0xb   : > { %v473_v0 = vld [vmem:[%s6269_s1] sm:$0xf]  ;;  %vm575_vm0 = vcmask 1043456   ;;  %p431_p3 = scmp.lt.s32.totalorder %s3878_s26, 1  ;;  %vm478_vm1 = vcmask 31744   ;;  %vm756_vm2 = vcmask 195584  }
   0xc   : > { %3887 = vmatpush.msk.msra.mxu0 %vm575_vm0, %v473_v0  ;;  %v4082_v14 = vmov 0.0   ;;  %v4262_v18 = vld [vmem:[%s6270_s2] ss:$0 sm:$0xff]  ;;  %vm759_vm3 = vcmask 189440   ;;  %v1824_v33 = vld [vmem:[%s6273_s5 + $0x10] sm:$0xff]  ;;  %v1823_v34 = vld [vmem:[%s6273_s5 + $0x8] sm:$0xff] }
   0xd   : > { %s6310_s26 = smov (!%p431_p3, %s3878_s26), 1  ;;  %761 = vst.msk [vmem:[#allocation2 + $0x18] sm:$0xff] %vm756_vm2, %v4082_v14  ;;  %1938 = vmatpush.msra.mxu1 %v1824_v33  ;;  %v1822_v35 = vld [vmem:[%s6273_s5] sm:$0xff] }
   0xe   : > { %s4019_s29 = sshll.u32 %s6310_s26, 8  ;;  %762 = vst.msk [vmem:[#allocation2 + $0x20] sm:$0xff] %vm756_vm2, %v4082_v14  ;;  %v845_v38 = vld [vmem:[%s6271_s3] sm:$0x7]  ;;  %v846_v56 = vld [vmem:[%s6271_s3 + $0x4] sm:$0x7] }
   0xf   : > { %s4173_s15 = scalar_lea.vmem %s6268_s0, %s4019_s29  ;;  %757 = vst.msk [vmem:[#allocation2] sm:$0xff] %vm756_vm2, %v4082_v14  ;;  %1939 = vmatpush.msra.mxu1 %v1823_v34  ;;  %v4422_v39 = vperm.slane %v845_v38, 0  ;;  %v4426_v43 = vperm.slane %v845_v38, 1  ;;  %v4446_v53 = vperm.slane %v845_v38, 2  ;;  %s5930_s28 = scalar_lea.vmem %s6281_s13, %s4019_s29 }
  0x10   : > { %v441_v1 = vld [vmem:[%s4173_s15] sm:$0xff]  ;;  %v442_v2 = vld [vmem:[%s4173_s15 + $0x8] sm:$0xff]  ;;  %v443_v3 = vld [vmem:[%s4173_s15 + $0x10] sm:$0xff]  ;;  %758 = vst.msk [vmem:[#allocation2 + $0x8] sm:$0xff] %vm756_vm2, %v4082_v14 }
  0x11   : > { %3888 = vmatmul.msk.f32.vlgmr.msra.gmra.mxu0 %vm478_vm1, %v441_v1  ;;  %v444_v4 = vld [vmem:[%s4173_s15 + $0x18] sm:$0xff]  ;;  %v445_v5 = vld [vmem:[%s4173_s15 + $0x20] sm:$0xff]  ;;  %v446_v6 = vld [vmem:[%s4173_s15 + $0x28] sm:$0xff]  ;;  %764 = vst.msk [vmem:[#allocation2 + $0x30] sm:$0xff] %vm756_vm2, %v4082_v14  ;;  %1940 = vmatpush.msra.mxu1 %v1822_v35 }
  0x12   : > { %v447_v7 = vld [vmem:[%s4173_s15 + $0x30] sm:$0xff]  ;;  %v448_v8 = vld [vmem:[%s4173_s15 + $0x38] sm:$0xff]  ;;  %v449_v9 = vld [vmem:[%s4173_s15 + $0x40] sm:$0xff]  ;;  %765 = vst.msk [vmem:[#allocation2 + $0x38] sm:$0xff] %vm756_vm2, %v4082_v14 }
  0x13   : > { %v450_v10 = vld [vmem:[%s4173_s15 + $0x48] sm:$0xff]  ;;  %v451_v11 = vld [vmem:[%s4173_s15 + $0x50] sm:$0xff]  ;;  %v452_v12 = vld [vmem:[%s4173_s15 + $0x58] sm:$0xff]  ;;  %767 = vst.msk [vmem:[#allocation2 + $0x48] sm:$0xff] %vm756_vm2, %v4082_v14 }
  0x14   : > { %v453_v13 = vld [vmem:[%s4173_s15 + $0x60] sm:$0xff]  ;;  %v454_v15 = vld [vmem:[%s4173_s15 + $0x68] sm:$0xff]  ;;  %768 = vst.msk [vmem:[#allocation2 + $0x50] sm:$0xff] %vm756_vm2, %v4082_v14  ;;  %v455_v16 = vld [vmem:[%s4173_s15 + $0x70] sm:$0xff] }
  0x15   : > { %770 = vst.msk [vmem:[#allocation2 + $0x60] sm:$0xff] %vm756_vm2, %v4082_v14  ;;  %v456_v17 = vld [vmem:[%s4173_s15 + $0x78] sm:$0xff]  ;;  %v457_v20 = vld [vmem:[%s4173_s15 + $0x80] sm:$0xff]  ;;  %v458_v24 = vld [vmem:[%s4173_s15 + $0x88] sm:$0xff] }
  0x16   : > { %771 = vst.msk [vmem:[#allocation2 + $0x68] sm:$0xff] %vm756_vm2, %v4082_v14  ;;  %v459_v30 = vld [vmem:[%s4173_s15 + $0x90] sm:$0xff]  ;;  %v460_v32 = vld [vmem:[%s4173_s15 + $0x98] sm:$0xff]  ;;  %v461_v37 = vld [vmem:[%s4173_s15 + $0xa0] sm:$0xff] }
  0x17   : > { %773 = vst.msk [vmem:[#allocation2 + $0x78] sm:$0xff] %vm756_vm2, %v4082_v14  ;;  %v848_v41 = vld [vmem:[#allocation2] sm:$0xff]  ;;  %v462_v44 = vld [vmem:[%s4173_s15 + $0xa8] sm:$0xff] }
  0x18   : > { %774 = vst.msk [vmem:[#allocation2 + $0x80] sm:$0xff] %vm756_vm2, %v4082_v14  ;;  %v945_v42 = vld [vmem:[#allocation2 + $0x1] sm:$0xff]  ;;  %v881_v48 = vmul.f32 %v4422_v39, %v848_v41 }
  0x19   : > { %3889 = vmatmul.msk.f32.gmra.mxu0 %vm478_vm1, %v442_v2  ;;  %776 = vst.msk [vmem:[#allocation2 + $0x90] sm:$0xff] %vm756_vm2, %v4082_v14  ;;  %v849_v45 = vld [vmem:[#allocation2 + $0x8] sm:$0xff]  ;;  %v978_v49 = vmul.f32 %v4426_v43, %v945_v42 }
  0x1a   : > { %777 = vst.msk [vmem:[#allocation2 + $0x98] sm:$0xff] %vm756_vm2, %v4082_v14  ;;  %v882_v50 = vmul.f32 %v4422_v39, %v849_v45  ;;  %v1042_v57 = vld [vmem:[#allocation2 + $0x2] sm:$0xff] }
  0x1b   : > { %779 = vst.msk [vmem:[#allocation2 + $0xa8] sm:$0xff] %vm756_vm2, %v4082_v14  ;;  %v1010_v61 = vadd.f32 %v978_v49, %v881_v48  ;;  %v1075_v2 = vmul.f32 %v4446_v53, %v1042_v57 }
  0x1c   : > { %780 = vst.msk [vmem:[#allocation2 + $0xb0] sm:$0xff] %vm756_vm2, %v4082_v14 }
  0x1d   : > { %782 = vst.msk [vmem:[#allocation2 + $0xc0] sm:$0xff] %vm756_vm2, %v4082_v14 }
  0x1e   : > { %783 = vst.msk [vmem:[#allocation2 + $0xc8] sm:$0xff] %vm756_vm2, %v4082_v14 }
  0x1f   : > { %785 = vst.msk [vmem:[#allocation2 + $0xd8] sm:$0xff] %vm756_vm2, %v4082_v14 }
  0x20   : > { %786 = vst.msk [vmem:[#allocation2 + $0xe0] sm:$0xff] %vm756_vm2, %v4082_v14 }
  0x21   : > { %3890 = vmatmul.msk.f32.gmra.mxu0 %vm478_vm1, %v443_v3  ;;  %788 = vst.msk [vmem:[#allocation2 + $0xf0] sm:$0xff] %vm756_vm2, %v4082_v14  ;;  %v4464_v3 = vperm.slane %v846_v56, 0 }
  0x22   : > { %789 = vst.msk [vmem:[#allocation2 + $0xf8] sm:$0xff] %vm756_vm2, %v4082_v14 }
  0x23   : > { %791 = vst.msk [vmem:[#allocation2 + $0x108] sm:$0xff] %vm756_vm2, %v4082_v14 }
  0x24   : > { %792 = vst.msk [vmem:[#allocation2 + $0x110] sm:$0xff] %vm756_vm2, %v4082_v14 }
  0x25   : > { %794 = vst.msk [vmem:[#allocation2 + $0x120] sm:$0xff] %vm756_vm2, %v4082_v14 }
  0x26   : > { %795 = vst.msk [vmem:[#allocation2 + $0x128] sm:$0xff] %vm756_vm2, %v4082_v14 }
  0x27   : > { %797 = vst.msk [vmem:[#allocation2 + $0x138] sm:$0xff] %vm756_vm2, %v4082_v14 }
  0x28   : > { %798 = vst.msk [vmem:[#allocation2 + $0x140] sm:$0xff] %vm756_vm2, %v4082_v14 }
  0x29   : > { %3891 = vmatmul.msk.f32.gmra.mxu0 %vm478_vm1, %v444_v4  ;;  %800 = vst.msk [vmem:[#allocation2 + $0x150] sm:$0xff] %vm756_vm2, %v4082_v14  ;;  %v463_v4 = vld [vmem:[%s4173_s15 + $0xb0] sm:$0xff] }
  0x2a   : > { %801 = vst.msk [vmem:[#allocation2 + $0x158] sm:$0xff] %vm756_vm2, %v4082_v14 }
  0x2b   : > { %803 = vst.msk [vmem:[#allocation2 + $0x168] sm:$0xff] %vm756_vm2, %v4082_v14 }
  0x2c   : > { %804 = vst.msk [vmem:[#allocation2 + $0x170] sm:$0xff] %vm756_vm2, %v4082_v14 }
  0x2d   : > { %806 = vst.msk [vmem:[#allocation2 + $0x180] sm:$0xff] %vm756_vm2, %v4082_v14 }
  0x2e   : > { %807 = vst.msk [vmem:[#allocation2 + $0x188] sm:$0xff] %vm756_vm2, %v4082_v14 }
  0x2f   : > { %809 = vst.msk [vmem:[#allocation2 + $0x198] sm:$0xff] %vm756_vm2, %v4082_v14 }
  0x30   : > { %810 = vst.msk [vmem:[#allocation2 + $0x1a0] sm:$0xff] %vm756_vm2, %v4082_v14 }
  0x31   : > { %3892 = vmatmul.msk.f32.gmra.mxu0 %vm478_vm1, %v445_v5  ;;  %2415 = vst.msk [vmem:[#allocation3] sm:$0xff] %vm756_vm2, %v4082_v14 }
  0x32   : > { %2416 = vst.msk [vmem:[#allocation3 + $0x8] sm:$0xff] %vm756_vm2, %v4082_v14 }
  0x33   : > { %2418 = vst.msk [vmem:[#allocation3 + $0x18] sm:$0xff] %vm756_vm2, %v4082_v14 }
  0x34   : > { %2419 = vst.msk [vmem:[#allocation3 + $0x20] sm:$0xff] %vm756_vm2, %v4082_v14 }
  0x35   : > { %2421 = vst.msk [vmem:[#allocation3 + $0x30] sm:$0xff] %vm756_vm2, %v4082_v14 }
  0x36   : > { %2422 = vst.msk [vmem:[#allocation3 + $0x38] sm:$0xff] %vm756_vm2, %v4082_v14 }
  0x37   : > { %2424 = vst.msk [vmem:[#allocation3 + $0x48] sm:$0xff] %vm756_vm2, %v4082_v14 }
  0x38   : > { %2425 = vst.msk [vmem:[#allocation3 + $0x50] sm:$0xff] %vm756_vm2, %v4082_v14 }
  0x39   : > { %3893 = vmatmul.msk.f32.gmra.mxu0 %vm478_vm1, %v446_v6  ;;  %2427 = vst.msk [vmem:[#allocation3 + $0x60] sm:$0xff] %vm756_vm2, %v4082_v14 }
  0x3a   : > { %2428 = vst.msk [vmem:[#allocation3 + $0x68] sm:$0xff] %vm756_vm2, %v4082_v14 }
  0x3b   : > { %2430 = vst.msk [vmem:[#allocation3 + $0x78] sm:$0xff] %vm756_vm2, %v4082_v14 }
  0x3c   : > { %2431 = vst.msk [vmem:[#allocation3 + $0x80] sm:$0xff] %vm756_vm2, %v4082_v14 }
  0x3d   : > { %2433 = vst.msk [vmem:[#allocation3 + $0x90] sm:$0xff] %vm756_vm2, %v4082_v14 }
  0x3e   : > { %2434 = vst.msk [vmem:[#allocation3 + $0x98] sm:$0xff] %vm756_vm2, %v4082_v14 }
  0x3f   : > { %2436 = vst.msk [vmem:[#allocation3 + $0xa8] sm:$0xff] %vm756_vm2, %v4082_v14 }
  0x40   : > { %2437 = vst.msk [vmem:[#allocation3 + $0xb0] sm:$0xff] %vm756_vm2, %v4082_v14 }
  0x41   : > { %3894 = vmatmul.msk.f32.gmra.mxu0 %vm478_vm1, %v447_v7  ;;  %2439 = vst.msk [vmem:[#allocation3 + $0xc0] sm:$0xff] %vm756_vm2, %v4082_v14 }
  0x42   : > { %2440 = vst.msk [vmem:[#allocation3 + $0xc8] sm:$0xff] %vm756_vm2, %v4082_v14 }
  0x43   : > { %2442 = vst.msk [vmem:[#allocation3 + $0xd8] sm:$0xff] %vm756_vm2, %v4082_v14 }
  0x44   : > { %2443 = vst.msk [vmem:[#allocation3 + $0xe0] sm:$0xff] %vm756_vm2, %v4082_v14 }
  0x45   : > { %2445 = vst.msk [vmem:[#allocation3 + $0xf0] sm:$0xff] %vm756_vm2, %v4082_v14 }
  0x46   : > { %2446 = vst.msk [vmem:[#allocation3 + $0xf8] sm:$0xff] %vm756_vm2, %v4082_v14 }
  0x47   : > { %2448 = vst.msk [vmem:[#allocation3 + $0x108] sm:$0xff] %vm756_vm2, %v4082_v14 }
  0x48   : > { %2449 = vst.msk [vmem:[#allocation3 + $0x110] sm:$0xff] %vm756_vm2, %v4082_v14 }
  0x49   : > { %3895 = vmatmul.msk.f32.gmra.mxu0 %vm478_vm1, %v448_v8  ;;  %2451 = vst.msk [vmem:[#allocation3 + $0x120] sm:$0xff] %vm756_vm2, %v4082_v14 }
  0x4a   : > { %2452 = vst.msk [vmem:[#allocation3 + $0x128] sm:$0xff] %vm756_vm2, %v4082_v14 }
  0x4b   : > { %2454 = vst.msk [vmem:[#allocation3 + $0x138] sm:$0xff] %vm756_vm2, %v4082_v14 }
  0x4c   : > { %2455 = vst.msk [vmem:[#allocation3 + $0x140] sm:$0xff] %vm756_vm2, %v4082_v14 }
  0x4d   : > { %2457 = vst.msk [vmem:[#allocation3 + $0x150] sm:$0xff] %vm756_vm2, %v4082_v14 }
  0x4e   : > { %2458 = vst.msk [vmem:[#allocation3 + $0x158] sm:$0xff] %vm756_vm2, %v4082_v14 }
  0x4f   : > { %2460 = vst.msk [vmem:[#allocation3 + $0x168] sm:$0xff] %vm756_vm2, %v4082_v14 }
  0x50   : > { %2461 = vst.msk [vmem:[#allocation3 + $0x170] sm:$0xff] %vm756_vm2, %v4082_v14 }
  0x51   : > { %3896 = vmatmul.msk.f32.gmra.mxu0 %vm478_vm1, %v449_v9  ;;  %2463 = vst.msk [vmem:[#allocation3 + $0x180] sm:$0xff] %vm756_vm2, %v4082_v14 }
  0x52   : > { %2464 = vst.msk [vmem:[#allocation3 + $0x188] sm:$0xff] %vm756_vm2, %v4082_v14 }
  0x53   : > { %2466 = vst.msk [vmem:[#allocation3 + $0x198] sm:$0xff] %vm756_vm2, %v4082_v14 }
  0x54   : > { %2467 = vst.msk [vmem:[#allocation3 + $0x1a0] sm:$0xff] %vm756_vm2, %v4082_v14 }
  0x55   : > { %763 = vst.msk [vmem:[#allocation2 + $0x28] sm:$0x3] %vm759_vm3, %v4082_v14 }
  0x56   : > { %760 = vst.msk [vmem:[#allocation2 + $0x10] sm:$0x3] %vm759_vm3, %v4082_v14 }
  0x57   : > { %766 = vst.msk [vmem:[#allocation2 + $0x40] sm:$0x3] %vm759_vm3, %v4082_v14 }
  0x58   : > { %769 = vst.msk [vmem:[#allocation2 + $0x58] sm:$0x3] %vm759_vm3, %v4082_v14 }
  0x59   : > { %3897 = vmatmul.msk.f32.gmra.mxu0 %vm478_vm1, %v450_v10  ;;  %772 = vst.msk [vmem:[#allocation2 + $0x70] sm:$0x3] %vm759_vm3, %v4082_v14 }
  0x5a   : > { %775 = vst.msk [vmem:[#allocation2 + $0x88] sm:$0x3] %vm759_vm3, %v4082_v14 }
  0x5b   : > { %778 = vst.msk [vmem:[#allocation2 + $0xa0] sm:$0x3] %vm759_vm3, %v4082_v14 }
  0x5c   : > { %781 = vst.msk [vmem:[#allocation2 + $0xb8] sm:$0x3] %vm759_vm3, %v4082_v14 }
  0x5d   : > { %784 = vst.msk [vmem:[#allocation2 + $0xd0] sm:$0x3] %vm759_vm3, %v4082_v14  ;;  %v946_v46 = vld [vmem:[#allocation2 + $0x9] sm:$0xff] }
  0x5e   : > { %787 = vst.msk [vmem:[#allocation2 + $0xe8] sm:$0x3] %vm759_vm3, %v4082_v14  ;;  %v979_v51 = vmul.f32 %v4426_v43, %v946_v46  ;;  %v1043_v54 = vld [vmem:[#allocation2 + $0xa] sm:$0xff] }
  0x5f   : > { %790 = vst.msk [vmem:[#allocation2 + $0x100] sm:$0x3] %vm759_vm3, %v4082_v14  ;;  %v1076_v63 = vmul.f32 %v4446_v53, %v1043_v54 }
  0x60   : > { %793 = vst.msk [vmem:[#allocation2 + $0x118] sm:$0x3] %vm759_vm3, %v4082_v14  ;;  %v1011_v62 = vadd.f32 %v979_v51, %v882_v50 }
  0x61   : > { %3898 = vmatmul.msk.f32.gmra.mxu0 %vm478_vm1, %v451_v11  ;;  %796 = vst.msk [vmem:[#allocation2 + $0x130] sm:$0x3] %vm759_vm3, %v4082_v14 }
  0x62   : > { %799 = vst.msk [vmem:[#allocation2 + $0x148] sm:$0x3] %vm759_vm3, %v4082_v14  ;;  %v1108_v11 = vadd.f32 %v1076_v63, %v1011_v62 }
  0x63   : > { %802 = vst.msk [vmem:[#allocation2 + $0x160] sm:$0x3] %vm759_vm3, %v4082_v14 }
  0x64   : > { %805 = vst.msk [vmem:[#allocation2 + $0x178] sm:$0x3] %vm759_vm3, %v4082_v14 }
  0x65   : > { %808 = vst.msk [vmem:[#allocation2 + $0x190] sm:$0x3] %vm759_vm3, %v4082_v14 }
  0x66   : > { %811 = vst.msk [vmem:[#allocation2 + $0x1a8] sm:$0x3] %vm759_vm3, %v4082_v14 }
  0x67   : > { %2417 = vst.msk [vmem:[#allocation3 + $0x10] sm:$0x3] %vm759_vm3, %v4082_v14 }
  0x68   : > { %2420 = vst.msk [vmem:[#allocation3 + $0x28] sm:$0x3] %vm759_vm3, %v4082_v14 }
  0x69   : > { %3899 = vmatmul.msk.f32.gmra.mxu0 %vm478_vm1, %v452_v12  ;;  %2423 = vst.msk [vmem:[#allocation3 + $0x40] sm:$0x3] %vm759_vm3, %v4082_v14 }
  0x6a   : > { %2426 = vst.msk [vmem:[#allocation3 + $0x58] sm:$0x3] %vm759_vm3, %v4082_v14 }
  0x6b   : > { %2429 = vst.msk [vmem:[#allocation3 + $0x70] sm:$0x3] %vm759_vm3, %v4082_v14 }
  0x6c   : > { %2432 = vst.msk [vmem:[#allocation3 + $0x88] sm:$0x3] %vm759_vm3, %v4082_v14 }
  0x6d   : > { %2435 = vst.msk [vmem:[#allocation3 + $0xa0] sm:$0x3] %vm759_vm3, %v4082_v14 }
  0x6e   : > { %2438 = vst.msk [vmem:[#allocation3 + $0xb8] sm:$0x3] %vm759_vm3, %v4082_v14 }
  0x6f   : > { %2441 = vst.msk [vmem:[#allocation3 + $0xd0] sm:$0x3] %vm759_vm3, %v4082_v14 }
  0x70   : > { %2444 = vst.msk [vmem:[#allocation3 + $0xe8] sm:$0x3] %vm759_vm3, %v4082_v14 }
  0x71   : > { %3900 = vmatmul.msk.f32.gmra.mxu0 %vm478_vm1, %v453_v13  ;;  %2447 = vst.msk [vmem:[#allocation3 + $0x100] sm:$0x3] %vm759_vm3, %v4082_v14 }
  0x72   : > { %2450 = vst.msk [vmem:[#allocation3 + $0x118] sm:$0x3] %vm759_vm3, %v4082_v14 }
  0x73   : > { %2453 = vst.msk [vmem:[#allocation3 + $0x130] sm:$0x3] %vm759_vm3, %v4082_v14 }
  0x74   : > { %2456 = vst.msk [vmem:[#allocation3 + $0x148] sm:$0x3] %vm759_vm3, %v4082_v14 }
  0x75   : > { %2459 = vst.msk [vmem:[#allocation3 + $0x160] sm:$0x3] %vm759_vm3, %v4082_v14 }
  0x76   : > { %2462 = vst.msk [vmem:[#allocation3 + $0x178] sm:$0x3] %vm759_vm3, %v4082_v14 }
  0x77   : > { %2465 = vst.msk [vmem:[#allocation3 + $0x190] sm:$0x3] %vm759_vm3, %v4082_v14 }
  0x78   : > { %2468 = vst.msk [vmem:[#allocation3 + $0x1a8] sm:$0x3] %vm759_vm3, %v4082_v14 }
  0x79   : > { %3901 = vmatmul.msk.f32.gmra.mxu0 %vm478_vm1, %v454_v15  ;;  %v1107_v15 = vadd.f32 %v1075_v2, %v1010_v61 }
  0x81   : > { %3902 = vmatmul.msk.f32.gmra.mxu0 %vm478_vm1, %v455_v16 }
  0x89   : > { %3903 = vmatmul.msk.f32.gmra.mxu0 %vm478_vm1, %v456_v17 }
  0x8e   : > { %v596_v19 = vpop.f32.mrf.mxu0 }
  0x8f   : > { %v597_v21 = vadd.f32 %v4262_v18, %v596_v19 }
  0x91   : > { %v692_v22 = vmax.f32 %v597_v21, 0.0  ;;  %3904 = vmatmul.msk.f32.gmra.mxu0 %vm478_vm1, %v457_v20  ;;  %v4480_v20 = vperm.slane %v846_v56, 1  ;;  %v4482_v21 = vperm.slane %v846_v56, 2 }
  0x93   : > { %v724_v23 = vmin.f32 %v692_v22, 6.0 }
  0x95   : > { %813 = vst.msk [vmem:[#allocation2 + $0x19] sm:$0xff] %vm756_vm2, %v724_v23 }
  0x96   : > { %v599_v25 = vpop.f32.mrf.mxu0 }
  0x97   : > { %v600_v26 = vadd.f32 %v4262_v18, %v599_v25 }
  0x99   : > { %3905 = vmatmul.msk.f32.gmra.mxu0 %vm478_vm1, %v458_v24  ;;  %v693_v27 = vmax.f32 %v600_v26, 0.0 }
  0x9b   : > { %v725_v29 = vmin.f32 %v693_v27, 6.0 }
  0x9c   : > { %v1139_v7 = vld [vmem:[#allocation2 + $0x18] sm:$0xff] }
  0x9d   : > { %814 = vst.msk [vmem:[#allocation2 + $0x21] sm:$0xff] %vm756_vm2, %v725_v29  ;;  %v1172_v16 = vmul.f32 %v4464_v3, %v1139_v7  ;;  %v1236_v19 = vld [vmem:[#allocation2 + $0x19] sm:$0xff]  ;;  %v883_v14 = vmul.f32 %v1139_v7, %v4422_v39 }
  0x9e   : > { %v602_v28 = vpop.f32.mrf.mxu0  ;;  %v1269_v33 = vmul.f32 %v4480_v20, %v1236_v19  ;;  %v465_v7 = vld [vmem:[%s4173_s15 + $0xc0] sm:$0xff] }
  0x9f   : > { %v603_v47 = vadd.f32 %v4262_v18, %v602_v28  ;;  %v847_v28 = vld [vmem:[%s6271_s3 + $0x8] sm:$0x7]  ;;  %v1204_v29 = vadd.f32 %v1172_v16, %v1107_v15 }
  0xa0   : > { %v4504_v42 = vperm.slane %v847_v28, 0  ;;  %v4507_v46 = vperm.slane %v847_v28, 1  ;;  %v4509_v49 = vperm.slane %v847_v28, 2 }
  0xa1   : > { %3906 = vmatmul.msk.f32.gmra.mxu0 %vm478_vm1, %v459_v30  ;;  %v694_v59 = vmax.f32 %v603_v47, 0.0  ;;  %v1301_v45 = vadd.f32 %v1269_v33, %v1204_v29 }
  0xa3   : > { %v726_v9 = vmin.f32 %v694_v59, 6.0 }
  0xa4   : > { %v1140_v5 = vld [vmem:[#allocation2 + $0x20] sm:$0xff] }
  0xa5   : > { %v1173_v12 = vmul.f32 %v4464_v3, %v1140_v5  ;;  %v1333_v23 = vld [vmem:[#allocation2 + $0x1a] sm:$0xff]  ;;  %815 = vst.msk [vmem:[#allocation2 + $0x31] sm:$0xff] %vm756_vm2, %v726_v9 }
  0xa6   : > { %v605_v31 = vpop.f32.mrf.mxu0  ;;  %v1237_v24 = vld [vmem:[#allocation2 + $0x21] sm:$0xff]  ;;  %v1366_v34 = vmul.f32 %v4482_v21, %v1333_v23  ;;  %v1077_v38 = vmul.f32 %v1333_v23, %v4446_v53 }
  0xa7   : > { %v606_v52 = vadd.f32 %v4262_v18, %v605_v31  ;;  %v1205_v27 = vadd.f32 %v1173_v12, %v1108_v11  ;;  %v464_v31 = vld [vmem:[%s4173_s15 + $0xb8] sm:$0xff]  ;;  %v1270_v35 = vmul.f32 %v4480_v20, %v1237_v24  ;;  %v981_v41 = vmul.f32 %v1237_v24, %v4426_v43 }
  0xa8   : > { %v1398_v51 = vadd.f32 %v1366_v34, %v1301_v45 }
  0xa9   : > { %3907 = vmatmul.msk.f32.gmra.mxu0 %vm478_vm1, %v460_v32  ;;  %v695_v0 = vmax.f32 %v606_v52, 0.0  ;;  %v980_v32 = vmul.f32 %v1236_v19, %v4426_v43 }
  0xab   : > { %v727_v13 = vmin.f32 %v695_v0, 6.0  ;;  %v1012_v48 = vadd.f32 %v980_v32, %v883_v14 }
  0xac   : > { %v1431_v52 = vld [vmem:[#allocation2 + $0x30] sm:$0xff] }
  0xad   : > { %816 = vst.msk [vmem:[#allocation2 + $0x39] sm:$0xff] %vm756_vm2, %v727_v13  ;;  %v1528_v54 = vld [vmem:[#allocation2 + $0x31] sm:$0xff]  ;;  %v1464_v57 = vmul.f32 %v4504_v42, %v1431_v52  ;;  %v1174_v63 = vmul.f32 %v1431_v52, %v4464_v3 }
  0xae   : > { %v608_v36 = vpop.f32.mrf.mxu0 }
  0xaf   : > { %v609_v55 = vadd.f32 %v4262_v18, %v608_v36 }
  0xb1   : > { %3908 = vmatmul.msk.f32.gmra.mxu0 %vm478_vm1, %v461_v37  ;;  %v696_v6 = vmax.f32 %v609_v55, 0.0  ;;  %v1334_v37 = vld [vmem:[#allocation2 + $0x22] sm:$0xff]  ;;  %v1109_v55 = vadd.f32 %v1077_v38, %v1012_v48 }
  0xb2   : > { %v1367_v50 = vmul.f32 %v4482_v21, %v1334_v37  ;;  %v1078_v0 = vmul.f32 %v1334_v37, %v4446_v53 }
  0xb3   : > { %v728_v17 = vmin.f32 %v696_v6, 6.0  ;;  %v1206_v11 = vadd.f32 %v1174_v63, %v1109_v55 }
  0xb4   : > { %v4516_v61 = vld [vmem:[#allocation2 + $0x39] sm:$0xff] }
  0xb5   : > { %817 = vst.msk [vmem:[#allocation2 + $0x49] sm:$0xff] %vm756_vm2, %v728_v17  ;;  %v1562_v15 = vmul.f32 %v4507_v46, %v4516_v61  ;;  %v1272_v34 = vmul.f32 %v4516_v61, %v4480_v20 }
  0xb6   : > { %v611_v40 = vpop.f32.mrf.mxu0 }
  0xb7   : > { %v612_v58 = vadd.f32 %v4262_v18, %v611_v40  ;;  %v884_v40 = vmul.f32 %v1140_v5, %v4422_v39  ;;  %v1271_v5 = vmul.f32 %v1528_v54, %v4480_v20 }
  0xb9   : > { %3909 = vmatmul.msk.f32.gmra.mxu0 %vm478_vm1, %v462_v44  ;;  %v697_v8 = vmax.f32 %v612_v58, 0.0  ;;  %v1302_v44 = vadd.f32 %v1270_v35, %v1205_v27  ;;  %v1013_v56 = vadd.f32 %v981_v41, %v884_v40  ;;  %v1625_v58 = vld [vmem:[#allocation2 + $0x32] sm:$0xff]  ;;  %v1303_v23 = vadd.f32 %v1271_v5, %v1206_v11 }
  0xba   : > { %v1658_v9 = vmul.f32 %v4509_v49, %v1625_v58  ;;  %v1368_v12 = vmul.f32 %v1625_v58, %v4482_v21  ;;  %v885_v40 = vmul.f32 %v1431_v52, %v4422_v39  ;;  %v982_v41 = vmul.f32 %v1528_v54, %v4426_v43 }
  0xbb   : > { %v729_v22 = vmin.f32 %v697_v8, 6.0  ;;  %v1399_v59 = vadd.f32 %v1367_v50, %v1302_v44  ;;  %v1496_v8 = vadd.f32 %v1464_v57, %v1398_v51  ;;  %v1110_v17 = vadd.f32 %v1078_v0, %v1013_v56 }
  0xbc   : > { %v4525_v6 = vld [vmem:[#allocation2 + $0x48] sm:$0xff]  ;;  %v1079_v55 = vmul.f32 %v1625_v58, %v4446_v53  ;;  %v1014_v63 = vadd.f32 %v982_v41, %v885_v40 }
  0xbd   : > { %818 = vst.msk [vmem:[#allocation2 + $0x51] sm:$0xff] %vm756_vm2, %v729_v22  ;;  %v4537_v22 = vld [vmem:[%s6272_s4] ss:$0 sm:$0xff]  ;;  %v1466_v24 = vmul.f32 %v4504_v42, %v4525_v6  ;;  %v4547_v32 = vld [vmem:[#allocation2 + $0x49] sm:$0xff]  ;;  %v1176_v0 = vmul.f32 %v4525_v6, %v4464_v3 }
  0xbe   : > { %v614_v60 = vpop.f32.mrf.mxu0  ;;  %v1563_v50 = vmul.f32 %v4507_v46, %v4547_v32  ;;  %v1111_v5 = vadd.f32 %v1079_v55, %v1014_v63  ;;  %v887_v55 = vmul.f32 %v4525_v6, %v4422_v39 }
  0xbf   : > { %v615_v1 = vadd.f32 %v4262_v18, %v614_v60  ;;  %v4514_v60 = vld [vmem:[#allocation2 + $0x38] sm:$0xff] }
  0xc0   : > { %v1465_v2 = vmul.f32 %v4504_v42, %v4514_v60 }
  0xc1   : > { %v698_v10 = vmax.f32 %v615_v1, 0.0  ;;  %3910 = vmatmul.msk.f32.gmra.mxu0 %vm478_vm1, %v463_v4  ;;  %v1561_v1 = vmul.f32 %v4507_v46, %v1528_v54 }
  0xc2   : > { %v1497_v13 = vadd.f32 %v1465_v2, %v1399_v59 }
  0xc3   : > { %v730_v25 = vmin.f32 %v698_v10, 6.0  ;;  %v4529_v10 = vld [vmem:[#allocation2 + $0x3a] sm:$0xff]  ;;  %v1593_v19 = vadd.f32 %v1561_v1, %v1496_v8  ;;  %v886_v8 = vmul.f32 %v4514_v60, %v4422_v39 }
  0xc4   : > { %v1659_v27 = vmul.f32 %v4509_v49, %v4529_v10  ;;  %v4549_v33 = vld [vmem:[#allocation2 + $0x4a] sm:$0xff]  ;;  %v1369_v52 = vmul.f32 %v4529_v10, %v4482_v21 }
  0xc5   : > { %819 = vst.msk [vmem:[#allocation2 + $0x61] sm:$0xff] %vm756_vm2, %v730_v25  ;;  %v1175_v25 = vmul.f32 %v4514_v60, %v4464_v3  ;;  %v1690_v29 = vadd.f32 %v1658_v9, %v1593_v19  ;;  %v4554_v38 = vld [vmem:[#allocation2 + $0x50] sm:$0xff]  ;;  %v1660_v51 = vmul.f32 %v4509_v49, %v4549_v33  ;;  %v983_v9 = vmul.f32 %v4516_v61, %v4426_v43 }
  0xc6   : > { %v617_v26 = vpop.f32.mrf.mxu0  ;;  %v1467_v54 = vmul.f32 %v4504_v42, %v4554_v38  ;;  %v4587_v60 = vld [vmem:[#allocation2 + $0x52] sm:$0xff]  ;;  %v1370_v61 = vmul.f32 %v4549_v33, %v4482_v21  ;;  %v1081_v6 = vmul.f32 %v4549_v33, %v4446_v53 }
  0xc7   : > { %v618_v30 = vadd.f32 %v4262_v18, %v617_v26  ;;  %v1594_v26 = vadd.f32 %v1562_v15, %v1497_v13  ;;  %v1726_v35 = vadd.f32 %v4537_v22, %v1690_v29  ;;  %v1208_v13 = vadd.f32 %v1176_v0, %v1111_v5 }
  0xc8   : > { %v1371_v0 = vmul.f32 %v4587_v60, %v4482_v21 }
  0xc9   : > { %v699_v36 = vmax.f32 %v618_v30, 0.0  ;;  %3911 = vmatmul.msk.f32.gmra.mxu0 %vm478_vm1, %v464_v31  ;;  %v1400_v30 = vadd.f32 %v1368_v12, %v1303_v23  ;;  %v1207_v31 = vadd.f32 %v1175_v25, %v1110_v17  ;;  %v1691_v14 = vadd.f32 %v1659_v27, %v1594_v26  ;;  %v467_v23 = vld [vmem:[%s4173_s15 + $0xd0] sm:$0xff] }
  0xca   : > { %v1758_v48 = vmax.f32 %v1726_v35, 0.0  ;;  %v1273_v17 = vmul.f32 %v4547_v32, %v4480_v20  ;;  %v1080_v26 = vmul.f32 %v4529_v10, %v4446_v53  ;;  %v1177_v27 = vmul.f32 %v4554_v38, %v4464_v3 }
  0xcb   : > { %v731_v47 = vmin.f32 %v699_v36, 6.0  ;;  %v1498_v36 = vadd.f32 %v1466_v24, %v1400_v30  ;;  %v1304_v45 = vadd.f32 %v1272_v34, %v1207_v31  ;;  %v1727_v56 = vadd.f32 %v4537_v22, %v1691_v14 }
  0xcc   : > { %v1790_v59 = vmin.f32 %v1758_v48, 6.0  ;;  %v4583_v19 = vld [vmem:[#allocation2 + $0x60] sm:$0xff]  ;;  %v1015_v24 = vadd.f32 %v983_v9, %v886_v8  ;;  %v1305_v31 = vadd.f32 %v1273_v17, %v1208_v13  ;;  %v1661_v35 = vmul.f32 %v4509_v49, %v4587_v60 }
  0xcd   : > { %820 = vst.msk [vmem:[#allocation2 + $0x69] sm:$0xff] %vm756_vm2, %v731_v47  ;;  %v466_v47 = vld [vmem:[%s4173_s15 + $0xc8] sm:$0xff]  ;;  %v1401_v2 = vadd.f32 %v1369_v52, %v1304_v45  ;;  %v1759_v11 = vmax.f32 %v1727_v56, 0.0  ;;  %v1468_v14 = vmul.f32 %v4504_v42, %v4583_v19  ;;  %v984_v56 = vmul.f32 %v4547_v32, %v4426_v43 }
  0xce   : > { %v620_v62 = vpop.f32.mrf.mxu0  ;;  %3920 = vmatmul.msk.f32.vlgmr.msra.gmra.mxu1 %vm756_vm2, %v1790_v59  ;;  %v1112_v34 = vadd.f32 %v1080_v26, %v1015_v24  ;;  %v4601_v40 = vld [vmem:[#allocation2 + $0x61] sm:$0xff]  ;;  %v468_v59 = vld [vmem:[%s4173_s15 + $0xd8] sm:$0xff]  ;;  %v888_v8 = vmul.f32 %v4554_v38, %v4422_v39 }
  0xcf   : > { %v621_v4 = vadd.f32 %v4262_v18, %v620_v62  ;;  %v1595_v62 = vadd.f32 %v1563_v50, %v1498_v36  ;;  %v1791_v30 = vmin.f32 %v1759_v11, 6.0 }
  0xd1   : > { %v700_v16 = vmax.f32 %v621_v4, 0.0  ;;  %3912 = vmatmul.msk.f32.gmra.mxu0 %vm478_vm1, %v465_v7  ;;  %v1692_v58 = vadd.f32 %v1660_v51, %v1595_v62  ;;  %v1531_v4 = vld [vmem:[#allocation2 + $0x51] sm:$0xff]  ;;  %v1499_v7 = vadd.f32 %v1467_v54, %v1401_v2 }
  0xd2   : > { %v1564_v15 = vmul.f32 %v4507_v46, %v1531_v4  ;;  %v1274_v50 = vmul.f32 %v1531_v4, %v4480_v20  ;;  %v985_v9 = vmul.f32 %v1531_v4, %v4426_v43  ;;  %v1275_v4 = vmul.f32 %v4601_v40, %v4480_v20 }
  0xd3   : > { %v732_v28 = vmin.f32 %v700_v16, 6.0  ;;  %v1728_v25 = vadd.f32 %v4537_v22, %v1692_v58  ;;  %v1178_v58 = vmul.f32 %v4583_v19, %v4464_v3 }
  0xd4   : > { %v4603_v41 = vld [vmem:[#allocation2 + $0x62] sm:$0xff] }
  0xd5   : > { %821 = vst.msk [vmem:[#allocation2 + $0x79] sm:$0xff] %vm756_vm2, %v732_v28  ;;  %v1596_v28 = vadd.f32 %v1564_v15, %v1499_v7  ;;  %v1760_v10 = vmax.f32 %v1728_v25, 0.0  ;;  %v4607_v51 = vld [vmem:[#allocation2 + $0x68] sm:$0xff]  ;;  %v1662_v52 = vmul.f32 %v4509_v49, %v4603_v41  ;;  %v1016_v7 = vadd.f32 %v984_v56, %v887_v55 }
  0xd6   : > { %v623_v37 = vpop.f32.mrf.mxu0  ;;  %3921 = vmatmul.msk.f32.gmra.mxu1 %vm756_vm2, %v1791_v30  ;;  %v1469_v2 = vmul.f32 %v4504_v42, %v4607_v51  ;;  %v1533_v13 = vld [vmem:[#allocation2 + $0x69] sm:$0xff]  ;;  %v1017_v25 = vadd.f32 %v985_v9, %v888_v8  ;;  %v1082_v30 = vmul.f32 %v4587_v60, %v4446_v53  ;;  %v890_v9 = vmul.f32 %v4607_v51, %v4422_v39 }
  0xd7   : > { %v624_v44 = vadd.f32 %v4262_v18, %v623_v37  ;;  %v1402_v37 = vadd.f32 %v1370_v61, %v1305_v31  ;;  %v1693_v45 = vadd.f32 %v1661_v35, %v1596_v28  ;;  %v1792_v62 = vmin.f32 %v1760_v10, 6.0 }
  0xd8   : > { %v1113_v15 = vadd.f32 %v1081_v6, %v1016_v7  ;;  %v1566_v61 = vmul.f32 %v4507_v46, %v1533_v13  ;;  %v1179_v31 = vmul.f32 %v4607_v51, %v4464_v3 }
  0xd9   : > { %v701_v57 = vmax.f32 %v624_v44, 0.0  ;;  %3913 = vmatmul.msk.f32.gmra.mxu0 %vm478_vm1, %v466_v47  ;;  %v1209_v44 = vadd.f32 %v1177_v27, %v1112_v34  ;;  %v1500_v47 = vadd.f32 %v1468_v14, %v1402_v37  ;;  %v469_v27 = vld [vmem:[%s4173_s15 + $0xe0] sm:$0xff]  ;;  %v1630_v34 = vld [vmem:[#allocation2 + $0x6a] sm:$0xff] }
  0xda   : > { %v1210_v24 = vadd.f32 %v1178_v58, %v1113_v15  ;;  %v1663_v60 = vmul.f32 %v4509_v49, %v1630_v34  ;;  %v1373_v7 = vmul.f32 %v1630_v34, %v4482_v21 }
  0xdb   : > { %v733_v1 = vmin.f32 %v701_v57, 6.0  ;;  %v1565_v57 = vmul.f32 %v4507_v46, %v4601_v40  ;;  %v1306_v63 = vadd.f32 %v1274_v50, %v1209_v44  ;;  %v1114_v44 = vadd.f32 %v1082_v30, %v1017_v25 }
  0xdc   : > { %v4638_v26 = vld [vmem:[#allocation2 + $0x78] sm:$0xff]  ;;  %v1307_v10 = vadd.f32 %v1275_v4, %v1210_v24  ;;  %v1084_v30 = vmul.f32 %v1630_v34, %v4446_v53 }
  0xdd   : > { %822 = vst.msk [vmem:[#allocation2 + $0x81] sm:$0xff] %vm756_vm2, %v733_v1  ;;  %v1729_v1 = vadd.f32 %v4537_v22, %v1693_v45  ;;  %v1597_v5 = vadd.f32 %v1565_v57, %v1500_v47  ;;  %v1470_v37 = vmul.f32 %v4504_v42, %v4638_v26  ;;  %v4653_v50 = vld [vmem:[#allocation2 + $0x79] sm:$0xff]  ;;  %v1211_v56 = vadd.f32 %v1179_v31, %v1114_v44 }
  0xde   : > { %v626_v12 = vpop.f32.mrf.mxu0  ;;  %3922 = vmatmul.msk.f32.gmra.mxu1 %vm756_vm2, %v1792_v62  ;;  %v1276_v57 = vmul.f32 %v1533_v13, %v4480_v20  ;;  %v889_v62 = vmul.f32 %v4583_v19, %v4422_v39  ;;  %v1083_v19 = vmul.f32 %v4603_v41, %v4446_v53 }
  0xdf   : > { %v627_v16 = vadd.f32 %v4262_v18, %v626_v12  ;;  %v1694_v33 = vadd.f32 %v1662_v52, %v1597_v5  ;;  %v1403_v12 = vadd.f32 %v1371_v0, %v1306_v63  ;;  %v986_v63 = vmul.f32 %v4601_v40, %v4426_v43 }
  0xe0   : > { %v1567_v0 = vmul.f32 %v4507_v46, %v4653_v50  ;;  %v1308_v5 = vadd.f32 %v1276_v57, %v1211_v56  ;;  %v1180_v40 = vmul.f32 %v4638_v26, %v4464_v3 }
  0xe1   : > { %v702_v29 = vmax.f32 %v627_v16, 0.0  ;;  %3914 = vmatmul.msk.f32.gmra.mxu0 %vm478_vm1, %v467_v23  ;;  %v1761_v16 = vmax.f32 %v1729_v1, 0.0  ;;  %v1501_v17 = vadd.f32 %v1469_v2, %v1403_v12  ;;  %v1730_v28 = vadd.f32 %v4537_v22, %v1694_v33  ;;  %v470_v2 = vld [vmem:[%s4173_s15 + $0xe8] sm:$0xff] }
  0xe3   : > { %v734_v36 = vmin.f32 %v702_v29, 6.0  ;;  %v1372_v29 = vmul.f32 %v4603_v41, %v4482_v21  ;;  %v1793_v14 = vmin.f32 %v1761_v16, 6.0  ;;  %v1762_v47 = vmax.f32 %v1730_v28, 0.0 }
  0xe4   : > { %v4655_v55 = vld [vmem:[#allocation2 + $0x7a] sm:$0xff]  ;;  %v1018_v16 = vadd.f32 %v986_v63, %v889_v62 }
  0xe5   : > { %823 = vst.msk [vmem:[#allocation2 + $0x91] sm:$0xff] %vm756_vm2, %v734_v36  ;;  %v1598_v36 = vadd.f32 %v1566_v61, %v1501_v17  ;;  %v1664_v6 = vmul.f32 %v4509_v49, %v4655_v55  ;;  %v1794_v58 = vmin.f32 %v1762_v47, 6.0  ;;  %v1535_v51 = vld [vmem:[#allocation2 + $0x81] sm:$0xff] }
  0xe6   : > { %v629_v48 = vpop.f32.mrf.mxu0  ;;  %3923 = vmatmul.msk.f32.gmra.mxu1 %vm756_vm2, %v1793_v14  ;;  %v1115_v24 = vadd.f32 %v1083_v19, %v1018_v16 }
  0xe7   : > { %v630_v54 = vadd.f32 %v4262_v18, %v629_v48  ;;  %v1404_v48 = vadd.f32 %v1372_v29, %v1307_v10  ;;  %v1695_v52 = vadd.f32 %v1663_v60, %v1598_v36  ;;  %v471_v29 = vld [vmem:[%s4173_s15 + $0xf0] sm:$0xff]  ;;  %v1277_v36 = vmul.f32 %v4653_v50, %v4480_v20 }
  0xe8   : > { %v1212_v4 = vadd.f32 %v1180_v40, %v1115_v24  ;;  %v1374_v10 = vmul.f32 %v4655_v55, %v4482_v21  ;;  %v472_v40 = vld [vmem:[%s4173_s15 + $0xf8] sm:$0xff]  ;;  %v989_v24 = vmul.f32 %v1535_v51, %v4426_v43 }
  0xe9   : > { %v703_v32 = vmax.f32 %v630_v54, 0.0  ;;  %3915 = vmatmul.msk.f32.gmra.mxu0 %vm478_vm1, %v468_v59  ;;  %v1502_v54 = vadd.f32 %v1470_v37, %v1404_v48  ;;  %v1731_v33 = vadd.f32 %v4537_v22, %v1695_v52  ;;  %v1632_v37 = vld [vmem:[#allocation2 + $0x82] sm:$0xff] }
  0xea   : > { %v1309_v48 = vadd.f32 %v1277_v36, %v1212_v4 }
  0xeb   : > { %v735_v11 = vmin.f32 %v703_v32, 6.0  ;;  %v4668_v32 = vld [vmem:[#allocation2 + $0x80] sm:$0xff]  ;;  %v1599_v12 = vadd.f32 %v1567_v0, %v1502_v54  ;;  %v1763_v25 = vmax.f32 %v1731_v33, 0.0  ;;  %v1665_v54 = vmul.f32 %v4509_v49, %v1632_v37 }
  0xec   : > { %v1471_v15 = vmul.f32 %v4504_v42, %v4668_v32  ;;  %v4686_v28 = vld [vmem:[#allocation2 + $0x90] sm:$0xff]  ;;  %v1181_v31 = vmul.f32 %v4668_v32, %v4464_v3  ;;  %v1278_v0 = vmul.f32 %v1535_v51, %v4480_v20 }
  0xed   : > { %824 = vst.msk [vmem:[#allocation2 + $0x99] sm:$0xff] %vm756_vm2, %v735_v11  ;;  %v987_v11 = vmul.f32 %v1533_v13, %v4426_v43  ;;  %v1696_v17 = vadd.f32 %v1664_v6, %v1599_v12  ;;  %v1795_v47 = vmin.f32 %v1763_v25, 6.0  ;;  %v1472_v34 = vmul.f32 %v4504_v42, %v4686_v28  ;;  %v4704_v62 = vld [vmem:[#allocation2 + $0x91] sm:$0xff] }
  0xee   : > { %v632_v23 = vpop.f32.mrf.mxu0  ;;  %3924 = vmatmul.msk.f32.gmra.mxu1 %vm756_vm2, %v1794_v58  ;;  %v891_v6 = vmul.f32 %v4638_v26, %v4422_v39  ;;  %v1569_v33 = vmul.f32 %v4507_v46, %v4704_v62  ;;  %v1279_v36 = vmul.f32 %v4704_v62, %v4480_v20 }
  0xef   : > { %v633_v38 = vadd.f32 %v4262_v18, %v632_v23  ;;  %v1405_v23 = vadd.f32 %v1373_v7, %v1308_v5  ;;  %v1019_v13 = vadd.f32 %v987_v11, %v890_v9  ;;  %v1732_v14 = vadd.f32 %v4537_v22, %v1696_v17 }
  0xf0   : > { %v1085_v9 = vmul.f32 %v4655_v55, %v4446_v53 }
  0xf1   : > { %v704_v35 = vmax.f32 %v633_v38, 0.0  ;;  %3916 = vmatmul.msk.f32.gmra.mxu0 %vm478_vm1, %v469_v27  ;;  %v1503_v61 = vadd.f32 %v1471_v15, %v1405_v23  ;;  %v1764_v52 = vmax.f32 %v1732_v14, 0.0  ;;  %v892_v23 = vmul.f32 %v4668_v32, %v4422_v39 }
  0xf3   : > { %v736_v45 = vmin.f32 %v704_v35, 6.0  ;;  %v1568_v35 = vmul.f32 %v4507_v46, %v1535_v51  ;;  %v1796_v11 = vmin.f32 %v1764_v52, 6.0 }
  0xf4   : > { %v4706_v63 = vld [vmem:[#allocation2 + $0x92] sm:$0xff] }
  0xf5   : > { %825 = vst.msk [vmem:[#allocation2 + $0xa9] sm:$0xff] %vm756_vm2, %v736_v45  ;;  %v1116_v45 = vadd.f32 %v1084_v30, %v1019_v13  ;;  %v1600_v60 = vadd.f32 %v1568_v35, %v1503_v61  ;;  %v4713_v7 = vld [vmem:[#allocation2 + $0x98] sm:$0xff]  ;;  %v1666_v26 = vmul.f32 %v4509_v49, %v4706_v63  ;;  %v1021_v35 = vadd.f32 %v989_v24, %v892_v23 }
  0xf6   : > { %v635_v59 = vpop.f32.mrf.mxu0  ;;  %3925 = vmatmul.msk.f32.gmra.mxu1 %vm756_vm2, %v1795_v47  ;;  %v1473_v15 = vmul.f32 %v4504_v42, %v4713_v7  ;;  %v1537_v4 = vld [vmem:[#allocation2 + $0x99] sm:$0xff]  ;;  %v1086_v47 = vmul.f32 %v1632_v37, %v4446_v53 }
  0xf7   : > { %v636_v1 = vadd.f32 %v4262_v18, %v635_v59  ;;  %v1213_v57 = vadd.f32 %v1181_v31, %v1116_v45  ;;  %v1406_v59 = vadd.f32 %v1374_v10, %v1309_v48  ;;  %v1570_v32 = vmul.f32 %v4507_v46, %v1537_v4  ;;  %v1634_v45 = vld [vmem:[#allocation2 + $0x9a] sm:$0xff] }
  0xf8   : > { %v1376_v10 = vmul.f32 %v4706_v63, %v4482_v21  ;;  %v991_v23 = vmul.f32 %v1537_v4, %v4426_v43  ;;  %v1377_v24 = vmul.f32 %v1634_v45, %v4482_v21 }
  0xf9   : > { %v705_v8 = vmax.f32 %v636_v1, 0.0  ;;  %3917 = vmatmul.msk.f32.gmra.mxu0 %vm478_vm1, %v470_v2  ;;  %v988_v1 = vmul.f32 %v4653_v50, %v4426_v43  ;;  %v1697_v2 = vadd.f32 %v1665_v54, %v1600_v60  ;;  %v1504_v58 = vadd.f32 %v1472_v34, %v1406_v59 }
  0xfa   : > { %v1375_v50 = vmul.f32 %v1632_v37, %v4482_v21  ;;  %v1183_v60 = vmul.f32 %v4713_v7, %v4464_v3  ;;  %v1118_v54 = vadd.f32 %v1086_v47, %v1021_v35  ;;  %v1667_v59 = vmul.f32 %v4509_v49, %v1634_v45  ;;  %v4787_v47 = vld [vmem:[%s6270_s2] ss:$0 sm:$0xff] }
  0xfb   : > { %v737_v41 = vmin.f32 %v705_v8, 6.0  ;;  %v1310_v8 = vadd.f32 %v1278_v0, %v1213_v57  ;;  %v1020_v16 = vadd.f32 %v988_v1, %v891_v6  ;;  %v1733_v17 = vadd.f32 %v4537_v22, %v1697_v2 }
  0xfc   : > { %v1601_v55 = vadd.f32 %v1569_v33, %v1504_v58  ;;  %v4735_v14 = vld [vmem:[#allocation2 + $0xa8] sm:$0xff]  ;;  %v1215_v58 = vadd.f32 %v1183_v60, %v1118_v54 }
  0xfd   : > { %826 = vst.msk [vmem:[#allocation2 + $0xb1] sm:$0xff] %vm756_vm2, %v737_v41  ;;  %v1182_v41 = vmul.f32 %v4686_v28, %v4464_v3  ;;  %v1407_v25 = vadd.f32 %v1375_v50, %v1310_v8  ;;  %v1117_v61 = vadd.f32 %v1085_v9, %v1020_v16  ;;  %v1765_v30 = vmax.f32 %v1733_v17, 0.0  ;;  %v1538_v2 = vld [vmem:[#allocation2 + $0xa9] sm:$0xff] }
  0xfe   : > { %v638_v38 = vpop.f32.mrf.mxu0  ;;  %3926 = vmatmul.msk.f32.gmra.mxu1 %vm756_vm2, %v1796_v11  ;;  %v1474_v57 = vmul.f32 %v4504_v42, %v4735_v14  ;;  %v893_v9 = vmul.f32 %v4686_v28, %v4422_v39  ;;  %v990_v11 = vmul.f32 %v4704_v62, %v4426_v43  ;;  %v1571_v33 = vmul.f32 %v4507_v46, %v1538_v2 }
  0xff   : > { %v639_v27 = vadd.f32 %v4262_v18, %v638_v38  ;;  %v1698_v38 = vadd.f32 %v1666_v26, %v1601_v55  ;;  %v1797_v52 = vmin.f32 %v1765_v30, 6.0  ;;  %v894_v28 = vmul.f32 %v4713_v7, %v4422_v39 }
 0x101   : > { %v706_v44 = vmax.f32 %v639_v27, 0.0  ;;  %3918 = vmatmul.msk.f32.gmra.mxu0 %vm478_vm1, %v471_v29  ;;  %v1505_v27 = vadd.f32 %v1473_v15, %v1407_v25  ;;  %v1214_v29 = vadd.f32 %v1182_v41, %v1117_v61  ;;  %v1087_v41 = vmul.f32 %v4706_v63, %v4446_v53 }
 0x102   : > { %v1184_v25 = vmul.f32 %v4735_v14, %v4464_v3 }
 0x103   : > { %v738_v56 = vmin.f32 %v706_v44, 6.0  ;;  %v1734_v44 = vadd.f32 %v4537_v22, %v1698_v38  ;;  %v1602_v48 = vadd.f32 %v1570_v32, %v1505_v27 }
 0x104   : > { %v4751_v37 = vld [vmem:[#allocation2 + $0xaa] sm:$0xff] }
 0x105   : > { %827 = vst.msk [vmem:[#allocation2 + $0xc1] sm:$0xff] %vm756_vm2, %v738_v56  ;;  %v1311_v56 = vadd.f32 %v1279_v36, %v1214_v29  ;;  %v1766_v1 = vmax.f32 %v1734_v44, 0.0  ;;  %v1668_v26 = vmul.f32 %v4509_v49, %v4751_v37  ;;  %v1539_v29 = vld [vmem:[#allocation2 + $0xb1] sm:$0xff] }
 0x106   : > { %v641_v5 = vpop.f32.mrf.mxu0  ;;  %3927 = vmatmul.msk.f32.gmra.mxu1 %vm756_vm2, %v1797_v52  ;;  %v1572_v44 = vmul.f32 %v4507_v46, %v1539_v29 }
 0x107   : > { %v642_v19 = vadd.f32 %v4262_v18, %v641_v5  ;;  %v1408_v6 = vadd.f32 %v1376_v10, %v1311_v56  ;;  %v1699_v5 = vadd.f32 %v1667_v59, %v1602_v48  ;;  %v1798_v15 = vmin.f32 %v1766_v1, 6.0 }
 0x108   : > { %v1088_v10 = vmul.f32 %v1634_v45, %v4446_v53  ;;  %v1378_v48 = vmul.f32 %v4751_v37, %v4482_v21  ;;  %v895_v1 = vmul.f32 %v4735_v14, %v4422_v39 }
 0x109   : > { %v707_v12 = vmax.f32 %v642_v19, 0.0  ;;  %3919 = vmatmul.msk.f32.gmra.mxu0 %vm478_vm1, %v472_v40  ;;  %v1506_v19 = vadd.f32 %v1474_v57, %v1408_v6  ;;  %v1280_v40 = vmul.f32 %v1537_v4, %v4480_v20  ;;  %v1735_v17 = vadd.f32 %v4537_v22, %v1699_v5  ;;  %v1636_v57 = vld [vmem:[#allocation2 + $0xb2] sm:$0xff] }
 0x10a   : > { %v1023_v4 = vadd.f32 %v991_v23, %v894_v28  ;;  %v1669_v5 = vmul.f32 %v4509_v49, %v1636_v57  ;;  %v1379_v23 = vmul.f32 %v1636_v57, %v4482_v21 }
 0x10b   : > { %v739_v13 = vmin.f32 %v707_v12, 6.0  ;;  %v4763_v12 = vld [vmem:[#allocation2 + $0xb0] sm:$0xff]  ;;  %v1312_v16 = vadd.f32 %v1280_v40, %v1215_v58  ;;  %v1603_v62 = vadd.f32 %v1571_v33, %v1506_v19  ;;  %v1767_v27 = vmax.f32 %v1735_v17, 0.0 }
 0x10c   : > { %v4780_v36 = vld [vmem:[#allocation2 + $0xc0] sm:$0xff]  ;;  %v1120_v52 = vadd.f32 %v1088_v10, %v1023_v4  ;;  %v992_v58 = vmul.f32 %v1538_v2, %v4426_v43 }
 0x10d   : > { %828 = vst.msk [vmem:[#allocation2 + $0xc9] sm:$0xff] %vm756_vm2, %v739_v13  ;;  %v1022_v13 = vadd.f32 %v990_v11, %v893_v9  ;;  %v1700_v61 = vadd.f32 %v1668_v26, %v1603_v62  ;;  %v1409_v7 = vadd.f32 %v1377_v24, %v1312_v16  ;;  %v1799_v56 = vmin.f32 %v1767_v27, 6.0  ;;  %v4801_v9 = vld [vmem:[#allocation2 + $0xc1] sm:$0xff] }
 0x10e   : > { %v644_v31 = vpop.f32.mrf.mxu0  ;;  %3928 = vmatmul.msk.f32.gmra.mxu1 %vm756_vm2, %v1798_v15  ;;  %v1024_v16 = vadd.f32 %v992_v58, %v895_v1  ;;  %v1573_v28 = vmul.f32 %v4507_v46, %v4801_v9  ;;  %v1186_v24 = vmul.f32 %v4780_v36, %v4464_v3  ;;  %v1283_v10 = vmul.f32 %v4801_v9, %v4480_v20 }
 0x10f   : > { %v645_v51 = vadd.f32 %v4262_v18, %v644_v31  ;;  %v1119_v38 = vadd.f32 %v1087_v41, %v1022_v13  ;;  %v1736_v35 = vadd.f32 %v4537_v22, %v1700_v61  ;;  %v1089_v41 = vmul.f32 %v4751_v37, %v4446_v53 }
 0x110   : > { %v993_v13 = vmul.f32 %v1539_v29, %v4426_v43 }
 0x111   : > { %v708_v34 = vmax.f32 %v645_v51, 0.0  ;;  %v1216_v31 = vadd.f32 %v1184_v25, %v1119_v38  ;;  %v1281_v51 = vmul.f32 %v1538_v2, %v4480_v20  ;;  %v1768_v6 = vmax.f32 %v1736_v35, 0.0 }
 0x113   : > { %v740_v0 = vmin.f32 %v708_v34, 6.0  ;;  %v1185_v34 = vmul.f32 %v4763_v12, %v4464_v3  ;;  %v1313_v59 = vadd.f32 %v1281_v51, %v1216_v31  ;;  %v1800_v14 = vmin.f32 %v1768_v6, 6.0 }
 0x114   : > { %v4803_v11 = vld [vmem:[#allocation2 + $0xc2] sm:$0xff] }
 0x115   : > { %829 = vst.msk [vmem:[#allocation2 + $0xd9] sm:$0xff] %vm756_vm2, %v740_v0  ;;  %v1476_v0 = vmul.f32 %v4504_v42, %v4780_v36  ;;  %v1217_v40 = vadd.f32 %v1185_v34, %v1120_v52  ;;  %v4807_v2 = vld [vmem:[#allocation2 + $0xc8] sm:$0xff]  ;;  %v1670_v17 = vmul.f32 %v4509_v49, %v4803_v11 }
 0x116   : > { %v647_v8 = vpop.f32.mrf.mxu0  ;;  %3929 = vmatmul.msk.f32.gmra.mxu1 %vm756_vm2, %v1799_v56 }
 0x117   : > { %v648_v50 = vadd.f32 %v4262_v18, %v647_v8  ;;  %v1475_v18 = vmul.f32 %v4504_v42, %v4763_v12  ;;  %v1410_v8 = vadd.f32 %v1378_v48, %v1313_v59  ;;  %v1187_v48 = vmul.f32 %v4807_v2, %v4464_v3 }
 0x119   : > { %v709_v55 = vmax.f32 %v648_v50, 0.0  ;;  %v1507_v30 = vadd.f32 %v1475_v18, %v1409_v7  ;;  %v1508_v26 = vadd.f32 %v1476_v0, %v1410_v8  ;;  %v1282_v50 = vmul.f32 %v1539_v29, %v4480_v20 }
 0x11a   : > { %v896_v18 = vmul.f32 %v4763_v12, %v4422_v39  ;;  %v1121_v7 = vadd.f32 %v1089_v41, %v1024_v16  ;;  %v897_v41 = vmul.f32 %v4780_v36, %v4422_v39 }
 0x11b   : > { %v741_v63 = vmin.f32 %v709_v55, 6.0  ;;  %v1604_v54 = vadd.f32 %v1572_v44, %v1507_v30  ;;  %v1314_v55 = vadd.f32 %v1282_v50, %v1217_v40  ;;  %v1605_v25 = vadd.f32 %v1573_v28, %v1508_v26  ;;  %v1541_v30 = vld [vmem:[#allocation2 + $0xc9] sm:$0xff] }
 0x11c   : > { %v1218_v31 = vadd.f32 %v1186_v24, %v1121_v7  ;;  %v1025_v35 = vadd.f32 %v993_v13, %v896_v18  ;;  %v4827_v29 = vld [vmem:[#allocation2 + $0xd8] sm:$0xff]  ;;  %v1380_v44 = vmul.f32 %v4803_v11, %v4482_v21  ;;  %v1574_v56 = vmul.f32 %v4507_v46, %v1541_v30 }
 0x11d   : > { %830 = vst.msk [vmem:[#allocation2 + $0xe1] sm:$0xff] %vm756_vm2, %v741_v63  ;;  %v1701_v33 = vadd.f32 %v1669_v5, %v1604_v54  ;;  %v1477_v63 = vmul.f32 %v4504_v42, %v4807_v2  ;;  %v1702_v38 = vadd.f32 %v1670_v17, %v1605_v25  ;;  %v1411_v4 = vadd.f32 %v1379_v23, %v1314_v55  ;;  %v1638_v54 = vld [vmem:[#allocation2 + $0xca] sm:$0xff] }
 0x11e   : > { %v650_v32 = vpop.f32.mrf.mxu0  ;;  %3930 = vmatmul.msk.f32.gmra.mxu1 %vm756_vm2, %v1800_v14  ;;  %v1478_v59 = vmul.f32 %v4504_v42, %v4827_v29  ;;  %v1671_v8 = vmul.f32 %v4509_v49, %v1638_v54  ;;  %v1284_v14 = vmul.f32 %v1541_v30, %v4480_v20  ;;  %v994_v28 = vmul.f32 %v4801_v9, %v4426_v43 }
 0x11f   : > { %v651_v60 = vadd.f32 %v4787_v47, %v650_v32  ;;  %v1737_v37 = vadd.f32 %v4537_v22, %v1701_v33  ;;  %v1509_v12 = vadd.f32 %v1477_v63, %v1411_v4  ;;  %v1738_v34 = vadd.f32 %v4537_v22, %v1702_v38  ;;  %v1542_v33 = vld [vmem:[#allocation2 + $0xd9] sm:$0xff] }
 0x120   : > { %v1575_v17 = vmul.f32 %v4507_v46, %v1542_v33  ;;  %v1381_v13 = vmul.f32 %v1638_v54, %v4482_v21  ;;  %v898_v9 = vmul.f32 %v4807_v2, %v4422_v39  ;;  %v1026_v38 = vadd.f32 %v994_v28, %v897_v41 }
 0x121   : > { %v710_v45 = vmax.f32 %v651_v60, 0.0  ;;  %v1769_v32 = vmax.f32 %v1737_v37, 0.0  ;;  %v1090_v60 = vmul.f32 %v1636_v57, %v4446_v53  ;;  %v1606_v1 = vadd.f32 %v1574_v56, %v1509_v12 }
 0x122   : > { %v1091_v37 = vmul.f32 %v4803_v11, %v4446_v53 }
 0x123   : > { %v742_v19 = vmin.f32 %v710_v45, 6.0  ;;  %v1315_v45 = vadd.f32 %v1283_v10, %v1218_v31  ;;  %v1122_v0 = vadd.f32 %v1090_v60, %v1025_v35  ;;  %v1801_v6 = vmin.f32 %v1769_v32, 6.0 }
 0x124   : > { %v4843_v26 = vld [vmem:[#allocation2 + $0xda] sm:$0xff]  ;;  %v1123_v32 = vadd.f32 %v1091_v37, %v1026_v38  ;;  %v1640_v56 = vld [vmem:[#allocation2 + $0xe2] sm:$0xff] }
 0x125   : > { %831 = vst.msk [vmem:[#allocation2 + $0xf1] sm:$0xff] %vm756_vm2, %v742_v19  ;;  %v1412_v5 = vadd.f32 %v1380_v44, %v1315_v45  ;;  %v1219_v57 = vadd.f32 %v1187_v48, %v1122_v0  ;;  %v1770_v19 = vmax.f32 %v1738_v34, 0.0  ;;  %v4847_v16 = vld [vmem:[#allocation2 + $0xe0] sm:$0xff]  ;;  %v1092_v34 = vmul.f32 %v1638_v54, %v4446_v53 }
 0x126   : > { %v653_v15 = vpop.f32.mrf.mxu0  ;;  %3931 = vmatmul.msk.f32.gmra.mxu1 %vm756_vm2, %v1801_v6  ;;  %v1479_v36 = vmul.f32 %v4504_v42, %v4847_v16  ;;  %v1543_v35 = vld [vmem:[#allocation2 + $0xe1] sm:$0xff]  ;;  %v1285_v45 = vmul.f32 %v1542_v33, %v4480_v20  ;;  %v1189_v0 = vmul.f32 %v4847_v16, %v4464_v3  ;;  %v1093_v37 = vmul.f32 %v4843_v26, %v4446_v53 }
 0x127   : > { %v654_v62 = vadd.f32 %v4787_v47, %v653_v15  ;;  %v1510_v50 = vadd.f32 %v1478_v59, %v1412_v5  ;;  %v1703_v15 = vadd.f32 %v1671_v8, %v1606_v1  ;;  %v1316_v23 = vadd.f32 %v1284_v14, %v1219_v57 }
 0x128   : > { %v1802_v24 = vmin.f32 %v1770_v19, 6.0  ;;  %v1576_v44 = vmul.f32 %v4507_v46, %v1543_v35  ;;  %v1382_v59 = vmul.f32 %v4843_v26, %v4482_v21  ;;  %v1673_v8 = vmul.f32 %v4509_v49, %v1640_v56 }
 0x129   : > { %v711_v61 = vmax.f32 %v654_v62, 0.0  ;;  %v1672_v62 = vmul.f32 %v4509_v49, %v4843_v26  ;;  %v1607_v25 = vadd.f32 %v1575_v17, %v1510_v50  ;;  %v1739_v63 = vadd.f32 %v4537_v22, %v1703_v15 }
 0x12a   : > { %v1413_v31 = vadd.f32 %v1381_v13, %v1316_v23  ;;  %v996_v50 = vmul.f32 %v1542_v33, %v4426_v43  ;;  %v2134_v23 = vld [vmem:[%s6275_s7] sm:$0xf]  ;;  %v900_v38 = vmul.f32 %v4847_v16, %v4422_v39 }
 0x12b   : > { %v743_v27 = vmin.f32 %v711_v61, 6.0  ;;  %v995_v61 = vmul.f32 %v1541_v30, %v4426_v43  ;;  %v1704_v4 = vadd.f32 %v1672_v62, %v1607_v25  ;;  %v1771_v10 = vmax.f32 %v1739_v63, 0.0  ;;  %3952 = vmatpush.msk.msra.mxu2 %vm575_vm0, %v2134_v23 }
 0x12c   : > { %v1511_v12 = vadd.f32 %v1479_v36, %v1413_v31  ;;  %v4872_v48 = vld [vmem:[#allocation2 + $0xf0] sm:$0xff] }
 0x12d   : > { %832 = vst.msk [vmem:[#allocation2 + $0xf9] sm:$0xff] %vm756_vm2, %v743_v27  ;;  %v1188_v27 = vmul.f32 %v4827_v29, %v4464_v3  ;;  %v1740_v30 = vadd.f32 %v4537_v22, %v1704_v4  ;;  %v1480_v19 = vmul.f32 %v4504_v42, %v4872_v48  ;;  %v1544_v17 = vld [vmem:[#allocation2 + $0xf1] sm:$0xff] }
 0x12e   : > { %v656_v51 = vpop.f32.mrf.mxu0  ;;  %3932 = vmatmul.msk.f32.gmra.mxu1 %vm756_vm2, %v1802_v24  ;;  %v1608_v6 = vadd.f32 %v1576_v44, %v1511_v12  ;;  %v1577_v25 = vmul.f32 %v4507_v46, %v1544_v17 }
 0x12f   : > { %v657_v52 = vadd.f32 %v4787_v47, %v656_v51  ;;  %v1027_v51 = vadd.f32 %v995_v61, %v898_v9  ;;  %v1220_v2 = vadd.f32 %v1188_v27, %v1123_v32  ;;  %v1772_v54 = vmax.f32 %v1740_v30, 0.0 }
 0x130   : > { %v1705_v28 = vadd.f32 %v1673_v8, %v1608_v6  ;;  %v997_v27 = vmul.f32 %v1543_v35, %v4426_v43 }
 0x131   : > { %v712_v58 = vmax.f32 %v657_v52, 0.0  ;;  %v1124_v1 = vadd.f32 %v1092_v34, %v1027_v51  ;;  %v1317_v57 = vadd.f32 %v1285_v45, %v1220_v2  ;;  %v1804_v24 = vmin.f32 %v1772_v54, 6.0 }
 0x132   : > { %v1741_v63 = vadd.f32 %v4537_v22, %v1705_v28  ;;  %v1029_v44 = vadd.f32 %v997_v27, %v900_v38  ;;  %v1287_v34 = vmul.f32 %v1544_v17, %v4480_v20  ;;  %v1094_v45 = vmul.f32 %v1640_v56, %v4446_v53 }
 0x133   : > { %v744_v40 = vmin.f32 %v712_v58, 6.0  ;;  %v1803_v58 = vmin.f32 %v1771_v10, 6.0  ;;  %v1414_v15 = vadd.f32 %v1382_v59, %v1317_v57  ;;  %v1221_v41 = vadd.f32 %v1189_v0, %v1124_v1 }
 0x134   : > { %v4888_v62 = vld [vmem:[#allocation2 + $0xf2] sm:$0xff]  ;;  %v1773_v2 = vmax.f32 %v1741_v63, 0.0  ;;  %v1642_v57 = vld [vmem:[#allocation2 + $0xfa] sm:$0xff] }
 0x135   : > { %833 = vst.msk [vmem:[#allocation2 + $0x109] sm:$0xff] %vm756_vm2, %v744_v40  ;;  %v899_v40 = vmul.f32 %v4827_v29, %v4422_v39  ;;  %v1286_v29 = vmul.f32 %v1543_v35, %v4480_v20  ;;  %v1674_v36 = vmul.f32 %v4509_v49, %v4888_v62  ;;  %v1545_v30 = vld [vmem:[#allocation2 + $0xf9] sm:$0xff] }
 0x136   : > { %v659_v55 = vpop.f32.mrf.mxu0  ;;  %3933 = vmatmul.msk.f32.gmra.mxu1 %vm756_vm2, %v1803_v58  ;;  %v1578_v6 = vmul.f32 %v4507_v46, %v1545_v30  ;;  %v1384_v58 = vmul.f32 %v4888_v62, %v4482_v21 }
 0x137   : > { %v660_v18 = vadd.f32 %v4787_v47, %v659_v55  ;;  %v1512_v55 = vadd.f32 %v1480_v19, %v1414_v15  ;;  %v1028_v13 = vadd.f32 %v996_v50, %v899_v40  ;;  %v1318_v61 = vadd.f32 %v1286_v29, %v1221_v41 }
 0x138   : > { %v1126_v19 = vadd.f32 %v1094_v45, %v1029_v44  ;;  %v1675_v41 = vmul.f32 %v4509_v49, %v1642_v57 }
 0x139   : > { %v713_v7 = vmax.f32 %v660_v18, 0.0  ;;  %v4896_v18 = vld [vmem:[#allocation2 + $0xf8] sm:$0xff]  ;;  %v1609_v4 = vadd.f32 %v1577_v25, %v1512_v55  ;;  %v1125_v10 = vadd.f32 %v1093_v37, %v1028_v13 }
 0x13a   : > { %v1481_v26 = vmul.f32 %v4504_v42, %v4896_v18  ;;  %v1191_v59 = vmul.f32 %v4896_v18, %v4464_v3 }
 0x13b   : > { %v745_v11 = vmin.f32 %v713_v7, 6.0  ;;  %v1383_v7 = vmul.f32 %v1640_v56, %v4482_v21  ;;  %v1706_v32 = vadd.f32 %v1674_v36, %v1609_v4  ;;  %v1385_v36 = vmul.f32 %v1642_v57, %v4482_v21 }
 0x13c   : > { %v1223_v50 = vadd.f32 %v1191_v59, %v1126_v19  ;;  %v4933_v23 = vld [vmem:[#allocation2 + $0x109] sm:$0xff] }
 0x13d   : > { %834 = vst.msk [vmem:[#allocation2 + $0x111] sm:$0xff] %vm756_vm2, %v745_v11  ;;  %v1190_v11 = vmul.f32 %v4872_v48, %v4464_v3  ;;  %v1415_v51 = vadd.f32 %v1383_v7, %v1318_v61  ;;  %v1742_v0 = vadd.f32 %v4537_v22, %v1706_v32  ;;  %v901_v22 = vmul.f32 %v4872_v48, %v4422_v39 }
 0x13e   : > { %v662_v60 = vpop.f32.mrf.mxu0  ;;  %3934 = vmatmul.msk.f32.gmra.mxu1 %vm756_vm2, %v1804_v24  ;;  %v1288_v24 = vmul.f32 %v1545_v30, %v4480_v20  ;;  %v1095_v61 = vmul.f32 %v4888_v62, %v4446_v53  ;;  %v1579_v7 = vmul.f32 %v4507_v46, %v4933_v23  ;;  %v902_v62 = vmul.f32 %v4896_v18, %v4422_v39 }
 0x13f   : > { %v663_v52 = vadd.f32 %v4787_v47, %v662_v60  ;;  %v1513_v16 = vadd.f32 %v1481_v26, %v1415_v51  ;;  %v1222_v35 = vadd.f32 %v1190_v11, %v1125_v10  ;;  %v1774_v15 = vmax.f32 %v1742_v0, 0.0 }
 0x140   : > { %v1320_v25 = vadd.f32 %v1288_v24, %v1223_v50  ;;  %v999_v11 = vmul.f32 %v1545_v30, %v4426_v43 }
 0x141   : > { %v714_v5 = vmax.f32 %v663_v52, 0.0  ;;  %v4916_v52 = vld [vmem:[#allocation2 + $0x108] sm:$0xff]  ;;  %v1610_v54 = vadd.f32 %v1578_v6, %v1513_v16  ;;  %v1319_v40 = vadd.f32 %v1287_v34, %v1222_v35  ;;  %v1806_v63 = vmin.f32 %v1774_v15, 6.0  ;;  %v4038_v35 = vld [vmem:[%s4173_s15] sm:$0xff] }
 0x142   : > { %v1482_v56 = vmul.f32 %v4504_v42, %v4916_v52  ;;  %v1192_v26 = vmul.f32 %v4916_v52, %v4464_v3  ;;  %v1417_v44 = vadd.f32 %v1385_v36, %v1320_v25  ;;  %v1031_v0 = vadd.f32 %v999_v11, %v902_v62 }
 0x143   : > { %v746_v14 = vmin.f32 %v714_v5, 6.0  ;;  %v1805_v5 = vmin.f32 %v1773_v2, 6.0  ;;  %v1416_v55 = vadd.f32 %v1384_v58, %v1319_v40  ;;  %v1707_v48 = vadd.f32 %v1675_v41, %v1610_v54 }
 0x144   : > { %v4935_v29 = vld [vmem:[#allocation2 + $0x10a] sm:$0xff] }
 0x145   : > { %835 = vst.msk [vmem:[#allocation2 + $0x121] sm:$0xff] %vm756_vm2, %v746_v14  ;;  %v998_v14 = vmul.f32 %v1544_v17, %v4426_v43  ;;  %v1514_v17 = vadd.f32 %v1482_v56, %v1416_v55  ;;  %v4944_v13 = vld [vmem:[#allocation2 + $0x110] sm:$0xff]  ;;  %v1676_v38 = vmul.f32 %v4509_v49, %v4935_v29  ;;  %v1386_v40 = vmul.f32 %v4935_v29, %v4482_v21 }
 0x146   : > { %v665_v33 = vpop.f32.mrf.mxu0  ;;  %3935 = vmatmul.msk.f32.gmra.mxu1 %vm756_vm2, %v1805_v5  ;;  %v1547_v30 = vld [vmem:[#allocation2 + $0x111] sm:$0xff]  ;;  %v1096_v5 = vmul.f32 %v1642_v57, %v4446_v53  ;;  %v1193_v56 = vmul.f32 %v4944_v13, %v4464_v3 }
 0x147   : > { %v666_v9 = vadd.f32 %v4787_v47, %v665_v33  ;;  %v4941_v33 = vld [vmem:[%s6274_s6] ss:$0 sm:$0xff]  ;;  %v1611_v10 = vadd.f32 %v1579_v7, %v1514_v17  ;;  %v1580_v19 = vmul.f32 %v4507_v46, %v1547_v30  ;;  %v1290_v62 = vmul.f32 %v1547_v30, %v4480_v20 }
 0x148   : > { %v1128_v24 = vadd.f32 %v1096_v5, %v1031_v0 }
 0x149   : > { %v715_v31 = vmax.f32 %v666_v9, 0.0  ;;  %v1030_v9 = vadd.f32 %v998_v14, %v901_v22  ;;  %v1708_v18 = vadd.f32 %v1676_v38, %v1611_v10  ;;  %v1644_v14 = vld [vmem:[#allocation2 + $0x112] sm:$0xff]  ;;  %v1000_v10 = vmul.f32 %v4933_v23, %v4426_v43 }
 0x14a   : > { %v1677_v25 = vmul.f32 %v4509_v49, %v1644_v14 }
 0x14b   : > { %v747_v12 = vmin.f32 %v715_v31, 6.0  ;;  %v1942_v4 = vpop.f32.mrf.mxu1  ;;  %v1483_v31 = vmul.f32 %v4504_v42, %v4944_v13  ;;  %v1127_v16 = vadd.f32 %v1095_v61, %v1030_v9  ;;  %v1225_v9 = vadd.f32 %v1193_v56, %v1128_v24  ;;  %v4039_v61 = vld [vmem:[%s4173_s15 + $0x8] sm:$0xff]  ;;  %v4040_v56 = vld [vmem:[%s4173_s15 + $0x10] sm:$0xff] }
 0x14c   : > { %v1943_v32 = vadd.f32 %v4941_v33, %v1942_v4  ;;  %v4971_v58 = vld [vmem:[#allocation2 + $0x120] sm:$0xff]  ;;  %v1098_v24 = vmul.f32 %v1644_v14, %v4446_v53 }
 0x14d   : > { %836 = vst.msk [vmem:[#allocation2 + $0x129] sm:$0xff] %vm756_vm2, %v747_v12  ;;  %v4965_v12 = vld [vmem:[%s6272_s4] ss:$0 sm:$0xff]  ;;  %v1515_v45 = vadd.f32 %v1483_v31, %v1417_v44  ;;  %v1224_v59 = vadd.f32 %v1192_v26, %v1127_v16  ;;  %v1484_v55 = vmul.f32 %v4504_v42, %v4971_v58 }
 0x14e   : > { %v668_v60 = vpop.f32.mrf.mxu0  ;;  %v1743_v51 = vadd.f32 %v4965_v12, %v1707_v48  ;;  %3936 = vmatmul.msk.f32.gmra.mxu1 %vm756_vm2, %v1806_v63  ;;  %v1744_v22 = vadd.f32 %v4965_v12, %v1708_v18  ;;  %v1001_v18 = vmul.f32 %v1547_v30, %v4426_v43 }
 0x14f   : > { %v669_v1 = vadd.f32 %v4787_v47, %v668_v60  ;;  %v2038_v60 = vadd.f32 %v4038_v35, %v1943_v32  ;;  %v1612_v41 = vadd.f32 %v1580_v19, %v1515_v45 }
 0x150   : > { %v1776_v7 = vmax.f32 %v1744_v22, 0.0 }
 0x151   : > { %v716_v8 = vmax.f32 %v669_v1, 0.0  ;;  %v2070_v6 = vmax.f32 %v2038_v60, 0.0  ;;  %v1775_v1 = vmax.f32 %v1743_v51, 0.0  ;;  %v1709_v31 = vadd.f32 %v1677_v25, %v1612_v41 }
 0x152   : > { %v903_v51 = vmul.f32 %v4916_v52, %v4422_v39  ;;  %v1322_v60 = vadd.f32 %v1290_v62, %v1225_v9  ;;  %v1808_v45 = vmin.f32 %v1776_v7, 6.0 }
 0x153   : > { %v748_v28 = vmin.f32 %v716_v8, 6.0  ;;  %v1289_v8 = vmul.f32 %v4933_v23, %v4480_v20  ;;  %v4981_v50 = vmin.f32 %v2070_v6, 6.0  ;;  %v1945_v15 = vpop.f32.mrf.mxu1  ;;  %v1807_v17 = vmin.f32 %v1775_v1, 6.0 }
 0x154   : > { %v1946_v48 = vadd.f32 %v4941_v33, %v1945_v15  ;;  %v4993_v4 = vld [vmem:[#allocation2 + $0x122] sm:$0xff]  ;;  %v1097_v23 = vmul.f32 %v4935_v29, %v4446_v53  ;;  %v1387_v6 = vmul.f32 %v1644_v14, %v4482_v21  ;;  %v1032_v19 = vadd.f32 %v1000_v10, %v903_v51 }
 0x155   : > { %837 = vst.msk [vmem:[#allocation2 + $0x139] sm:$0xff] %vm756_vm2, %v748_v28  ;;  %v1321_v28 = vadd.f32 %v1289_v8, %v1224_v59  ;;  %3953 = vmatmul.msk.f32.vlgmr.msra.gmra.mxu2 %vm478_vm1, %v4981_v50  ;;  %v4997_v32 = vld [vmem:[#allocation2 + $0x128] sm:$0xff]  ;;  %v1678_v16 = vmul.f32 %v4509_v49, %v4993_v4  ;;  %v905_v10 = vmul.f32 %v4971_v58, %v4422_v39 }
 0x156   : > { %v671_v37 = vpop.f32.mrf.mxu0  ;;  %v2039_v63 = vadd.f32 %v4039_v61, %v1946_v48  ;;  %3937 = vmatmul.msk.f32.gmra.mxu1 %vm756_vm2, %v1807_v17  ;;  %v1485_v1 = vmul.f32 %v4504_v42, %v4997_v32  ;;  %v1419_v8 = vadd.f32 %v1387_v6, %v1322_v60  ;;  %v1549_v15 = vld [vmem:[#allocation2 + $0x129] sm:$0xff]  ;;  %v1129_v41 = vadd.f32 %v1097_v23, %v1032_v19  ;;  %v4041_v23 = vld [vmem:[%s4173_s15 + $0x18] sm:$0xff] }
 0x157   : > { %v672_v27 = vadd.f32 %v4787_v47, %v671_v37  ;;  %v1418_v36 = vadd.f32 %v1386_v40, %v1321_v28  ;;  %v1582_v25 = vmul.f32 %v4507_v46, %v1549_v15 }
 0x158   : > { %v2071_v11 = vmax.f32 %v2039_v63, 0.0  ;;  %v1195_v63 = vmul.f32 %v4997_v32, %v4464_v3 }
 0x159   : > { %v717_v2 = vmax.f32 %v672_v27, 0.0  ;;  %v1548_v27 = vld [vmem:[#allocation2 + $0x121] sm:$0xff]  ;;  %v1516_v26 = vadd.f32 %v1484_v55, %v1418_v36  ;;  %v1517_v55 = vadd.f32 %v1485_v1, %v1419_v8  ;;  %v1292_v1 = vmul.f32 %v1549_v15, %v4480_v20 }
 0x15a   : > { %v1581_v44 = vmul.f32 %v4507_v46, %v1548_v27 }
 0x15b   : > { %v749_v34 = vmin.f32 %v717_v2, 6.0  ;;  %v904_v2 = vmul.f32 %v4944_v13, %v4422_v39  ;;  %v1948_v59 = vpop.f32.mrf.mxu1  ;;  %v1745_v13 = vadd.f32 %v4965_v12, %v1709_v31  ;;  %v1291_v31 = vmul.f32 %v1548_v27, %v4480_v20 }
 0x15c   : > { %v1613_v0 = vadd.f32 %v1581_v44, %v1516_v26  ;;  %v1949_v30 = vadd.f32 %v4941_v33, %v1948_v59  ;;  %v5029_v9 = vld [vmem:[#allocation2 + $0x138] sm:$0xff]  ;;  %v1388_v26 = vmul.f32 %v4993_v4, %v4482_v21  ;;  %v1614_v51 = vadd.f32 %v1582_v25, %v1517_v55 }
 0x15d   : > { %838 = vst.msk [vmem:[#allocation2 + $0x141] sm:$0xff] %vm756_vm2, %v749_v34  ;;  %v5009_v34 = vmin.f32 %v2071_v11, 6.0  ;;  %v1033_v40 = vadd.f32 %v1001_v18, %v904_v2  ;;  %v1777_v28 = vmax.f32 %v1745_v13, 0.0  ;;  %v1002_v2 = vmul.f32 %v1548_v27, %v4426_v43 }
 0x15e   : > { %v674_v54 = vpop.f32.mrf.mxu0  ;;  %v1710_v29 = vadd.f32 %v1678_v16, %v1613_v0  ;;  %v2040_v22 = vadd.f32 %v4040_v56, %v1949_v30  ;;  %3938 = vmatmul.msk.f32.gmra.mxu1 %vm756_vm2, %v1808_v45  ;;  %v1486_v60 = vmul.f32 %v4504_v42, %v5029_v9  ;;  %v5053_v0 = vld [vmem:[#allocation2 + $0x139] sm:$0xff] }
 0x15f   : > { %v675_v57 = vadd.f32 %v4787_v47, %v674_v54  ;;  %3954 = vmatmul.msk.f32.gmra.mxu2 %vm478_vm1, %v5009_v34  ;;  %v1194_v54 = vmul.f32 %v4971_v58, %v4464_v3  ;;  %v1130_v61 = vadd.f32 %v1098_v24, %v1033_v40  ;;  %v1809_v11 = vmin.f32 %v1777_v28, 6.0 }
 0x160   : > { %v2072_v48 = vmax.f32 %v2040_v22, 0.0  ;;  %v1034_v19 = vadd.f32 %v1002_v2, %v905_v10  ;;  %v1099_v22 = vmul.f32 %v4993_v4, %v4446_v53  ;;  %v906_v4 = vmul.f32 %v4997_v32, %v4422_v39 }
 0x161   : > { %v718_v37 = vmax.f32 %v675_v57, 0.0  ;;  %v1226_v17 = vadd.f32 %v1194_v54, %v1129_v41  ;;  %v1583_v41 = vmul.f32 %v4507_v46, %v5053_v0 }
 0x162   : > { %v5033_v7 = vmin.f32 %v2072_v48, 6.0 }
 0x163   : > { %v750_v38 = vmin.f32 %v718_v37, 6.0  ;;  %v1746_v37 = vadd.f32 %v4965_v12, %v1710_v29  ;;  %v1951_v62 = vpop.f32.mrf.mxu1 }
 0x164   : > { %v1952_v44 = vadd.f32 %v4941_v33, %v1951_v62  ;;  %v5055_v6 = vld [vmem:[#allocation2 + $0x13a] sm:$0xff] }
 0x165   : > { %839 = vst.msk [vmem:[#allocation2 + $0x151] sm:$0xff] %vm756_vm2, %v750_v38  ;;  %v5035_v38 = vld [vmem:[#allocation2 + $0x12a] sm:$0xff]  ;;  %v1778_v18 = vmax.f32 %v1746_v37, 0.0  ;;  %v5061_v56 = vld [vmem:[#allocation2 + $0x140] sm:$0xff]  ;;  %v1680_v28 = vmul.f32 %v4509_v49, %v5055_v6  ;;  %v1003_v37 = vmul.f32 %v1549_v15, %v4426_v43 }
 0x166   : > { %v677_v35 = vpop.f32.mrf.mxu0  ;;  %v1679_v45 = vmul.f32 %v4509_v49, %v5035_v38  ;;  %v2041_v59 = vadd.f32 %v4041_v23, %v1952_v44  ;;  %3939 = vmatmul.msk.f32.gmra.mxu1 %vm756_vm2, %v1809_v11  ;;  %v1389_v40 = vmul.f32 %v5035_v38, %v4482_v21  ;;  %v1551_v15 = vld [vmem:[#allocation2 + $0x141] sm:$0xff] }
 0x167   : > { %v678_v52 = vadd.f32 %v4787_v47, %v677_v35  ;;  %3955 = vmatmul.msk.f32.gmra.mxu2 %vm478_vm1, %v5033_v7  ;;  %v1323_v35 = vadd.f32 %v1291_v31, %v1226_v17  ;;  %v1810_v54 = vmin.f32 %v1778_v18, 6.0  ;;  %v1196_v17 = vmul.f32 %v5029_v9, %v4464_v3  ;;  %v4042_v31 = vld [vmem:[%s4173_s15 + $0x20] sm:$0xff] }
 0x168   : > { %v1711_v13 = vadd.f32 %v1679_v45, %v1614_v51  ;;  %v2073_v30 = vmax.f32 %v2041_v59, 0.0  ;;  %v1035_v10 = vadd.f32 %v1003_v37, %v906_v4  ;;  %v1100_v18 = vmul.f32 %v5035_v38, %v4446_v53 }
 0x169   : > { %v719_v5 = vmax.f32 %v678_v52, 0.0  ;;  %v1227_v52 = vadd.f32 %v1195_v63, %v1130_v61  ;;  %v1420_v27 = vadd.f32 %v1388_v26, %v1323_v35  ;;  %v1487_v63 = vmul.f32 %v4504_v42, %v5061_v56 }
 0x16a   : > { %v1747_v48 = vadd.f32 %v4965_v12, %v1711_v13  ;;  %v1293_v35 = vmul.f32 %v5053_v0, %v4480_v20  ;;  %v1197_v45 = vmul.f32 %v5061_v56, %v4464_v3  ;;  %v1584_v59 = vmul.f32 %v4507_v46, %v1551_v15 }
 0x16b   : > { %v751_v57 = vmin.f32 %v719_v5, 6.0  ;;  %v1518_v5 = vadd.f32 %v1486_v60, %v1420_v27  ;;  %v1324_v8 = vadd.f32 %v1292_v1, %v1227_v52  ;;  %v1954_v24 = vpop.f32.mrf.mxu1  ;;  %v1390_v27 = vmul.f32 %v5055_v6, %v4482_v21 }
 0x16c   : > { %v1955_v25 = vadd.f32 %v4941_v33, %v1954_v24  ;;  %v1779_v51 = vmax.f32 %v1747_v48, 0.0  ;;  %v5088_v60 = vld [vmem:[#allocation2 + $0x150] sm:$0xff] }
 0x16d   : > { %840 = vst.msk [vmem:[#allocation2 + $0x159] sm:$0xff] %vm756_vm2, %v751_v57  ;;  %v5065_v57 = vmin.f32 %v2073_v30, 6.0  ;;  %v1421_v32 = vadd.f32 %v1389_v40, %v1324_v8  ;;  %v5100_v30 = vld [vmem:[#allocation2 + $0x142] sm:$0xff]  ;;  %v1488_v8 = vmul.f32 %v4504_v42, %v5088_v60 }
 0x16e   : > { %v680_v36 = vpop.f32.mrf.mxu0  ;;  %v2042_v26 = vadd.f32 %v4042_v31, %v1955_v25  ;;  %3940 = vmatmul.msk.f32.gmra.mxu1 %vm756_vm2, %v1810_v54  ;;  %v1811_v1 = vmin.f32 %v1779_v51, 6.0  ;;  %v1552_v25 = vld [vmem:[#allocation2 + $0x151] sm:$0xff] }
 0x16f   : > { %v681_v14 = vadd.f32 %v4787_v47, %v680_v36  ;;  %3956 = vmatmul.msk.f32.gmra.mxu2 %vm478_vm1, %v5065_v57  ;;  %v1615_v36 = vadd.f32 %v1583_v41, %v1518_v5  ;;  %v1519_v44 = vadd.f32 %v1487_v63, %v1421_v32  ;;  %v1132_v5 = vadd.f32 %v1100_v18, %v1035_v10 }
 0x170   : > { %v2074_v2 = vmax.f32 %v2042_v26, 0.0  ;;  %v907_v41 = vmul.f32 %v5029_v9, %v4422_v39  ;;  %v1391_v26 = vmul.f32 %v5100_v30, %v4482_v21  ;;  %v1585_v10 = vmul.f32 %v4507_v46, %v1552_v25 }
 0x171   : > { %v720_v16 = vmax.f32 %v681_v14, 0.0  ;;  %v1131_v14 = vadd.f32 %v1099_v22, %v1034_v19  ;;  %v1712_v62 = vadd.f32 %v1680_v28, %v1615_v36  ;;  %v1616_v54 = vadd.f32 %v1584_v59, %v1519_v44 }
 0x172   : > { %v5094_v52 = vmin.f32 %v2074_v2, 6.0  ;;  %v1229_v22 = vadd.f32 %v1197_v45, %v1132_v5  ;;  %v1004_v28 = vmul.f32 %v5053_v0, %v4426_v43  ;;  %v908_v45 = vmul.f32 %v5061_v56, %v4422_v39 }
 0x173   : > { %v752_v58 = vmin.f32 %v720_v16, 6.0  ;;  %v1228_v16 = vadd.f32 %v1196_v17, %v1131_v14  ;;  %v1748_v23 = vadd.f32 %v4965_v12, %v1712_v62  ;;  %v1957_v13 = vpop.f32.mrf.mxu1  ;;  %v1681_v17 = vmul.f32 %v4509_v49, %v5100_v30 }
 0x174   : > { %v1958_v19 = vadd.f32 %v4941_v33, %v1957_v13  ;;  %v5116_v36 = vld [vmem:[#allocation2 + $0x152] sm:$0xff]  ;;  %v1036_v62 = vadd.f32 %v1004_v28, %v907_v41 }
 0x175   : > { %841 = vst.msk [vmem:[#allocation2 + $0x169] sm:$0xff] %vm756_vm2, %v752_v58  ;;  %v1780_v48 = vmax.f32 %v1748_v23, 0.0  ;;  %v1713_v9 = vadd.f32 %v1681_v17, %v1616_v54  ;;  %v5119_v31 = vld [vmem:[#allocation2 + $0x158] sm:$0xff]  ;;  %v1682_v2 = vmul.f32 %v4509_v49, %v5116_v36 }
 0x176   : > { %v683_v29 = vpop.f32.mrf.mxu0  ;;  %3941 = vmatmul.msk.f32.gmra.mxu1 %vm756_vm2, %v1811_v1  ;;  %v1489_v18 = vmul.f32 %v4504_v42, %v5119_v31  ;;  %v4044_v1 = vld [vmem:[%s4173_s15 + $0x30] sm:$0xff]  ;;  %v1553_v5 = vld [vmem:[#allocation2 + $0x159] sm:$0xff] }
 0x177   : > { %v684_v55 = vadd.f32 %v4787_v47, %v683_v29  ;;  %3957 = vmatmul.msk.f32.gmra.mxu2 %vm478_vm1, %v5094_v52  ;;  %v1325_v29 = vadd.f32 %v1293_v35, %v1228_v16  ;;  %v1812_v51 = vmin.f32 %v1780_v48, 6.0  ;;  %v1749_v59 = vadd.f32 %v4965_v12, %v1713_v9 }
 0x178   : > { %v1586_v41 = vmul.f32 %v4507_v46, %v1553_v5 }
 0x179   : > { %v721_v61 = vmax.f32 %v684_v55, 0.0  ;;  %v4043_v55 = vld [vmem:[%s4173_s15 + $0x28] sm:$0xff]  ;;  %v1422_v4 = vadd.f32 %v1390_v27, %v1325_v29  ;;  %v1198_v27 = vmul.f32 %v5088_v60, %v4464_v3 }
 0x17a   : > { %v2043_v24 = vadd.f32 %v4043_v55, %v1958_v19  ;;  %v1102_v55 = vmul.f32 %v5100_v30, %v4446_v53 }
 0x17b   : > { %v753_v11 = vmin.f32 %v721_v61, 6.0  ;;  %v1294_v61 = vmul.f32 %v1551_v15, %v4480_v20  ;;  %v1520_v14 = vadd.f32 %v1488_v8, %v1422_v4  ;;  %v1960_v16 = vpop.f32.mrf.mxu1  ;;  %v1650_v4 = vld [vmem:[#allocation2 + $0x15a] sm:$0xff] }
 0x17c   : > { %v2075_v63 = vmax.f32 %v2043_v24, 0.0  ;;  %v1961_v23 = vadd.f32 %v4941_v33, %v1960_v16  ;;  %v5147_v28 = vld [vmem:[#allocation2 + $0x168] sm:$0xff]  ;;  %v1199_v24 = vmul.f32 %v5119_v31, %v4464_v3 }
 0x17d   : > { %842 = vst.msk [vmem:[#allocation2 + $0x171] sm:$0xff] %vm756_vm2, %v753_v11  ;;  %v1326_v0 = vadd.f32 %v1294_v61, %v1229_v22  ;;  %v1101_v11 = vmul.f32 %v5055_v6, %v4446_v53  ;;  %v1005_v6 = vmul.f32 %v1551_v15, %v4426_v43  ;;  %v1392_v61 = vmul.f32 %v5116_v36, %v4482_v21 }
 0x17e   : > { %v686_v58 = vpop.f32.mrf.mxu0  ;;  %v5126_v32 = vmin.f32 %v2075_v63, 6.0  ;;  %3942 = vmatmul.msk.f32.gmra.mxu1 %vm756_vm2, %v1812_v51 }
 0x17f   : > { %v687_v38 = vadd.f32 %v4787_v47, %v686_v58  ;;  %v1617_v58 = vadd.f32 %v1585_v10, %v1520_v14  ;;  %v1423_v13 = vadd.f32 %v1391_v26, %v1326_v0  ;;  %v1133_v15 = vadd.f32 %v1101_v11, %v1036_v62 }
 0x180   : > { %3958 = vmatmul.msk.f32.gmra.mxu2 %vm478_vm1, %v5126_v32  ;;  %v1037_v29 = vadd.f32 %v1005_v6, %v908_v45  ;;  %v1490_v62 = vmul.f32 %v4504_v42, %v5147_v28  ;;  %v1683_v11 = vmul.f32 %v4509_v49, %v1650_v4  ;;  %v909_v10 = vmul.f32 %v5088_v60, %v4422_v39  ;;  %v1554_v6 = vld [vmem:[#allocation2 + $0x169] sm:$0xff] }
 0x181   : > { %v722_v40 = vmax.f32 %v687_v38, 0.0  ;;  %v2044_v38 = vadd.f32 %v4044_v1, %v1961_v23  ;;  %v1714_v56 = vadd.f32 %v1682_v2, %v1617_v58  ;;  %v1521_v54 = vadd.f32 %v1489_v18, %v1423_v13 }
 0x182   : > { %v1230_v22 = vadd.f32 %v1198_v27, %v1133_v15  ;;  %v1134_v14 = vadd.f32 %v1102_v55, %v1037_v29  ;;  %v1006_v2 = vmul.f32 %v1552_v25, %v4426_v43  ;;  %v1393_v29 = vmul.f32 %v1650_v4, %v4482_v21 }
 0x183   : > { %v754_v37 = vmin.f32 %v722_v40, 6.0  ;;  %v2076_v8 = vmax.f32 %v2044_v38, 0.0  ;;  %v1781_v40 = vmax.f32 %v1749_v59, 0.0  ;;  %v1750_v17 = vadd.f32 %v4965_v12, %v1714_v56  ;;  %v1963_v63 = vpop.f32.mrf.mxu1 }
 0x184   : > { %v1618_v9 = vadd.f32 %v1586_v41, %v1521_v54  ;;  %v1964_v0 = vadd.f32 %v4941_v33, %v1963_v63  ;;  %v1231_v51 = vadd.f32 %v1199_v24, %v1134_v14  ;;  %v5170_v23 = vld [vmem:[#allocation2 + $0x16a] sm:$0xff]  ;;  %v1296_v59 = vmul.f32 %v1553_v5, %v4480_v20  ;;  %v4046_v24 = vld [vmem:[%s4173_s15 + $0x40] sm:$0xff] }
 0x185   : > { %843 = vst.msk [vmem:[#allocation2 + $0x181] sm:$0xff] %vm756_vm2, %v754_v37  ;;  %v5153_v48 = vmin.f32 %v2076_v8, 6.0  ;;  %v1295_v37 = vmul.f32 %v1552_v25, %v4480_v20  ;;  %v1813_v30 = vmin.f32 %v1781_v40, 6.0  ;;  %v5173_v13 = vld [vmem:[#allocation2 + $0x170] sm:$0xff]  ;;  %v1038_v60 = vadd.f32 %v1006_v2, %v909_v10 }
 0x186   : > { %v689_v44 = vpop.f32.mrf.mxu0  ;;  %v1715_v45 = vadd.f32 %v1683_v11, %v1618_v9  ;;  %v1103_v25 = vmul.f32 %v5116_v36, %v4446_v53  ;;  %v1587_v56 = vmul.f32 %v4507_v46, %v1554_v6  ;;  %v1684_v15 = vmul.f32 %v4509_v49, %v5170_v23  ;;  %v1555_v63 = vld [vmem:[#allocation2 + $0x171] sm:$0xff] }
 0x187   : > { %v690_v35 = vadd.f32 %v4787_v47, %v689_v44  ;;  %v1327_v26 = vadd.f32 %v1295_v37, %v1230_v22  ;;  %v4045_v44 = vld [vmem:[%s4173_s15 + $0x38] sm:$0xff]  ;;  %3943 = vmatmul.msk.f32.gmra.mxu1 %vm756_vm2, %v1813_v30  ;;  %v910_v8 = vmul.f32 %v5119_v31, %v4422_v39  ;;  %v1007_v40 = vmul.f32 %v1553_v5, %v4426_v43 }
 0x188   : > { %3959 = vmatmul.msk.f32.gmra.mxu2 %vm478_vm1, %v5153_v48  ;;  %v2045_v16 = vadd.f32 %v4045_v44, %v1964_v0  ;;  %v1751_v54 = vadd.f32 %v4965_v12, %v1715_v45  ;;  %v1491_v41 = vmul.f32 %v4504_v42, %v5173_v13  ;;  %v1200_v55 = vmul.f32 %v5147_v28, %v4464_v3  ;;  %v1652_v45 = vld [vmem:[#allocation2 + $0x172] sm:$0xff] }
 0x189   : > { %v723_v47 = vmax.f32 %v690_v35, 0.0  ;;  %v1782_v35 = vmax.f32 %v1750_v17, 0.0  ;;  %v1424_v18 = vadd.f32 %v1392_v61, %v1327_v26  ;;  %v1135_v61 = vadd.f32 %v1103_v25, %v1038_v60 }
 0x18a   : > { %v2077_v58 = vmax.f32 %v2045_v16, 0.0  ;;  %v1783_v5 = vmax.f32 %v1751_v54, 0.0  ;;  %v1039_v9 = vadd.f32 %v1007_v40, %v910_v8  ;;  %v1297_v26 = vmul.f32 %v1554_v6, %v4480_v20 }
 0x18b   : > { %v755_v19 = vmin.f32 %v723_v47, 6.0  ;;  %v1522_v27 = vadd.f32 %v1490_v62, %v1424_v18  ;;  %v1328_v47 = vadd.f32 %v1296_v59, %v1231_v51  ;;  %v1814_v38 = vmin.f32 %v1782_v35, 6.0 }
 0x18c   : > { %v5177_v1 = vmin.f32 %v2077_v58, 6.0  ;;  %v1232_v30 = vadd.f32 %v1200_v55, %v1135_v61  ;;  %v1459_v62 = vld [vmem:[#allocation2 + $0x180] sm:$0xff]  ;;  %v1104_v11 = vmul.f32 %v1650_v4, %v4446_v53  ;;  %v1201_v51 = vmul.f32 %v5173_v13, %v4464_v3 }
 0x18d   : > { %844 = vst.msk [vmem:[#allocation2 + $0x189] sm:$0xff] %vm756_vm2, %v755_v19  ;;  %v1966_v19 = vpop.f32.mrf.mxu1  ;;  %v1619_v22 = vadd.f32 %v1587_v56, %v1522_v27  ;;  %v1425_v31 = vadd.f32 %v1393_v29, %v1328_v47  ;;  %v1588_v44 = vmul.f32 %v4507_v46, %v1555_v63  ;;  %v1394_v16 = vmul.f32 %v5170_v23, %v4482_v21  ;;  %v4047_v56 = vld [vmem:[%s4173_s15 + $0x48] sm:$0xff] }
 0x18e   : > { %v1967_v36 = vadd.f32 %v4941_v33, %v1966_v19  ;;  %v1815_v18 = vmin.f32 %v1783_v5, 6.0  ;;  %v1136_v59 = vadd.f32 %v1104_v11, %v1039_v9  ;;  %v911_v4 = vmul.f32 %v5147_v28, %v4422_v39  ;;  %v1556_v29 = vld [vmem:[#allocation2 + $0x181] sm:$0xff] }
 0x18f   : > { %3944 = vmatmul.msk.f32.gmra.mxu1 %vm756_vm2, %v1814_v38  ;;  %v1716_v37 = vadd.f32 %v1684_v15, %v1619_v22  ;;  %v1523_v0 = vadd.f32 %v1491_v41, %v1425_v31  ;;  %v1008_v58 = vmul.f32 %v1554_v6, %v4426_v43  ;;  %v1329_v60 = vadd.f32 %v1297_v26, %v1232_v30 }
 0x190   : > { %3960 = vmatmul.msk.f32.gmra.mxu2 %vm478_vm1, %v5177_v1  ;;  %v2046_v17 = vadd.f32 %v4046_v24, %v1967_v36  ;;  %v1492_v25 = vmul.f32 %v4504_v42, %v1459_v62  ;;  %v1233_v38 = vadd.f32 %v1201_v51, %v1136_v59  ;;  %v1685_v54 = vmul.f32 %v4509_v49, %v1652_v45 }
 0x191   : > { %v1752_v2 = vadd.f32 %v4965_v12, %v1716_v37  ;;  %v1620_v47 = vadd.f32 %v1588_v44, %v1523_v0  ;;  %v1426_v28 = vadd.f32 %v1394_v16, %v1329_v60  ;;  %v1298_v8 = vmul.f32 %v1555_v63, %v4480_v20  ;;  %v1461_v60 = vld [vmem:[#allocation2 + $0x198] sm:$0xff] }
 0x192   : > { %v2078_v14 = vmax.f32 %v2046_v17, 0.0  ;;  %v1105_v40 = vmul.f32 %v5170_v23, %v4446_v53  ;;  %v1040_v55 = vadd.f32 %v1008_v58, %v911_v4  ;;  %v1202_v37 = vmul.f32 %v1459_v62, %v4464_v3  ;;  %v4048_v62 = vld [vmem:[%s4173_s15 + $0x50] sm:$0xff] }
 0x193   : > { %v1784_v19 = vmax.f32 %v1752_v2, 0.0  ;;  %v1717_v22 = vadd.f32 %v1685_v54, %v1620_v47  ;;  %v1524_v41 = vadd.f32 %v1492_v25, %v1426_v28  ;;  %v1330_v24 = vadd.f32 %v1298_v8, %v1233_v38 }
 0x194   : > { %v5200_v10 = vmin.f32 %v2078_v14, 6.0  ;;  %v1653_v6 = vld [vmem:[#allocation2 + $0x182] sm:$0xff]  ;;  %v912_v31 = vmul.f32 %v5173_v13, %v4422_v39  ;;  %v1009_v61 = vmul.f32 %v1555_v63, %v4426_v43  ;;  %v1589_v14 = vmul.f32 %v4507_v46, %v1556_v29 }
 0x195   : > { %v1969_v35 = vpop.f32.mrf.mxu1  ;;  %v1460_v17 = vld [vmem:[#allocation2 + $0x188] sm:$0xff]  ;;  %v1816_v9 = vmin.f32 %v1784_v19, 6.0  ;;  %v1686_v23 = vmul.f32 %v4509_v49, %v1653_v6  ;;  %v1395_v30 = vmul.f32 %v1652_v45, %v4482_v21  ;;  %v1137_v26 = vadd.f32 %v1105_v40, %v1040_v55  ;;  %v1558_v40 = vld [vmem:[#allocation2 + $0x199] sm:$0xff] }
 0x196   : > { %v1970_v27 = vadd.f32 %v4941_v33, %v1969_v35  ;;  %v1753_v39 = vadd.f32 %v4965_v12, %v1717_v22  ;;  %v1621_v13 = vadd.f32 %v1589_v14, %v1524_v41  ;;  %v1493_v43 = vmul.f32 %v4504_v42, %v1460_v17  ;;  %v1557_v35 = vld [vmem:[#allocation2 + $0x189] sm:$0xff]  ;;  %v4049_v22 = vld [vmem:[%s4173_s15 + $0x58] sm:$0xff] }
 0x197   : > { %3945 = vmatmul.msk.f32.gmra.mxu1 %vm756_vm2, %v1815_v18  ;;  %v1234_v63 = vadd.f32 %v1202_v37, %v1137_v26  ;;  %v1427_v44 = vadd.f32 %v1395_v30, %v1330_v24  ;;  %v1041_v16 = vadd.f32 %v1009_v61, %v912_v31  ;;  %v1299_v18 = vmul.f32 %v1556_v29, %v4480_v20  ;;  %v1654_v29 = vld [vmem:[#allocation2 + $0x18a] sm:$0xff]  ;;  %v1655_v14 = vld [vmem:[#allocation2 + $0x19a] sm:$0xff] }
 0x198   : > { %3961 = vmatmul.msk.f32.gmra.mxu2 %vm478_vm1, %v5200_v10  ;;  %v2047_v15 = vadd.f32 %v4047_v56, %v1970_v27  ;;  %v1718_v2 = vadd.f32 %v1686_v23, %v1621_v13  ;;  %v1396_v59 = vmul.f32 %v1653_v6, %v4482_v21  ;;  %v1106_v4 = vmul.f32 %v1652_v45, %v4446_v53 }
 0x199   : > { %v1785_v27 = vmax.f32 %v1753_v39, 0.0  ;;  %v1525_v47 = vadd.f32 %v1493_v43, %v1427_v44  ;;  %v1203_v25 = vmul.f32 %v1460_v17, %v4464_v3  ;;  %v1331_v38 = vadd.f32 %v1299_v18, %v1234_v63  ;;  %v4050_v44 = vld [vmem:[%s4173_s15 + $0x60] sm:$0xff] }
 0x19a   : > { %v2079_v36 = vmax.f32 %v2047_v15, 0.0  ;;  %v1754_v15 = vadd.f32 %v4965_v12, %v1718_v2  ;;  %v1590_v19 = vmul.f32 %v4507_v46, %v1557_v35  ;;  %v1138_v54 = vadd.f32 %v1106_v4, %v1041_v16  ;;  %v1559_v2 = vld [vmem:[#allocation2 + $0x1a1] sm:$0xff] }
 0x19b   : > { %v1428_v6 = vadd.f32 %v1396_v59, %v1331_v38  ;;  %v1494_v53 = vmul.f32 %v4504_v42, %v1461_v60  ;;  %v1817_v3 = vmin.f32 %v1785_v27, 6.0  ;;  %v1687_v24 = vmul.f32 %v4509_v49, %v1654_v29 }
 0x19c   : > { %v5223_v5 = vmin.f32 %v2079_v36, 6.0  ;;  %v1622_v8 = vadd.f32 %v1590_v19, %v1525_v47  ;;  %v1235_v36 = vadd.f32 %v1203_v25, %v1138_v54  ;;  %v1786_v55 = vmax.f32 %v1754_v15, 0.0  ;;  %v4051_v15 = vld [vmem:[%s4173_s15 + $0x68] sm:$0xff] }
 0x19d   : > { %v1972_v0 = vpop.f32.mrf.mxu1  ;;  %v1300_v17 = vmul.f32 %v1557_v35, %v4480_v20  ;;  %v1526_v37 = vadd.f32 %v1494_v53, %v1428_v6  ;;  %v1591_v31 = vmul.f32 %v4507_v46, %v1558_v40  ;;  %v1688_v43 = vmul.f32 %v4509_v49, %v1655_v14 }
 0x19e   : > { %v1973_v11 = vadd.f32 %v4941_v33, %v1972_v0  ;;  %v1462_v0 = vld [vmem:[#allocation2 + $0x1a0] sm:$0xff]  ;;  %v1818_v26 = vmin.f32 %v1786_v55, 6.0 }
 0x19f   : > { %3946 = vmatmul.msk.f32.gmra.mxu1 %vm756_vm2, %v1816_v9  ;;  %v1719_v9 = vadd.f32 %v1687_v24, %v1622_v8  ;;  %v1332_v23 = vadd.f32 %v1300_v17, %v1235_v36  ;;  %v1623_v13 = vadd.f32 %v1591_v31, %v1526_v37  ;;  %v4052_v8 = vld [vmem:[%s4173_s15 + $0x70] sm:$0xff]  ;;  %v4053_v37 = vld [vmem:[%s4173_s15 + $0x78] sm:$0xff] }
 0x1a0   : > { %3962 = vmatmul.msk.f32.gmra.mxu2 %vm478_vm1, %v5223_v5  ;;  %v2048_v51 = vadd.f32 %v4048_v62, %v1973_v11  ;;  %v1397_v11 = vmul.f32 %v1654_v29, %v4482_v21  ;;  %v1592_v21 = vmul.f32 %v4507_v46, %v1559_v2 }
 0x1a1   : > { %v1755_v63 = vadd.f32 %v4965_v12, %v1719_v9  ;;  %v1720_v59 = vadd.f32 %v1688_v43, %v1623_v13  ;;  %v5302_v43 = vld [vmem:[%s6276_s8] ss:$0 sm:$0xff] }
 0x1a2   : > { %v2080_v58 = vmax.f32 %v2048_v51, 0.0  ;;  %v1429_v62 = vadd.f32 %v1397_v11, %v1332_v23  ;;  %v1495_v51 = vmul.f32 %v4504_v42, %v1462_v0  ;;  %v4054_v23 = vld [vmem:[%s4173_s15 + $0x80] sm:$0xff] }
 0x1a3   : > { %v1787_v18 = vmax.f32 %v1755_v63, 0.0  ;;  %v1756_v38 = vadd.f32 %v4965_v12, %v1720_v59  ;;  %v4056_v59 = vld [vmem:[%s4173_s15 + $0x90] sm:$0xff] }
 0x1a4   : > { %v5239_v56 = vmin.f32 %v2080_v58, 6.0  ;;  %v1527_v4 = vadd.f32 %v1495_v51, %v1429_v62  ;;  %v1656_v58 = vld [vmem:[#allocation2 + $0x1a2] sm:$0xff] }
 0x1a5   : > { %v1975_v28 = vpop.f32.mrf.mxu1  ;;  %v1689_v60 = vmul.f32 %v4509_v49, %v1656_v58  ;;  %v1819_v25 = vmin.f32 %v1787_v18, 6.0  ;;  %v2502_v58 = vld [vmem:[%s6277_s9] sm:$0x7] }
 0x1a6   : > { %v1976_v45 = vadd.f32 %v4941_v33, %v1975_v28  ;;  %v1624_v46 = vadd.f32 %v1592_v21, %v1527_v4  ;;  %v1788_v28 = vmax.f32 %v1756_v38, 0.0  ;;  %v5319_v38 = vperm.slane %v2502_v58, 1 }
 0x1a7   : > { %3947 = vmatmul.msk.f32.gmra.mxu1 %vm756_vm2, %v1817_v3 }
 0x1a8   : > { %3963 = vmatmul.msk.f32.gmra.mxu2 %vm478_vm1, %v5239_v56  ;;  %v2049_v41 = vadd.f32 %v4049_v22, %v1976_v45  ;;  %v1721_v29 = vadd.f32 %v1689_v60, %v1624_v46  ;;  %v1820_v45 = vmin.f32 %v1788_v28, 6.0 }
 0x1aa   : > { %v2081_v61 = vmax.f32 %v2049_v41, 0.0  ;;  %v1757_v3 = vadd.f32 %v4965_v12, %v1721_v29 }
 0x1ac   : > { %v5252_v30 = vmin.f32 %v2081_v61, 6.0  ;;  %v1789_v22 = vmax.f32 %v1757_v3, 0.0  ;;  %v4057_v3 = vld [vmem:[%s4173_s15 + $0x98] sm:$0xff] }
 0x1ad   : > { %v1978_v39 = vpop.f32.mrf.mxu1 }
 0x1ae   : > { %v1979_v20 = vadd.f32 %v4941_v33, %v1978_v39  ;;  %v1821_v17 = vmin.f32 %v1789_v22, 6.0  ;;  %v2603_v22 = vld [vmem:[#allocation3 + $0x9] sm:$0xff] }
 0x1af   : > { %3948 = vmatmul.msk.f32.gmra.mxu1 %vm756_vm2, %v1818_v26 }
 0x1b0   : > { %3964 = vmatmul.msk.f32.gmra.mxu2 %vm478_vm1, %v5252_v30  ;;  %v2050_v16 = vadd.f32 %v4050_v44, %v1979_v20  ;;  %v4055_v20 = vld [vmem:[%s4173_s15 + $0x88] sm:$0xff] }
 0x1b2   : > { %v2082_v35 = vmax.f32 %v2050_v16, 0.0 }
 0x1b4   : > { %v5264_v27 = vmin.f32 %v2082_v35, 6.0 }
 0x1b5   : > { %v1981_v47 = vpop.f32.mrf.mxu1 }
 0x1b6   : > { %v1982_v42 = vadd.f32 %v4941_v33, %v1981_v47 }
 0x1b7   : > { %3949 = vmatmul.msk.f32.gmra.mxu1 %vm756_vm2, %v1819_v25  ;;  %v5317_v25 = vperm.slane %v2502_v58, 0 }
 0x1b8   : > { %3965 = vmatmul.msk.f32.gmra.mxu2 %vm478_vm1, %v5264_v27  ;;  %v2051_v19 = vadd.f32 %v4051_v15, %v1982_v42 }
 0x1ba   : > { %v2083_v54 = vmax.f32 %v2051_v19, 0.0  ;;  %v2505_v19 = vld [vmem:[#allocation3] sm:$0xff] }
 0x1bc   : > { %v5273_v6 = vmin.f32 %v2083_v54, 6.0  ;;  %v2602_v54 = vld [vmem:[#allocation3 + $0x1] sm:$0xff] }
 0x1bd   : > { %v1984_v49 = vpop.f32.mrf.mxu1 }
 0x1be   : > { %v1985_v53 = vadd.f32 %v4941_v33, %v1984_v49 }
 0x1bf   : > { %3950 = vmatmul.msk.f32.gmra.mxu1 %vm756_vm2, %v1820_v45  ;;  %v2635_v45 = vmul.f32 %v5319_v38, %v2602_v54 }
 0x1c0   : > { %3966 = vmatmul.msk.f32.gmra.mxu2 %vm478_vm1, %v5273_v6  ;;  %v2052_v40 = vadd.f32 %v4052_v8, %v1985_v53  ;;  %v2538_v53 = vmul.f32 %v5317_v25, %v2505_v19 }
 0x1c2   : > { %v2084_v36 = vmax.f32 %v2052_v40, 0.0  ;;  %v5330_v40 = vperm.slane %v2502_v58, 2 }
 0x1c4   : > { %v5281_v41 = vmin.f32 %v2084_v36, 6.0  ;;  %v2506_v36 = vld [vmem:[#allocation3 + $0x8] sm:$0xff] }
 0x1c5   : > { %v1987_v55 = vpop.f32.mrf.mxu1 }
 0x1c6   : > { %v1988_v24 = vadd.f32 %v4941_v33, %v1987_v55 }
 0x1c7   : > { %3951 = vmatmul.msk.f32.gmra.mxu1 %vm756_vm2, %v1821_v17 }
 0x1c8   : > { %3967 = vmatmul.msk.f32.gmra.mxu2 %vm478_vm1, %v5281_v41  ;;  %v2053_v31 = vadd.f32 %v4053_v37, %v1988_v24  ;;  %v2699_v24 = vld [vmem:[#allocation3 + $0x2] sm:$0xff] }
 0x1ca   : > { %v2085_v12 = vmax.f32 %v2053_v31, 0.0  ;;  %v2667_v31 = vadd.f32 %v2635_v45, %v2538_v53 }
 0x1cc   : > { %v5288_v61 = vmin.f32 %v2085_v12, 6.0  ;;  %v2539_v12 = vmul.f32 %v5317_v25, %v2506_v36 }
 0x1cd   : > { %v1990_v9 = vpop.f32.mrf.mxu1 }
 0x1ce   : > { %v1991_v14 = vadd.f32 %v4941_v33, %v1990_v9  ;;  %v2636_v9 = vmul.f32 %v5319_v38, %v2603_v22 }
 0x1d0   : > { %3968 = vmatmul.msk.f32.gmra.mxu2 %vm478_vm1, %v5288_v61  ;;  %v2054_v0 = vadd.f32 %v4054_v23, %v1991_v14 }
 0x1d2   : > { %v2086_v26 = vmax.f32 %v2054_v0, 0.0  ;;  %v3481_v0 = vld [vmem:[%s6279_s11 + $0x10] sm:$0xff] }
 0x1d3   : > { %3595 = vmatpush.msra.mxu3 %v3481_v0  ;;  %v4060_v0 = vld [vmem:[%s4173_s15 + $0xa8] sm:$0xff] }
 0x1d4   : > { %v5294_v11 = vmin.f32 %v2086_v26, 6.0  ;;  %v3480_v26 = vld [vmem:[%s6279_s11 + $0x8] sm:$0xff] }
 0x1d5   : > { %v1993_v39 = vpop.f32.mrf.mxu1  ;;  %3596 = vmatpush.msra.mxu3 %v3480_v26 }
 0x1d6   : > { %v1994_v13 = vadd.f32 %v4941_v33, %v1993_v39  ;;  %v2732_v39 = vmul.f32 %v5330_v40, %v2699_v24 }
 0x1d8   : > { %3969 = vmatmul.msk.f32.gmra.mxu2 %vm478_vm1, %v5294_v11  ;;  %v2055_v63 = vadd.f32 %v4055_v20, %v1994_v13  ;;  %v2255_v62 = vpop.f32.mrf.mxu2  ;;  %v2700_v20 = vld [vmem:[#allocation3 + $0xa] sm:$0xff]  ;;  %v2764_v58 = vadd.f32 %v2732_v39, %v2667_v31 }
 0x1d9   : > { %v2256_v2 = vadd.f32 %v5302_v43, %v2255_v62 }
 0x1da   : > { %v2087_v51 = vmax.f32 %v2055_v63, 0.0 }
 0x1db   : > { %v2351_v16 = vmax.f32 %v2256_v2, 0.0  ;;  %v5352_v2 = vld [vmem:[%s6274_s6] ss:$0 sm:$0xff] }
 0x1dc   : > { %v5306_v44 = vmin.f32 %v2087_v51, 6.0 }
 0x1dd   : > { %v1996_v21 = vpop.f32.mrf.mxu1  ;;  %v2383_v35 = vmin.f32 %v2351_v16, 6.0 }
 0x1de   : > { %v1997_v18 = vadd.f32 %v4941_v33, %v1996_v21  ;;  %v2668_v21 = vadd.f32 %v2636_v9, %v2539_v12 }
 0x1df   : > { %2470 = vst.msk [vmem:[#allocation3 + $0x19] sm:$0xff] %vm756_vm2, %v2383_v35  ;;  %v2733_v35 = vmul.f32 %v5330_v40, %v2700_v20 }
 0x1e0   : > { %3970 = vmatmul.msk.f32.gmra.mxu2 %vm478_vm1, %v5306_v44  ;;  %v2056_v4 = vadd.f32 %v4056_v59, %v1997_v18  ;;  %v4059_v18 = vld [vmem:[%s4173_s15 + $0xa0] sm:$0xff] }
 0x1e1   : > { %v2765_v45 = vadd.f32 %v2733_v35, %v2668_v21 }
 0x1e2   : > { %v2258_v47 = vpop.f32.mrf.mxu2  ;;  %v2088_v60 = vmax.f32 %v2056_v4, 0.0  ;;  %v3479_v4 = vld [vmem:[%s6279_s11] sm:$0xff] }
 0x1e3   : > { %v2259_v42 = vadd.f32 %v5302_v43, %v2258_v47  ;;  %3597 = vmatpush.msra.mxu3 %v3479_v4 }
 0x1e4   : > { %v5321_v46 = vmin.f32 %v2088_v60, 6.0 }
 0x1e5   : > { %v2352_v15 = vmax.f32 %v2259_v42, 0.0  ;;  %v1999_v28 = vpop.f32.mrf.mxu1 }
 0x1e6   : > { %v2000_v49 = vadd.f32 %v4941_v33, %v1999_v28  ;;  %v2503_v33 = vld [vmem:[%s6277_s9 + $0x4] sm:$0x7]  ;;  %v2796_v62 = vld [vmem:[#allocation3 + $0x18] sm:$0xff] }
 0x1e7   : > { %v2384_v29 = vmin.f32 %v2352_v15, 6.0  ;;  %v5347_v13 = vperm.slane %v2503_v33, 0  ;;  %v2504_v15 = vld [vmem:[%s6277_s9 + $0x8] sm:$0x7]  ;;  %v5368_v28 = vperm.slane %v2503_v33, 1 }
 0x1e8   : > { %3971 = vmatmul.msk.f32.gmra.mxu2 %vm478_vm1, %v5321_v46  ;;  %v2057_v8 = vadd.f32 %v4057_v3, %v2000_v49  ;;  %v2893_v49 = vld [vmem:[#allocation3 + $0x19] sm:$0xff] }
 0x1e9   : > { %2471 = vst.msk [vmem:[#allocation3 + $0x21] sm:$0xff] %vm756_vm2, %v2384_v29  ;;  %v2829_v47 = vmul.f32 %v5347_v13, %v2796_v62  ;;  %v5370_v29 = vperm.slane %v2503_v33, 2  ;;  %v2926_v33 = vmul.f32 %v5368_v28, %v2893_v49 }
 0x1ea   : > { %v2261_v55 = vpop.f32.mrf.mxu2  ;;  %v2089_v17 = vmax.f32 %v2057_v8, 0.0 }
 0x1eb   : > { %v2262_v37 = vadd.f32 %v5302_v43, %v2261_v55  ;;  %v2861_v22 = vadd.f32 %v2829_v47, %v2764_v58  ;;  %v5375_v55 = vperm.slane %v2504_v15, 0  ;;  %v2540_v47 = vmul.f32 %v2796_v62, %v5317_v25 }
 0x1ec   : > { %v5338_v14 = vmin.f32 %v2089_v17, 6.0 }
 0x1ed   : > { %v2353_v23 = vmax.f32 %v2262_v37, 0.0  ;;  %v2002_v63 = vpop.f32.mrf.mxu1  ;;  %v2958_v39 = vadd.f32 %v2926_v33, %v2861_v22 }
 0x1ee   : > { %v2003_v16 = vadd.f32 %v5352_v2, %v2002_v63 }
 0x1ef   : > { %v2385_v51 = vmin.f32 %v2353_v23, 6.0 }
 0x1f0   : > { %3972 = vmatmul.msk.f32.gmra.mxu2 %vm478_vm1, %v5338_v14  ;;  %v2058_v59 = vadd.f32 %v4059_v18, %v2003_v16  ;;  %v2797_v60 = vld [vmem:[#allocation3 + $0x20] sm:$0xff]  ;;  %v5390_v18 = vperm.slane %v2504_v15, 1 }
 0x1f1   : > { %2472 = vst.msk [vmem:[#allocation3 + $0x31] sm:$0xff] %vm756_vm2, %v2385_v51  ;;  %v2990_v53 = vld [vmem:[#allocation3 + $0x1a] sm:$0xff]  ;;  %v2830_v3 = vmul.f32 %v5347_v13, %v2797_v60 }
 0x1f2   : > { %v2264_v42 = vpop.f32.mrf.mxu2  ;;  %v2090_v19 = vmax.f32 %v2058_v59, 0.0  ;;  %v3023_v31 = vmul.f32 %v5370_v29, %v2990_v53  ;;  %v2894_v12 = vld [vmem:[#allocation3 + $0x21] sm:$0xff] }
 0x1f3   : > { %v2265_v54 = vadd.f32 %v5302_v43, %v2264_v42  ;;  %v2862_v23 = vadd.f32 %v2830_v3, %v2765_v45  ;;  %v2927_v51 = vmul.f32 %v5368_v28, %v2894_v12  ;;  %v2991_v59 = vld [vmem:[#allocation3 + $0x22] sm:$0xff]  ;;  %v2637_v42 = vmul.f32 %v2893_v49, %v5319_v38 }
 0x1f4   : > { %v5373_v8 = vmin.f32 %v2090_v19, 6.0  ;;  %v3055_v35 = vadd.f32 %v3023_v31, %v2958_v39  ;;  %v5398_v3 = vperm.slane %v2504_v15, 2  ;;  %v3024_v22 = vmul.f32 %v5370_v29, %v2991_v59 }
 0x1f5   : > { %v2354_v36 = vmax.f32 %v2265_v54, 0.0  ;;  %v2005_v24 = vpop.f32.mrf.mxu1  ;;  %v2959_v58 = vadd.f32 %v2927_v51, %v2862_v23 }
 0x1f6   : > { %v2006_v37 = vadd.f32 %v5352_v2, %v2005_v24  ;;  %v2734_v24 = vmul.f32 %v2990_v53, %v5330_v40  ;;  %v2669_v53 = vadd.f32 %v2637_v42, %v2540_v47 }
 0x1f7   : > { %v2386_v17 = vmin.f32 %v2354_v36, 6.0  ;;  %v3056_v31 = vadd.f32 %v3024_v22, %v2959_v58 }
 0x1f8   : > { %3973 = vmatmul.msk.f32.gmra.mxu2 %vm478_vm1, %v5373_v8  ;;  %v5382_v9 = vld [vmem:[#allocation3 + $0x30] sm:$0xff]  ;;  %v2059_v26 = vadd.f32 %v4060_v0, %v2006_v37  ;;  %v2638_v37 = vmul.f32 %v2894_v12, %v5319_v38  ;;  %v4061_v12 = vld [vmem:[%s4173_s15 + $0xb0] sm:$0xff]  ;;  %v2766_v58 = vadd.f32 %v2734_v24, %v2669_v53 }
 0x1f9   : > { %2473 = vst.msk [vmem:[#allocation3 + $0x39] sm:$0xff] %vm756_vm2, %v2386_v17  ;;  %v3121_v20 = vmul.f32 %v5375_v55, %v5382_v9  ;;  %v5392_v4 = vld [vmem:[#allocation3 + $0x31] sm:$0xff]  ;;  %v2541_v17 = vmul.f32 %v2797_v60, %v5317_v25  ;;  %v2831_v60 = vmul.f32 %v5382_v9, %v5347_v13 }
 0x1fa   : > { %v2267_v63 = vpop.f32.mrf.mxu2  ;;  %v2091_v16 = vmax.f32 %v2059_v26, 0.0  ;;  %v3218_v15 = vmul.f32 %v5390_v18, %v5392_v4 }
 0x1fb   : > { %v2268_v21 = vadd.f32 %v5302_v43, %v2267_v63  ;;  %v3153_v45 = vadd.f32 %v3121_v20, %v3055_v35  ;;  %v5424_v63 = vld [vmem:[%s6278_s10] ss:$0 sm:$0xff]  ;;  %v2670_v47 = vadd.f32 %v2638_v37, %v2541_v17 }
 0x1fc   : > { %v5396_v19 = vmin.f32 %v2091_v16, 6.0 }
 0x1fd   : > { %v2355_v54 = vmax.f32 %v2268_v21, 0.0  ;;  %v2008_v36 = vpop.f32.mrf.mxu1  ;;  %v3250_v39 = vadd.f32 %v3218_v15, %v3153_v45 }
 0x1fe   : > { %6291 = vst [vmem:[#allocation4_spill] sm:$0xff] %v5396_v19  ;;  %v2009_v62 = vadd.f32 %v5352_v2, %v2008_v36 }
 0x1ff   : > { %v2387_v33 = vmin.f32 %v2355_v54, 6.0 }
 0x200   : > { %3974 = vmatmul.msk.f32.gmra.mxu2 %vm478_vm1, %v5396_v19  ;;  %v5409_v49 = vld [vmem:[#allocation3 + $0x32] sm:$0xff]  ;;  %v2060_v26 = vadd.f32 %v4061_v12, %v2009_v62  ;;  %v5428_v16 = vld [vmem:[#allocation3 + $0x3a] sm:$0xff]  ;;  %v2735_v62 = vmul.f32 %v2991_v59, %v5330_v40 }
 0x201   : > { %v5411_v23 = vld [vmem:[#allocation3 + $0x38] sm:$0xff]  ;;  %2474 = vst.msk [vmem:[#allocation3 + $0x49] sm:$0xff] %vm756_vm2, %v2387_v33  ;;  %v3315_v20 = vmul.f32 %v5398_v3, %v5409_v49  ;;  %v3316_v22 = vmul.f32 %v5398_v3, %v5428_v16  ;;  %v2863_v33 = vadd.f32 %v2831_v60, %v2766_v58  ;;  %v3025_v53 = vmul.f32 %v5409_v49, %v5370_v29  ;;  %v4062_v58 = vld [vmem:[%s4173_s15 + $0xb8] sm:$0xff] }
 0x202   : > { %v5413_v0 = vld [vmem:[#allocation3 + $0x39] sm:$0xff]  ;;  %v3122_v51 = vmul.f32 %v5375_v55, %v5411_v23  ;;  %v2092_v42 = vmax.f32 %v2060_v26, 0.0  ;;  %v2832_v15 = vmul.f32 %v5411_v23, %v5347_v13  ;;  %v2767_v60 = vadd.f32 %v2735_v62, %v2670_v47 }
 0x203   : > { %v2270_v21 = vpop.f32.mrf.mxu2  ;;  %v3219_v35 = vmul.f32 %v5390_v18, %v5413_v0  ;;  %v3347_v45 = vadd.f32 %v3315_v20, %v3250_v39 }
 0x204   : > { %v2271_v54 = vadd.f32 %v5302_v43, %v2270_v21  ;;  %v3154_v36 = vadd.f32 %v3122_v51, %v3056_v31  ;;  %v5438_v12 = vmin.f32 %v2092_v42, 6.0  ;;  %v2928_v31 = vmul.f32 %v5392_v4, %v5368_v28 }
 0x205   : > { %v3383_v24 = vadd.f32 %v5424_v63, %v3347_v45  ;;  %v2011_v37 = vpop.f32.mrf.mxu1 }
 0x206   : > { %6292 = vst [vmem:[#allocation5_spill] sm:$0xff] %v5438_v12  ;;  %v2356_v19 = vmax.f32 %v2271_v54, 0.0  ;;  %v3251_v17 = vadd.f32 %v3219_v35, %v3154_v36  ;;  %v2012_v59 = vadd.f32 %v5352_v2, %v2011_v37  ;;  %v2960_v51 = vadd.f32 %v2928_v31, %v2863_v33 }
 0x207   : > { %v3415_v39 = vmax.f32 %v3383_v24, 0.0  ;;  %v2864_v35 = vadd.f32 %v2832_v15, %v2767_v60  ;;  %v2929_v36 = vmul.f32 %v5413_v0, %v5368_v28  ;;  %v2542_v37 = vmul.f32 %v5382_v9, %v5317_v25 }
 0x208   : > { %v2388_v26 = vmin.f32 %v2356_v19, 6.0  ;;  %3975 = vmatmul.msk.f32.gmra.mxu2 %vm478_vm1, %v5438_v12  ;;  %v3348_v20 = vadd.f32 %v3316_v22, %v3251_v17  ;;  %v5448_v21 = vld [vmem:[#allocation3 + $0x48] sm:$0xff]  ;;  %v2061_v42 = vadd.f32 %v4062_v58, %v2012_v59  ;;  %v3057_v33 = vadd.f32 %v3025_v53, %v2960_v51 }
 0x209   : > { %v3447_v54 = vmin.f32 %v3415_v39, 6.0  ;;  %v3123_v19 = vmul.f32 %v5375_v55, %v5448_v21  ;;  %v5459_v24 = vld [vmem:[#allocation3 + $0x49] sm:$0xff]  ;;  %v2961_v17 = vadd.f32 %v2929_v36, %v2864_v35  ;;  %v2639_v31 = vmul.f32 %v5392_v4, %v5319_v38 }
 0x20a   : > { %2475 = vst.msk [vmem:[#allocation3 + $0x51] sm:$0xff] %vm756_vm2, %v2388_v26  ;;  %v3384_v45 = vadd.f32 %v5424_v63, %v3348_v20  ;;  %v2093_v62 = vmax.f32 %v2061_v42, 0.0  ;;  %v3026_v20 = vmul.f32 %v5428_v16, %v5370_v29  ;;  %v2736_v53 = vmul.f32 %v5409_v49, %v5330_v40 }
 0x20b   : > { %v2273_v47 = vpop.f32.mrf.mxu2  ;;  %3985 = vmatmul.msk.f32.vlgmr.msra.gmra.mxu3 %vm756_vm2, %v3447_v54  ;;  %v3155_v59 = vadd.f32 %v3123_v19, %v3057_v33  ;;  %v2543_v51 = vmul.f32 %v5411_v23, %v5317_v25  ;;  %v2640_v9 = vmul.f32 %v5413_v0, %v5319_v38  ;;  %v3220_v58 = vmul.f32 %v5390_v18, %v5459_v24 }
 0x20c   : > { %v2274_v22 = vadd.f32 %v5302_v43, %v2273_v47  ;;  %v3416_v15 = vmax.f32 %v3384_v45, 0.0  ;;  %v5465_v60 = vmin.f32 %v2093_v62, 6.0  ;;  %v3058_v45 = vadd.f32 %v3026_v20, %v2961_v17  ;;  %v4063_v47 = vld [vmem:[%s4173_s15 + $0xc0] sm:$0xff] }
 0x20d   : > { %v2014_v39 = vpop.f32.mrf.mxu1  ;;  %v2671_v23 = vadd.f32 %v2639_v31, %v2542_v37  ;;  %v2833_v0 = vmul.f32 %v5448_v21, %v5347_v13  ;;  %v3252_v62 = vadd.f32 %v3220_v58, %v3155_v59 }
 0x20e   : > { %6293 = vst [vmem:[#allocation6_spill] sm:$0xff] %v5465_v60  ;;  %v2357_v26 = vmax.f32 %v2274_v22, 0.0  ;;  %v2015_v4 = vadd.f32 %v5352_v2, %v2014_v39  ;;  %v3448_v42 = vmin.f32 %v3416_v15, 6.0 }
 0x20f   : > { %v2768_v31 = vadd.f32 %v2736_v53, %v2671_v23 }
 0x210   : > { %v2389_v35 = vmin.f32 %v2357_v26, 6.0  ;;  %3976 = vmatmul.msk.f32.gmra.mxu2 %vm478_vm1, %v5465_v60  ;;  %v2062_v36 = vadd.f32 %v4063_v47, %v2015_v4  ;;  %v2672_v26 = vadd.f32 %v2640_v9, %v2543_v51  ;;  %v2737_v47 = vmul.f32 %v5428_v16, %v5330_v40 }
 0x211   : > { %v5480_v54 = vld [vmem:[#allocation3 + $0x4a] sm:$0xff]  ;;  %v5494_v15 = vld [vmem:[#allocation3 + $0x52] sm:$0xff]  ;;  %v2865_v58 = vadd.f32 %v2833_v0, %v2768_v31 }
 0x212   : > { %v5482_v49 = vld [vmem:[#allocation3 + $0x50] sm:$0xff]  ;;  %2476 = vst.msk [vmem:[#allocation3 + $0x61] sm:$0xff] %vm756_vm2, %v2389_v35  ;;  %v3317_v22 = vmul.f32 %v5398_v3, %v5480_v54  ;;  %v2094_v39 = vmax.f32 %v2062_v36, 0.0  ;;  %v3318_v4 = vmul.f32 %v5398_v3, %v5494_v15  ;;  %v3027_v23 = vmul.f32 %v5480_v54, %v5370_v29  ;;  %v4064_v31 = vld [vmem:[%s4173_s15 + $0xc8] sm:$0xff] }
 0x213   : > { %v5484_v19 = vld [vmem:[#allocation3 + $0x51] sm:$0xff]  ;;  %v3124_v33 = vmul.f32 %v5375_v55, %v5482_v49  ;;  %v2276_v17 = vpop.f32.mrf.mxu2  ;;  %3986 = vmatmul.msk.f32.gmra.mxu3 %vm756_vm2, %v3448_v42  ;;  %v2834_v60 = vmul.f32 %v5482_v49, %v5347_v13  ;;  %v2769_v0 = vadd.f32 %v2737_v47, %v2672_v26 }
 0x214   : > { %v3221_v37 = vmul.f32 %v5390_v18, %v5484_v19  ;;  %v2277_v20 = vadd.f32 %v5302_v43, %v2276_v17  ;;  %v3349_v59 = vadd.f32 %v3317_v22, %v3252_v62  ;;  %v5506_v12 = vmin.f32 %v2094_v39, 6.0 }
 0x215   : > { %v3156_v35 = vadd.f32 %v3124_v33, %v3058_v45  ;;  %v2017_v42 = vpop.f32.mrf.mxu1  ;;  %v2930_v45 = vmul.f32 %v5459_v24, %v5368_v28  ;;  %v2931_v47 = vmul.f32 %v5484_v19, %v5368_v28 }
 0x216   : > { %6294 = vst [vmem:[#allocation7_spill] sm:$0xff] %v5506_v12  ;;  %v2358_v53 = vmax.f32 %v2277_v20, 0.0  ;;  %v3385_v51 = vadd.f32 %v5424_v63, %v3349_v59  ;;  %v2018_v16 = vadd.f32 %v5352_v2, %v2017_v42  ;;  %v2544_v42 = vmul.f32 %v5448_v21, %v5317_v25 }
 0x217   : > { %v3253_v9 = vadd.f32 %v3221_v37, %v3156_v35  ;;  %v2962_v33 = vadd.f32 %v2930_v45, %v2865_v58  ;;  %v2866_v37 = vadd.f32 %v2834_v60, %v2769_v0  ;;  %v2641_v45 = vmul.f32 %v5459_v24, %v5319_v38 }
 0x218   : > { %v2390_v36 = vmin.f32 %v2358_v53, 6.0  ;;  %3977 = vmatmul.msk.f32.gmra.mxu2 %vm478_vm1, %v5506_v12  ;;  %v3417_v62 = vmax.f32 %v3385_v51, 0.0  ;;  %v2063_v39 = vadd.f32 %v4064_v31, %v2018_v16  ;;  %v2642_v21 = vmul.f32 %v5484_v19, %v5319_v38 }
 0x219   : > { %v3350_v22 = vadd.f32 %v3318_v4, %v3253_v9  ;;  %v5516_v17 = vld [vmem:[#allocation3 + $0x60] sm:$0xff]  ;;  %v3059_v60 = vadd.f32 %v3027_v23, %v2962_v33  ;;  %v2963_v9 = vadd.f32 %v2931_v47, %v2866_v37  ;;  %v2738_v23 = vmul.f32 %v5480_v54, %v5330_v40 }
 0x21a   : > { %2477 = vst.msk [vmem:[#allocation3 + $0x69] sm:$0xff] %vm756_vm2, %v2390_v36  ;;  %v3449_v20 = vmin.f32 %v3417_v62, 6.0  ;;  %v3125_v26 = vmul.f32 %v5375_v55, %v5516_v17  ;;  %v2095_v53 = vmax.f32 %v2063_v39, 0.0  ;;  %v5527_v51 = vld [vmem:[#allocation3 + $0x61] sm:$0xff]  ;;  %v2545_v33 = vmul.f32 %v5482_v49, %v5317_v25 }
 0x21b   : > { %v3386_v59 = vadd.f32 %v5424_v63, %v3350_v22  ;;  %v2279_v35 = vpop.f32.mrf.mxu2  ;;  %v3028_v22 = vmul.f32 %v5494_v15, %v5370_v29  ;;  %v3222_v31 = vmul.f32 %v5390_v18, %v5527_v51  ;;  %v2673_v49 = vadd.f32 %v2641_v45, %v2544_v42 }
 0x21c   : > { %v2280_v4 = vadd.f32 %v5302_v43, %v2279_v35  ;;  %3987 = vmatmul.msk.f32.gmra.mxu3 %vm756_vm2, %v3449_v20  ;;  %v5533_v0 = vmin.f32 %v2095_v53, 6.0  ;;  %v3157_v16 = vadd.f32 %v3125_v26, %v3059_v60  ;;  %v2835_v19 = vmul.f32 %v5516_v17, %v5347_v13  ;;  %v4065_v35 = vld [vmem:[%s4173_s15 + $0xd0] sm:$0xff] }
 0x21d   : > { %v3418_v58 = vmax.f32 %v3386_v59, 0.0  ;;  %v2020_v62 = vpop.f32.mrf.mxu1  ;;  %v3060_v59 = vadd.f32 %v3028_v22, %v2963_v9  ;;  %v2770_v45 = vadd.f32 %v2738_v23, %v2673_v49 }
 0x21e   : > { %6295 = vst [vmem:[#allocation8_spill] sm:$0xff] %v5533_v0  ;;  %v2359_v36 = vmax.f32 %v2280_v4, 0.0  ;;  %v2021_v24 = vadd.f32 %v5352_v2, %v2020_v62  ;;  %v3254_v53 = vadd.f32 %v3222_v31, %v3157_v16 }
 0x21f   : > { %v3450_v39 = vmin.f32 %v3418_v58, 6.0  ;;  %v2867_v31 = vadd.f32 %v2835_v19, %v2770_v45  ;;  %v4066_v45 = vld [vmem:[%s4173_s15 + $0xd8] sm:$0xff] }
 0x220   : > { %v2391_v37 = vmin.f32 %v2359_v36, 6.0  ;;  %3978 = vmatmul.msk.f32.gmra.mxu2 %vm478_vm1, %v5533_v0  ;;  %v2064_v47 = vadd.f32 %v4065_v35, %v2021_v24  ;;  %v2674_v36 = vadd.f32 %v2642_v21, %v2545_v33  ;;  %v2739_v35 = vmul.f32 %v5494_v15, %v5330_v40 }
 0x221   : > { %v5548_v20 = vld [vmem:[#allocation3 + $0x62] sm:$0xff]  ;;  %v5562_v58 = vld [vmem:[#allocation3 + $0x6a] sm:$0xff] }
 0x222   : > { %v5550_v54 = vld [vmem:[#allocation3 + $0x68] sm:$0xff]  ;;  %2478 = vst.msk [vmem:[#allocation3 + $0x79] sm:$0xff] %vm756_vm2, %v2391_v37  ;;  %v3319_v4 = vmul.f32 %v5398_v3, %v5548_v20  ;;  %v2096_v62 = vmax.f32 %v2064_v47, 0.0  ;;  %v3320_v24 = vmul.f32 %v5398_v3, %v5562_v58  ;;  %v3029_v49 = vmul.f32 %v5548_v20, %v5370_v29 }
 0x223   : > { %v5552_v26 = vld [vmem:[#allocation3 + $0x69] sm:$0xff]  ;;  %v3126_v60 = vmul.f32 %v5375_v55, %v5550_v54  ;;  %v2282_v9 = vpop.f32.mrf.mxu2  ;;  %v2836_v0 = vmul.f32 %v5550_v54, %v5347_v13  ;;  %v2771_v19 = vadd.f32 %v2739_v35, %v2674_v36 }
 0x224   : > { %v3223_v42 = vmul.f32 %v5390_v18, %v5552_v26  ;;  %v2283_v22 = vadd.f32 %v5302_v43, %v2282_v9  ;;  %3988 = vmatmul.msk.f32.gmra.mxu3 %vm756_vm2, %v3450_v39  ;;  %v3351_v16 = vadd.f32 %v3319_v4, %v3254_v53  ;;  %v5574_v12 = vmin.f32 %v2096_v62, 6.0 }
 0x225   : > { %v3158_v37 = vadd.f32 %v3126_v60, %v3060_v59  ;;  %v2023_v39 = vpop.f32.mrf.mxu1  ;;  %v2932_v59 = vmul.f32 %v5527_v51, %v5368_v28  ;;  %v2933_v35 = vmul.f32 %v5552_v26, %v5368_v28 }
 0x226   : > { %6296 = vst [vmem:[#allocation9_spill] sm:$0xff] %v5574_v12  ;;  %v2360_v23 = vmax.f32 %v2283_v22, 0.0  ;;  %v3387_v33 = vadd.f32 %v5424_v63, %v3351_v16  ;;  %v2024_v15 = vadd.f32 %v5352_v2, %v2023_v39  ;;  %v2546_v39 = vmul.f32 %v5516_v17, %v5317_v25 }
 0x227   : > { %v3255_v21 = vadd.f32 %v3223_v42, %v3158_v37  ;;  %v2964_v60 = vadd.f32 %v2932_v59, %v2867_v31  ;;  %v2868_v42 = vadd.f32 %v2836_v0, %v2771_v19  ;;  %v2643_v59 = vmul.f32 %v5527_v51, %v5319_v38 }
 0x228   : > { %v2392_v47 = vmin.f32 %v2360_v23, 6.0  ;;  %3979 = vmatmul.msk.f32.gmra.mxu2 %vm478_vm1, %v5574_v12  ;;  %v3419_v53 = vmax.f32 %v3387_v33, 0.0  ;;  %v2065_v62 = vadd.f32 %v4066_v45, %v2024_v15  ;;  %v2644_v17 = vmul.f32 %v5552_v26, %v5319_v38 }
 0x229   : > { %v3352_v4 = vadd.f32 %v3320_v24, %v3255_v21  ;;  %v5584_v9 = vld [vmem:[#allocation3 + $0x78] sm:$0xff]  ;;  %v3061_v0 = vadd.f32 %v3029_v49, %v2964_v60  ;;  %v2965_v21 = vadd.f32 %v2933_v35, %v2868_v42  ;;  %v2740_v49 = vmul.f32 %v5548_v20, %v5330_v40 }
 0x22a   : > { %2479 = vst.msk [vmem:[#allocation3 + $0x81] sm:$0xff] %vm756_vm2, %v2392_v47  ;;  %v3451_v22 = vmin.f32 %v3419_v53, 6.0  ;;  %v3127_v36 = vmul.f32 %v5375_v55, %v5584_v9  ;;  %v2097_v23 = vmax.f32 %v2065_v62, 0.0  ;;  %v5595_v33 = vld [vmem:[#allocation3 + $0x79] sm:$0xff]  ;;  %v2547_v60 = vmul.f32 %v5550_v54, %v5317_v25 }
 0x22b   : > { %v3388_v16 = vadd.f32 %v5424_v63, %v3352_v4  ;;  %v2285_v37 = vpop.f32.mrf.mxu2  ;;  %v3030_v4 = vmul.f32 %v5562_v58, %v5370_v29  ;;  %v3224_v45 = vmul.f32 %v5390_v18, %v5595_v33  ;;  %v2675_v54 = vadd.f32 %v2643_v59, %v2546_v39 }
 0x22c   : > { %v2286_v24 = vadd.f32 %v5302_v43, %v2285_v37  ;;  %3989 = vmatmul.msk.f32.gmra.mxu3 %vm756_vm2, %v3451_v22  ;;  %v5601_v19 = vmin.f32 %v2097_v23, 6.0  ;;  %v3159_v15 = vadd.f32 %v3127_v36, %v3061_v0  ;;  %v2837_v26 = vmul.f32 %v5584_v9, %v5347_v13  ;;  %v4067_v37 = vld [vmem:[%s4173_s15 + $0xe0] sm:$0xff] }
 0x22d   : > { %v3420_v31 = vmax.f32 %v3388_v16, 0.0  ;;  %v2026_v53 = vpop.f32.mrf.mxu1  ;;  %v3062_v16 = vadd.f32 %v3030_v4, %v2965_v21  ;;  %v2772_v59 = vadd.f32 %v2740_v49, %v2675_v54 }
 0x22e   : > { %6297 = vst [vmem:[#allocation10_spill] sm:$0xff] %v5601_v19  ;;  %v2361_v47 = vmax.f32 %v2286_v24, 0.0  ;;  %v2027_v51 = vadd.f32 %v5352_v2, %v2026_v53  ;;  %v3256_v23 = vadd.f32 %v3224_v45, %v3159_v15 }
 0x22f   : > { %v3452_v62 = vmin.f32 %v3420_v31, 6.0  ;;  %v2869_v45 = vadd.f32 %v2837_v26, %v2772_v59  ;;  %v4068_v59 = vld [vmem:[%s4173_s15 + $0xe8] sm:$0xff] }
 0x230   : > { %v2393_v42 = vmin.f32 %v2361_v47, 6.0  ;;  %3980 = vmatmul.msk.f32.gmra.mxu2 %vm478_vm1, %v5601_v19  ;;  %v2066_v35 = vadd.f32 %v4067_v37, %v2027_v51  ;;  %v2676_v47 = vadd.f32 %v2644_v17, %v2547_v60  ;;  %v2741_v37 = vmul.f32 %v5562_v58, %v5330_v40 }
 0x231   : > { %v5616_v22 = vld [vmem:[#allocation3 + $0x7a] sm:$0xff]  ;;  %v5630_v31 = vld [vmem:[#allocation3 + $0x82] sm:$0xff] }
 0x232   : > { %v5618_v20 = vld [vmem:[#allocation3 + $0x80] sm:$0xff]  ;;  %2480 = vst.msk [vmem:[#allocation3 + $0x91] sm:$0xff] %vm756_vm2, %v2393_v42  ;;  %v3321_v24 = vmul.f32 %v5398_v3, %v5616_v22  ;;  %v2098_v53 = vmax.f32 %v2066_v35, 0.0  ;;  %v3322_v51 = vmul.f32 %v5398_v3, %v5630_v31  ;;  %v3031_v54 = vmul.f32 %v5616_v22, %v5370_v29 }
 0x233   : > { %v5620_v36 = vld [vmem:[#allocation3 + $0x81] sm:$0xff]  ;;  %v3128_v0 = vmul.f32 %v5375_v55, %v5618_v20  ;;  %v2288_v21 = vpop.f32.mrf.mxu2  ;;  %v2838_v19 = vmul.f32 %v5618_v20, %v5347_v13  ;;  %v2773_v26 = vadd.f32 %v2741_v37, %v2676_v47 }
 0x234   : > { %v3225_v39 = vmul.f32 %v5390_v18, %v5620_v36  ;;  %v2289_v4 = vadd.f32 %v5302_v43, %v2288_v21  ;;  %3990 = vmatmul.msk.f32.gmra.mxu3 %vm756_vm2, %v3452_v62  ;;  %v3353_v15 = vadd.f32 %v3321_v24, %v3256_v23  ;;  %v5642_v12 = vmin.f32 %v2098_v53, 6.0 }
 0x235   : > { %v3160_v42 = vadd.f32 %v3128_v0, %v3062_v16  ;;  %v2029_v62 = vpop.f32.mrf.mxu1  ;;  %v2934_v16 = vmul.f32 %v5595_v33, %v5368_v28  ;;  %v2935_v37 = vmul.f32 %v5620_v36, %v5368_v28 }
 0x236   : > { %6298 = vst [vmem:[#allocation11_spill] sm:$0xff] %v5642_v12  ;;  %v2362_v49 = vmax.f32 %v2289_v4, 0.0  ;;  %v3389_v60 = vadd.f32 %v5424_v63, %v3353_v15  ;;  %v2030_v58 = vadd.f32 %v5352_v2, %v2029_v62  ;;  %v2548_v62 = vmul.f32 %v5584_v9, %v5317_v25 }
 0x237   : > { %v3257_v17 = vadd.f32 %v3225_v39, %v3160_v42  ;;  %v2966_v0 = vadd.f32 %v2934_v16, %v2869_v45  ;;  %v2870_v39 = vadd.f32 %v2838_v19, %v2773_v26  ;;  %v2645_v16 = vmul.f32 %v5595_v33, %v5319_v38 }
 0x238   : > { %v2394_v35 = vmin.f32 %v2362_v49, 6.0  ;;  %3981 = vmatmul.msk.f32.gmra.mxu2 %vm478_vm1, %v5642_v12  ;;  %v3421_v23 = vmax.f32 %v3389_v60, 0.0  ;;  %v2067_v53 = vadd.f32 %v4068_v59, %v2030_v58  ;;  %v2646_v9 = vmul.f32 %v5620_v36, %v5319_v38  ;;  %v4069_v36 = vld [vmem:[%s4173_s15 + $0xf0] sm:$0xff] }
 0x239   : > { %v3354_v24 = vadd.f32 %v3322_v51, %v3257_v17  ;;  %v5652_v21 = vld [vmem:[#allocation3 + $0x90] sm:$0xff]  ;;  %v3063_v19 = vadd.f32 %v3031_v54, %v2966_v0  ;;  %v2967_v17 = vadd.f32 %v2935_v37, %v2870_v39  ;;  %v2742_v54 = vmul.f32 %v5616_v22, %v5330_v40 }
 0x23a   : > { %2481 = vst.msk [vmem:[#allocation3 + $0x99] sm:$0xff] %vm756_vm2, %v2394_v35  ;;  %v3453_v4 = vmin.f32 %v3421_v23, 6.0  ;;  %v3129_v47 = vmul.f32 %v5375_v55, %v5652_v21  ;;  %v2099_v49 = vmax.f32 %v2067_v53, 0.0  ;;  %v5663_v60 = vld [vmem:[#allocation3 + $0x91] sm:$0xff]  ;;  %v2549_v0 = vmul.f32 %v5618_v20, %v5317_v25 }
 0x23b   : > { %v3390_v15 = vadd.f32 %v5424_v63, %v3354_v24  ;;  %v2291_v42 = vpop.f32.mrf.mxu2  ;;  %v3032_v24 = vmul.f32 %v5630_v31, %v5370_v29  ;;  %v3226_v59 = vmul.f32 %v5390_v18, %v5663_v60  ;;  %v2839_v20 = vmul.f32 %v5652_v21, %v5347_v13 }
 0x23c   : > { %v2292_v51 = vadd.f32 %v5302_v43, %v2291_v42  ;;  %3991 = vmatmul.msk.f32.gmra.mxu3 %vm756_vm2, %v3453_v4  ;;  %v5669_v26 = vmin.f32 %v2099_v49, 6.0  ;;  %v3161_v58 = vadd.f32 %v3129_v47, %v3063_v19  ;;  %v2677_v42 = vadd.f32 %v2645_v16, %v2548_v62 }
 0x23d   : > { %v3422_v45 = vmax.f32 %v3390_v15, 0.0  ;;  %v2032_v23 = vpop.f32.mrf.mxu1  ;;  %v3064_v15 = vadd.f32 %v3032_v24, %v2967_v17  ;;  %v2678_v62 = vadd.f32 %v2646_v9, %v2549_v0 }
 0x23e   : > { %6299 = vst [vmem:[#allocation12_spill] sm:$0xff] %v5669_v26  ;;  %v2363_v35 = vmax.f32 %v2292_v51, 0.0  ;;  %v2033_v33 = vadd.f32 %v5352_v2, %v2032_v23  ;;  %v3258_v49 = vadd.f32 %v3226_v59, %v3161_v58  ;;  %v2774_v23 = vadd.f32 %v2742_v54, %v2677_v42 }
 0x23f   : > { %v3454_v53 = vmin.f32 %v3422_v45, 6.0 }
 0x240   : > { %v2395_v39 = vmin.f32 %v2363_v35, 6.0  ;;  %3982 = vmatmul.msk.f32.gmra.mxu2 %vm478_vm1, %v5669_v26  ;;  %v2068_v37 = vadd.f32 %v4069_v36, %v2033_v33  ;;  %v2871_v59 = vadd.f32 %v2839_v20, %v2774_v23  ;;  %v2743_v36 = vmul.f32 %v5630_v31, %v5330_v40  ;;  %v4070_v23 = vld [vmem:[%s4173_s15 + $0xf8] sm:$0xff] }
 0x241   : > { %v5684_v4 = vld [vmem:[#allocation3 + $0x92] sm:$0xff]  ;;  %v5693_v45 = vld [vmem:[#allocation3 + $0x9a] sm:$0xff] }
 0x242   : > { %v3097_v22 = vld [vmem:[#allocation3 + $0x98] sm:$0xff]  ;;  %2482 = vst.msk [vmem:[#allocation3 + $0xa9] sm:$0xff] %vm756_vm2, %v2395_v39  ;;  %v3323_v51 = vmul.f32 %v5398_v3, %v5684_v4  ;;  %v2100_v16 = vmax.f32 %v2068_v37, 0.0  ;;  %v3324_v58 = vmul.f32 %v5398_v3, %v5693_v45  ;;  %v2775_v20 = vadd.f32 %v2743_v36, %v2678_v62 }
 0x243   : > { %v3194_v47 = vld [vmem:[#allocation3 + $0x99] sm:$0xff]  ;;  %v3130_v19 = vmul.f32 %v5375_v55, %v3097_v22  ;;  %v2294_v35 = vpop.f32.mrf.mxu2  ;;  %v2840_v26 = vmul.f32 %v3097_v22, %v5347_v13 }
 0x244   : > { %v3227_v17 = vmul.f32 %v5390_v18, %v3194_v47  ;;  %v2295_v24 = vadd.f32 %v5302_v43, %v2294_v35  ;;  %3992 = vmatmul.msk.f32.gmra.mxu3 %vm756_vm2, %v3454_v53  ;;  %v3355_v39 = vadd.f32 %v3323_v51, %v3258_v49  ;;  %v5703_v12 = vmin.f32 %v2100_v16, 6.0 }
 0x245   : > { %v3162_v33 = vadd.f32 %v3130_v19, %v3064_v15  ;;  %v2035_v42 = vpop.f32.mrf.mxu1  ;;  %v2936_v53 = vmul.f32 %v5663_v60, %v5368_v28  ;;  %v3033_v15 = vmul.f32 %v5684_v4, %v5370_v29 }
 0x246   : > { %v2364_v54 = vmax.f32 %v2295_v24, 0.0  ;;  %v3391_v0 = vadd.f32 %v5424_v63, %v3355_v39  ;;  %v2036_v31 = vadd.f32 %v5352_v2, %v2035_v42 }
 0x247   : > { %v3259_v9 = vadd.f32 %v3227_v17, %v3162_v33  ;;  %v2968_v19 = vadd.f32 %v2936_v53, %v2871_v59  ;;  %v2872_v17 = vadd.f32 %v2840_v26, %v2775_v20  ;;  %v2937_v33 = vmul.f32 %v3194_v47, %v5368_v28 }
 0x248   : > { %v2396_v37 = vmin.f32 %v2364_v54, 6.0  ;;  %3983 = vmatmul.msk.f32.gmra.mxu2 %vm478_vm1, %v5703_v12  ;;  %v3423_v49 = vmax.f32 %v3391_v0, 0.0  ;;  %v2069_v16 = vadd.f32 %v4070_v23, %v2036_v31  ;;  %v2550_v0 = vmul.f32 %v5652_v21, %v5317_v25 }
 0x249   : > { %v3356_v51 = vadd.f32 %v3324_v58, %v3259_v9  ;;  %v5713_v35 = vld [vmem:[#allocation3 + $0xa8] sm:$0xff]  ;;  %v3065_v59 = vadd.f32 %v3033_v15, %v2968_v19  ;;  %v2969_v54 = vadd.f32 %v2937_v33, %v2872_v17  ;;  %v2647_v9 = vmul.f32 %v5663_v60, %v5319_v38 }
 0x24a   : > { %2483 = vst.msk [vmem:[#allocation3 + $0xb1] sm:$0xff] %vm756_vm2, %v2396_v37  ;;  %v3455_v24 = vmin.f32 %v3423_v49, 6.0  ;;  %v3131_v62 = vmul.f32 %v5375_v55, %v5713_v35  ;;  %v2101_v36 = vmax.f32 %v2069_v16, 0.0  ;;  %v5723_v26 = vld [vmem:[#allocation3 + $0xa9] sm:$0xff]  ;;  %v3034_v31 = vmul.f32 %v5693_v45, %v5370_v29 }
 0x24b   : > { %v3392_v39 = vadd.f32 %v5424_v63, %v3356_v51  ;;  %v2297_v2 = vpop.f32.mrf.mxu2  ;;  %v2744_v15 = vmul.f32 %v5684_v4, %v5330_v40  ;;  %v2551_v49 = vmul.f32 %v3097_v22, %v5317_v25  ;;  %v2648_v51 = vmul.f32 %v3194_v47, %v5319_v38 }
 0x24c   : > { %v2298_v58 = vadd.f32 %v5302_v43, %v2297_v2  ;;  %3993 = vmatmul.msk.f32.gmra.mxu3 %vm756_vm2, %v3455_v24  ;;  %v5729_v42 = vmin.f32 %v2101_v36, 6.0  ;;  %v3163_v37 = vadd.f32 %v3131_v62, %v3065_v59  ;;  %v3228_v21 = vmul.f32 %v5390_v18, %v5723_v26 }
 0x24d   : > { %v3424_v20 = vmax.f32 %v3392_v39, 0.0  ;;  %v3066_v17 = vadd.f32 %v3034_v31, %v2969_v54  ;;  %v2679_v24 = vadd.f32 %v2647_v9, %v2550_v0  ;;  %v2841_v39 = vmul.f32 %v5713_v35, %v5347_v13 }
 0x24e   : > { %v2365_v53 = vmax.f32 %v2298_v58, 0.0  ;;  %v3260_v22 = vadd.f32 %v3228_v21, %v3163_v37  ;;  %v2680_v58 = vadd.f32 %v2648_v51, %v2551_v49  ;;  %v2938_v49 = vmul.f32 %v5723_v26, %v5368_v28 }
 0x24f   : > { %v3456_v4 = vmin.f32 %v3424_v20, 6.0  ;;  %v2776_v36 = vadd.f32 %v2744_v15, %v2679_v24  ;;  %v2745_v20 = vmul.f32 %v5693_v45, %v5330_v40 }
 0x250   : > { %v2397_v19 = vmin.f32 %v2365_v53, 6.0  ;;  %3984 = vmatmul.msk.f32.gmra.mxu2 %vm478_vm1, %v5729_v42 }
 0x251   : > { %v3292_v60 = vld [vmem:[#allocation3 + $0xaa] sm:$0xff]  ;;  %v5746_v33 = vld [vmem:[#allocation3 + $0xb2] sm:$0xff]  ;;  %v2873_v53 = vadd.f32 %v2841_v39, %v2776_v36  ;;  %v2777_v51 = vadd.f32 %v2745_v20, %v2680_v58 }
 0x252   : > { %v3099_v23 = vld [vmem:[#allocation3 + $0xb0] sm:$0xff]  ;;  %2484 = vst.msk [vmem:[#allocation3 + $0xc1] sm:$0xff] %vm756_vm2, %v2397_v19  ;;  %v3325_v47 = vmul.f32 %v5398_v3, %v3292_v60  ;;  %v3326_v15 = vmul.f32 %v5398_v3, %v5746_v33  ;;  %v3035_v39 = vmul.f32 %v3292_v60, %v5370_v29 }
 0x253   : > { %v3196_v16 = vld [vmem:[#allocation3 + $0xb1] sm:$0xff]  ;;  %v3132_v62 = vmul.f32 %v5375_v55, %v3099_v23  ;;  %v2300_v2 = vpop.f32.mrf.mxu2  ;;  %v2842_v37 = vmul.f32 %v3099_v23, %v5347_v13 }
 0x254   : > { %v2301_v59 = vadd.f32 %v5302_v43, %v2300_v2  ;;  %3994 = vmatmul.msk.f32.gmra.mxu3 %vm756_vm2, %v3456_v4  ;;  %v3357_v54 = vadd.f32 %v3325_v47, %v3260_v22  ;;  %v3229_v9 = vmul.f32 %v5390_v18, %v3196_v16  ;;  %v2970_v2 = vadd.f32 %v2938_v49, %v2873_v53 }
 0x255   : > { %v3164_v0 = vadd.f32 %v3132_v62, %v3066_v17  ;;  %v2874_v45 = vadd.f32 %v2842_v37, %v2777_v51  ;;  %v2939_v58 = vmul.f32 %v3196_v16, %v5368_v28  ;;  %v2552_v37 = vmul.f32 %v5713_v35, %v5317_v25 }
 0x256   : > { %v2366_v31 = vmax.f32 %v2301_v59, 0.0  ;;  %v3393_v19 = vadd.f32 %v5424_v63, %v3357_v54  ;;  %v2746_v49 = vmul.f32 %v3292_v60, %v5330_v40  ;;  %v2650_v51 = vmul.f32 %v3196_v16, %v5319_v38 }
 0x257   : > { %v3261_v21 = vadd.f32 %v3229_v9, %v3164_v0  ;;  %v3067_v0 = vadd.f32 %v3035_v39, %v2970_v2  ;;  %v2971_v20 = vadd.f32 %v2939_v58, %v2874_v45 }
 0x258   : > { %v2398_v17 = vmin.f32 %v2366_v31, 6.0  ;;  %v3425_v24 = vmax.f32 %v3393_v19, 0.0  ;;  %v2649_v31 = vmul.f32 %v5723_v26, %v5319_v38 }
 0x259   : > { %v3358_v4 = vadd.f32 %v3326_v15, %v3261_v21  ;;  %v5760_v22 = vld [vmem:[#allocation3 + $0xc0] sm:$0xff]  ;;  %v3036_v15 = vmul.f32 %v5746_v33, %v5370_v29 }
 0x25a   : > { %2485 = vst.msk [vmem:[#allocation3 + $0xc9] sm:$0xff] %vm756_vm2, %v2398_v17  ;;  %v3457_v47 = vmin.f32 %v3425_v24, 6.0  ;;  %v3133_v36 = vmul.f32 %v5375_v55, %v5760_v22  ;;  %v3197_v9 = vld [vmem:[#allocation3 + $0xc1] sm:$0xff]  ;;  %v2681_v26 = vadd.f32 %v2649_v31, %v2552_v37 }
 0x25b   : > { %v3394_v62 = vadd.f32 %v5424_v63, %v3358_v4  ;;  %v2303_v59 = vpop.f32.mrf.mxu2  ;;  %v3230_v24 = vmul.f32 %v5390_v18, %v3197_v9  ;;  %v3068_v35 = vadd.f32 %v3036_v15, %v2971_v20 }
 0x25c   : > { %v2304_v54 = vadd.f32 %v5302_v43, %v2303_v59  ;;  %3995 = vmatmul.msk.f32.gmra.mxu3 %vm756_vm2, %v3457_v47  ;;  %v3165_v21 = vadd.f32 %v3133_v36, %v3067_v0  ;;  %v2553_v43 = vmul.f32 %v3099_v23, %v5317_v25  ;;  %v2843_v47 = vmul.f32 %v5760_v22, %v5347_v13 }
 0x25d   : > { %v3426_v19 = vmax.f32 %v3394_v62, 0.0  ;;  %v2778_v59 = vadd.f32 %v2746_v49, %v2681_v26 }
 0x25e   : > { %v2367_v53 = vmax.f32 %v2304_v54, 0.0  ;;  %v3262_v2 = vadd.f32 %v3230_v24, %v3165_v21  ;;  %v2682_v58 = vadd.f32 %v2650_v51, %v2553_v43  ;;  %v5789_v54 = vld [vmem:[%s6276_s8] ss:$0 sm:$0xff] }
 0x25f   : > { %v3458_v62 = vmin.f32 %v3426_v19, 6.0  ;;  %v2747_v19 = vmul.f32 %v5746_v33, %v5330_v40 }
 0x260   : > { %v2399_v17 = vmin.f32 %v2367_v53, 6.0  ;;  %v2875_v53 = vadd.f32 %v2843_v47, %v2778_v59 }
 0x261   : > { %v3294_v4 = vld [vmem:[#allocation3 + $0xc2] sm:$0xff]  ;;  %v5784_v36 = vld [vmem:[#allocation3 + $0xca] sm:$0xff]  ;;  %v2779_v24 = vadd.f32 %v2747_v19, %v2682_v58 }
 0x262   : > { %v3101_v39 = vld [vmem:[#allocation3 + $0xc8] sm:$0xff]  ;;  %2486 = vst.msk [vmem:[#allocation3 + $0xd9] sm:$0xff] %vm756_vm2, %v2399_v17  ;;  %v3327_v60 = vmul.f32 %v5398_v3, %v3294_v4  ;;  %v3328_v51 = vmul.f32 %v5398_v3, %v5784_v36  ;;  %v2940_v17 = vmul.f32 %v3197_v9, %v5368_v28  ;;  %v3037_v47 = vmul.f32 %v3294_v4, %v5370_v29 }
 0x263   : > { %v3198_v45 = vld [vmem:[#allocation3 + $0xc9] sm:$0xff]  ;;  %v3134_v23 = vmul.f32 %v5375_v55, %v3101_v39  ;;  %v2306_v16 = vpop.f32.mrf.mxu2  ;;  %v2844_v21 = vmul.f32 %v3101_v39, %v5347_v13 }
 0x264   : > { %v2307_v0 = vadd.f32 %v5789_v54, %v2306_v16  ;;  %3996 = vmatmul.msk.f32.gmra.mxu3 %vm756_vm2, %v3458_v62  ;;  %v3359_v20 = vadd.f32 %v3327_v60, %v3262_v2  ;;  %v3231_v31 = vmul.f32 %v5390_v18, %v3198_v45  ;;  %v2972_v16 = vadd.f32 %v2940_v17, %v2875_v53 }
 0x265   : > { %v3166_v37 = vadd.f32 %v3134_v23, %v3068_v35  ;;  %v2876_v33 = vadd.f32 %v2844_v21, %v2779_v24  ;;  %v2941_v58 = vmul.f32 %v3198_v45, %v5368_v28  ;;  %v2554_v21 = vmul.f32 %v5760_v22, %v5317_v25 }
 0x266   : > { %v2368_v15 = vmax.f32 %v2307_v0, 0.0  ;;  %v3395_v49 = vadd.f32 %v5424_v63, %v3359_v20  ;;  %v2748_v17 = vmul.f32 %v3294_v4, %v5330_v40  ;;  %v2555_v24 = vmul.f32 %v3101_v39, %v5317_v25 }
 0x267   : > { %v3263_v43 = vadd.f32 %v3231_v31, %v3166_v37  ;;  %v3069_v37 = vadd.f32 %v3037_v47, %v2972_v16  ;;  %v2973_v19 = vadd.f32 %v2941_v58, %v2876_v33 }
 0x268   : > { %v2400_v26 = vmin.f32 %v2368_v15, 6.0  ;;  %v3427_v35 = vmax.f32 %v3395_v49, 0.0  ;;  %v2651_v15 = vmul.f32 %v3197_v9, %v5319_v38 }
 0x269   : > { %v3360_v62 = vadd.f32 %v3328_v51, %v3263_v43  ;;  %v5802_v2 = vld [vmem:[#allocation3 + $0xd8] sm:$0xff]  ;;  %v3038_v51 = vmul.f32 %v5784_v36, %v5370_v29 }
 0x26a   : > { %2487 = vst.msk [vmem:[#allocation3 + $0xe1] sm:$0xff] %vm756_vm2, %v2400_v26  ;;  %v3459_v60 = vmin.f32 %v3427_v35, 6.0  ;;  %v3135_v59 = vmul.f32 %v5375_v55, %v5802_v2  ;;  %v3199_v31 = vld [vmem:[#allocation3 + $0xd9] sm:$0xff]  ;;  %v2652_v26 = vmul.f32 %v3198_v45, %v5319_v38  ;;  %v2683_v9 = vadd.f32 %v2651_v15, %v2554_v21 }
 0x26b   : > { %v3396_v23 = vadd.f32 %v5424_v63, %v3360_v62  ;;  %v2309_v0 = vpop.f32.mrf.mxu2  ;;  %v3232_v62 = vmul.f32 %v5390_v18, %v3199_v31  ;;  %v3070_v33 = vadd.f32 %v3038_v51, %v2973_v19 }
 0x26c   : > { %v2310_v20 = vadd.f32 %v5789_v54, %v2309_v0  ;;  %3997 = vmatmul.msk.f32.gmra.mxu3 %vm756_vm2, %v3459_v60  ;;  %v3167_v43 = vadd.f32 %v3135_v59, %v3069_v37  ;;  %v2780_v58 = vadd.f32 %v2748_v17, %v2683_v9 }
 0x26d   : > { %v3428_v53 = vmax.f32 %v3396_v23, 0.0  ;;  %v2845_v23 = vmul.f32 %v5802_v2, %v5347_v13 }
 0x26e   : > { %v2369_v49 = vmax.f32 %v2310_v20, 0.0  ;;  %v3264_v59 = vadd.f32 %v3232_v62, %v3167_v43  ;;  %v2684_v20 = vadd.f32 %v2652_v26, %v2555_v24  ;;  %v2942_v24 = vmul.f32 %v3199_v31, %v5368_v28 }
 0x26f   : > { %v3460_v16 = vmin.f32 %v3428_v53, 6.0  ;;  %v2749_v53 = vmul.f32 %v5784_v36, %v5330_v40 }
 0x270   : > { %v2401_v35 = vmin.f32 %v2369_v49, 6.0  ;;  %v2877_v49 = vadd.f32 %v2845_v23, %v2780_v58 }
 0x271   : > { %v3296_v47 = vld [vmem:[#allocation3 + $0xda] sm:$0xff]  ;;  %v5825_v0 = vld [vmem:[#allocation3 + $0xe2] sm:$0xff]  ;;  %v2781_v26 = vadd.f32 %v2749_v53, %v2684_v20 }
 0x272   : > { %v3103_v22 = vld [vmem:[#allocation3 + $0xe0] sm:$0xff]  ;;  %2488 = vst.msk [vmem:[#allocation3 + $0xf1] sm:$0xff] %vm756_vm2, %v2401_v35  ;;  %v3329_v4 = vmul.f32 %v5398_v3, %v3296_v47  ;;  %v3330_v17 = vmul.f32 %v5398_v3, %v5825_v0  ;;  %v3039_v23 = vmul.f32 %v3296_v47, %v5370_v29 }
 0x273   : > { %v3200_v60 = vld [vmem:[#allocation3 + $0xe1] sm:$0xff]  ;;  %v3136_v39 = vmul.f32 %v5375_v55, %v3103_v22  ;;  %v2312_v45 = vpop.f32.mrf.mxu2  ;;  %v2846_v43 = vmul.f32 %v3103_v22, %v5347_v13 }
 0x274   : > { %v2313_v37 = vadd.f32 %v5789_v54, %v2312_v45  ;;  %3998 = vmatmul.msk.f32.gmra.mxu3 %vm756_vm2, %v3460_v16  ;;  %v3361_v19 = vadd.f32 %v3329_v4, %v3264_v59  ;;  %v3233_v15 = vmul.f32 %v5390_v18, %v3200_v60  ;;  %v2974_v45 = vadd.f32 %v2942_v24, %v2877_v49 }
 0x275   : > { %v3168_v21 = vadd.f32 %v3136_v39, %v3070_v33  ;;  %v2878_v36 = vadd.f32 %v2846_v43, %v2781_v26  ;;  %v2943_v20 = vmul.f32 %v3200_v60, %v5368_v28  ;;  %v2556_v43 = vmul.f32 %v5802_v2, %v5317_v25 }
 0x276   : > { %v2370_v51 = vmax.f32 %v2313_v37, 0.0  ;;  %v3397_v35 = vadd.f32 %v5424_v63, %v3361_v19  ;;  %v2557_v24 = vmul.f32 %v3103_v22, %v5317_v25  ;;  %v2654_v26 = vmul.f32 %v3200_v60, %v5319_v38 }
 0x277   : > { %v3265_v62 = vadd.f32 %v3233_v15, %v3168_v21  ;;  %v3071_v21 = vadd.f32 %v3039_v23, %v2974_v45  ;;  %v2975_v53 = vadd.f32 %v2943_v20, %v2878_v36 }
 0x278   : > { %v2402_v9 = vmin.f32 %v2370_v51, 6.0  ;;  %v3429_v33 = vmax.f32 %v3397_v35, 0.0  ;;  %v2686_v20 = vadd.f32 %v2654_v26, %v2557_v24 }
 0x279   : > { %v3362_v16 = vadd.f32 %v3330_v17, %v3265_v62  ;;  %v5838_v59 = vld [vmem:[#allocation3 + $0xf0] sm:$0xff]  ;;  %v3040_v62 = vmul.f32 %v5825_v0, %v5370_v29  ;;  %v2750_v17 = vmul.f32 %v3296_v47, %v5330_v40 }
 0x27a   : > { %2489 = vst.msk [vmem:[#allocation3 + $0xf9] sm:$0xff] %vm756_vm2, %v2402_v9  ;;  %v3461_v4 = vmin.f32 %v3429_v33, 6.0  ;;  %v3137_v58 = vmul.f32 %v5375_v55, %v5838_v59  ;;  %v5847_v15 = vld [vmem:[#allocation3 + $0xf1] sm:$0xff] }
 0x27b   : > { %v3398_v39 = vadd.f32 %v5424_v63, %v3362_v16  ;;  %v2315_v37 = vpop.f32.mrf.mxu2  ;;  %v2653_v63 = vmul.f32 %v3199_v31, %v5319_v38  ;;  %v3234_v33 = vmul.f32 %v5390_v18, %v5847_v15  ;;  %v3072_v2 = vadd.f32 %v3040_v62, %v2975_v53  ;;  %v5875_v62 = vld [vmem:[%s6278_s10] ss:$0 sm:$0xff] }
 0x27c   : > { %v2316_v19 = vadd.f32 %v5789_v54, %v2315_v37  ;;  %3999 = vmatmul.msk.f32.gmra.mxu3 %vm756_vm2, %v3461_v4  ;;  %v3169_v35 = vadd.f32 %v3137_v58, %v3071_v21  ;;  %v2847_v4 = vmul.f32 %v5838_v59, %v5347_v13 }
 0x27d   : > { %v3430_v51 = vmax.f32 %v3398_v39, 0.0  ;;  %v2685_v36 = vadd.f32 %v2653_v63, %v2556_v43 }
 0x27e   : > { %v2371_v49 = vmax.f32 %v2316_v19, 0.0  ;;  %v3266_v47 = vadd.f32 %v3234_v33, %v3169_v35 }
 0x27f   : > { %v3462_v39 = vmin.f32 %v3430_v51, 6.0  ;;  %v2782_v37 = vadd.f32 %v2750_v17, %v2685_v36 }
 0x280   : > { %v2403_v9 = vmin.f32 %v2371_v49, 6.0  ;;  %v2751_v49 = vmul.f32 %v5825_v0, %v5330_v40 }
 0x281   : > { %v3298_v16 = vld [vmem:[#allocation3 + $0xf2] sm:$0xff]  ;;  %v5864_v58 = vld [vmem:[#allocation3 + $0xfa] sm:$0xff]  ;;  %v2879_v63 = vadd.f32 %v2847_v4, %v2782_v37 }
 0x282   : > { %v3105_v23 = vld [vmem:[#allocation3 + $0xf8] sm:$0xff]  ;;  %2490 = vst.msk [vmem:[#allocation3 + $0x109] sm:$0xff] %vm756_vm2, %v2403_v9  ;;  %v3331_v22 = vmul.f32 %v5398_v3, %v3298_v16  ;;  %v3332_v26 = vmul.f32 %v5398_v3, %v5864_v58  ;;  %v2944_v9 = vmul.f32 %v5847_v15, %v5368_v28  ;;  %v2783_v33 = vadd.f32 %v2751_v49, %v2686_v20 }
 0x283   : > { %v3202_v31 = vld [vmem:[#allocation3 + $0xf9] sm:$0xff]  ;;  %v3138_v60 = vmul.f32 %v5375_v55, %v3105_v23  ;;  %v2318_v45 = vpop.f32.mrf.mxu2  ;;  %v2848_v51 = vmul.f32 %v3105_v23, %v5347_v13  ;;  %v3041_v4 = vmul.f32 %v3298_v16, %v5370_v29 }
 0x284   : > { %v2319_v19 = vadd.f32 %v5789_v54, %v2318_v45  ;;  %4000 = vmatmul.msk.f32.gmra.mxu3 %vm756_vm2, %v3462_v39  ;;  %v3363_v21 = vadd.f32 %v3331_v22, %v3266_v47  ;;  %v3235_v43 = vmul.f32 %v5390_v18, %v3202_v31  ;;  %v2976_v45 = vadd.f32 %v2944_v9, %v2879_v63 }
 0x285   : > { %v3170_v53 = vadd.f32 %v3138_v60, %v3072_v2  ;;  %v2880_v47 = vadd.f32 %v2848_v51, %v2783_v33  ;;  %v2945_v20 = vmul.f32 %v3202_v31, %v5368_v28  ;;  %v3042_v33 = vmul.f32 %v5864_v58, %v5370_v29 }
 0x286   : > { %v2372_v35 = vmax.f32 %v2319_v19, 0.0  ;;  %v3399_v17 = vadd.f32 %v5875_v62, %v3363_v21 }
 0x287   : > { %v3267_v24 = vadd.f32 %v3235_v43, %v3170_v53  ;;  %v5895_v53 = vld [vmem:[%s6280_s12] ss:$0 sm:$0xff]  ;;  %v3073_v43 = vadd.f32 %v3041_v4, %v2976_v45  ;;  %v2977_v63 = vadd.f32 %v2945_v20, %v2880_v47 }
 0x288   : > { %v2404_v2 = vmin.f32 %v2372_v35, 6.0  ;;  %v3431_v0 = vmax.f32 %v3399_v17, 0.0  ;;  %v2558_v35 = vmul.f32 %v5838_v59, %v5317_v25  ;;  %v2655_v17 = vmul.f32 %v5847_v15, %v5319_v38 }
 0x289   : > { %v3364_v36 = vadd.f32 %v3332_v26, %v3267_v24  ;;  %v5883_v39 = vld [vmem:[#allocation3 + $0x108] sm:$0xff] }
 0x28a   : > { %2491 = vst.msk [vmem:[#allocation3 + $0x111] sm:$0xff] %vm756_vm2, %v2404_v2  ;;  %v3463_v22 = vmin.f32 %v3431_v0, 6.0  ;;  %v3139_v37 = vmul.f32 %v5375_v55, %v5883_v39  ;;  %v5897_v51 = vld [vmem:[#allocation3 + $0x109] sm:$0xff]  ;;  %v2752_v2 = vmul.f32 %v3298_v16, %v5330_v40  ;;  %v2559_v0 = vmul.f32 %v3105_v23, %v5317_v25 }
 0x28b   : > { %v3400_v60 = vadd.f32 %v5875_v62, %v3364_v36  ;;  %v2321_v19 = vpop.f32.mrf.mxu2  ;;  %v2656_v36 = vmul.f32 %v3202_v31, %v5319_v38  ;;  %v3236_v59 = vmul.f32 %v5390_v18, %v5897_v51  ;;  %v2849_v16 = vmul.f32 %v5883_v39, %v5347_v13 }
 0x28c   : > { %v2322_v21 = vadd.f32 %v5789_v54, %v2321_v19  ;;  %4001 = vmatmul.msk.f32.gmra.mxu3 %vm756_vm2, %v3463_v22  ;;  %v3171_v26 = vadd.f32 %v3139_v37, %v3073_v43  ;;  %v2687_v19 = vadd.f32 %v2655_v17, %v2558_v35 }
 0x28d   : > { %v3432_v49 = vmax.f32 %v3400_v60, 0.0  ;;  %v3074_v60 = vadd.f32 %v3042_v33, %v2977_v63  ;;  %v2688_v17 = vadd.f32 %v2656_v36, %v2559_v0 }
 0x28e   : > { %v2373_v24 = vmax.f32 %v2322_v21, 0.0  ;;  %v3599_v9 = vpop.f32.mrf.mxu3  ;;  %v3268_v31 = vadd.f32 %v3236_v59, %v3171_v26  ;;  %v2784_v35 = vadd.f32 %v2752_v2, %v2687_v19  ;;  %v2753_v2 = vmul.f32 %v5864_v58, %v5330_v40 }
 0x28f   : > { %v3600_v47 = vadd.f32 %v5895_v53, %v3599_v9  ;;  %v3464_v22 = vmin.f32 %v3432_v49, 6.0  ;;  %v2946_v19 = vmul.f32 %v5897_v51, %v5368_v28 }
 0x290   : > { %v2405_v4 = vmin.f32 %v2373_v24, 6.0 }
 0x291   : > { %v5911_v15 = vld [vmem:[#allocation3 + $0x10a] sm:$0xff]  ;;  %v3695_v23 = vadd.f32 %v3600_v47, %v4981_v50  ;;  %v5920_v43 = vld [vmem:[#allocation3 + $0x112] sm:$0xff] }
 0x292   : > { %v3107_v45 = vld [vmem:[#allocation3 + $0x110] sm:$0xff]  ;;  %2492 = vst.msk [vmem:[#allocation3 + $0x121] sm:$0xff] %vm756_vm2, %v2405_v4  ;;  %v3333_v20 = vmul.f32 %v5398_v3, %v5911_v15  ;;  %v3334_v26 = vmul.f32 %v5398_v3, %v5920_v43  ;;  %v2881_v4 = vadd.f32 %v2849_v16, %v2784_v35 }
 0x293   : > { %v3204_v37 = vld [vmem:[#allocation3 + $0x111] sm:$0xff]  ;;  %v3140_v21 = vmul.f32 %v5375_v55, %v3107_v45  ;;  %v2324_v49 = vpop.f32.mrf.mxu2  ;;  %v3727_v24 = vmax.f32 %v3695_v23, 0.0  ;;  %v2850_v0 = vmul.f32 %v3107_v45, %v5347_v13  ;;  %v3043_v23 = vmul.f32 %v5911_v15, %v5370_v29 }
 0x294   : > { %v3237_v63 = vmul.f32 %v5390_v18, %v3204_v37  ;;  %v2325_v9 = vadd.f32 %v5789_v54, %v2324_v49  ;;  %4002 = vmatmul.msk.f32.gmra.mxu3 %vm756_vm2, %v3464_v22  ;;  %v3365_v33 = vadd.f32 %v3333_v20, %v3268_v31  ;;  %v2785_v31 = vadd.f32 %v2753_v2, %v2688_v17 }
 0x295   : > { %v3172_v50 = vadd.f32 %v3140_v21, %v3074_v60  ;;  %v3759_v36 = vmin.f32 %v3727_v24, 6.0  ;;  %v2978_v49 = vadd.f32 %v2946_v19, %v2881_v4  ;;  %v2947_v2 = vmul.f32 %v3204_v37, %v5368_v28 }
 0x296   : > { %v2374_v47 = vmax.f32 %v2325_v9, 0.0  ;;  %v3401_v59 = vadd.f32 %v5875_v62, %v3365_v33  ;;  %v3602_v60 = vpop.f32.mrf.mxu3  ;;  %v2882_v24 = vadd.f32 %v2850_v0, %v2785_v31 }
 0x297   : > { %v3269_v22 = vadd.f32 %v3237_v63, %v3172_v50  ;;  %3791 = vst.msk [vmem:[%s5930_s28] sm:$0xff] %vm478_vm1, %v3759_v36  ;;  %v3603_v58 = vadd.f32 %v5895_v53, %v3602_v60  ;;  %v3075_v4 = vadd.f32 %v3043_v23, %v2978_v49  ;;  %v2754_v23 = vmul.f32 %v5911_v15, %v5330_v40 }
 0x298   : > { %v2406_v16 = vmin.f32 %v2374_v47, 6.0  ;;  %v3433_v20 = vmax.f32 %v3401_v59, 0.0  ;;  %v2560_v59 = vmul.f32 %v5883_v39, %v5317_v25 }
 0x299   : > { %v3366_v21 = vadd.f32 %v3334_v26, %v3269_v22  ;;  %v5945_v35 = vld [vmem:[#allocation3 + $0x120] sm:$0xff]  ;;  %v3696_v63 = vadd.f32 %v3603_v58, %v5009_v34  ;;  %v2979_v34 = vadd.f32 %v2947_v2, %v2882_v24  ;;  %v2657_v22 = vmul.f32 %v5897_v51, %v5319_v38 }
 0x29a   : > { %2493 = vst.msk [vmem:[#allocation3 + $0x129] sm:$0xff] %vm756_vm2, %v2406_v16  ;;  %v3465_v9 = vmin.f32 %v3433_v20, 6.0  ;;  %v3141_v17 = vmul.f32 %v5375_v55, %v5945_v35  ;;  %v5955_v47 = vld [vmem:[#allocation3 + $0x121] sm:$0xff]  ;;  %v3044_v58 = vmul.f32 %v5920_v43, %v5370_v29  ;;  %v2561_v20 = vmul.f32 %v3107_v45, %v5317_v25 }
 0x29b   : > { %v3402_v33 = vadd.f32 %v5875_v62, %v3366_v21  ;;  %v2327_v50 = vpop.f32.mrf.mxu2  ;;  %v3728_v36 = vmax.f32 %v3696_v63, 0.0  ;;  %v2658_v21 = vmul.f32 %v3204_v37, %v5319_v38  ;;  %v3238_v51 = vmul.f32 %v5390_v18, %v5955_v47 }
 0x29c   : > { %v2328_v26 = vadd.f32 %v5789_v54, %v2327_v50  ;;  %4003 = vmatmul.msk.f32.gmra.mxu3 %vm756_vm2, %v3465_v9  ;;  %v3173_v31 = vadd.f32 %v3141_v17, %v3075_v4  ;;  %v3076_v9 = vadd.f32 %v3044_v58, %v2979_v34  ;;  %v2689_v50 = vadd.f32 %v2657_v22, %v2560_v59 }
 0x29d   : > { %v3434_v0 = vmax.f32 %v3402_v33, 0.0  ;;  %v3760_v60 = vmin.f32 %v3728_v36, 6.0  ;;  %v2851_v15 = vmul.f32 %v5945_v35, %v5347_v13  ;;  %v2755_v58 = vmul.f32 %v5920_v43, %v5330_v40 }
 0x29e   : > { %v2375_v19 = vmax.f32 %v2328_v26, 0.0  ;;  %v3270_v37 = vadd.f32 %v3238_v51, %v3173_v31  ;;  %v2786_v34 = vadd.f32 %v2754_v23, %v2689_v50 }
 0x29f   : > { %v3605_v16 = vpop.f32.mrf.mxu3  ;;  %3792 = vst.msk [vmem:[%s5930_s28 + $0x8] sm:$0xff] %vm478_vm1, %v3760_v60  ;;  %v3466_v24 = vmin.f32 %v3434_v0, 6.0  ;;  %v2690_v60 = vadd.f32 %v2658_v21, %v2561_v20 }
 0x2a0   : > { %v2407_v39 = vmin.f32 %v2375_v19, 6.0  ;;  %v3606_v49 = vadd.f32 %v5895_v53, %v3605_v16  ;;  %v2883_v16 = vadd.f32 %v2851_v15, %v2786_v34 }
 0x2a1   : > { %v3302_v63 = vld [vmem:[#allocation3 + $0x122] sm:$0xff]  ;;  %v5978_v26 = vld [vmem:[#allocation3 + $0x12a] sm:$0xff]  ;;  %v2787_v50 = vadd.f32 %v2755_v58, %v2690_v60 }
 0x2a2   : > { %v3109_v33 = vld [vmem:[#allocation3 + $0x128] sm:$0xff]  ;;  %2494 = vst.msk [vmem:[#allocation3 + $0x139] sm:$0xff] %vm756_vm2, %v2407_v39  ;;  %v3697_v45 = vadd.f32 %v3606_v49, %v5033_v7  ;;  %v3335_v2 = vmul.f32 %v5398_v3, %v3302_v63  ;;  %v3336_v31 = vmul.f32 %v5398_v3, %v5978_v26 }
 0x2a3   : > { %v3206_v17 = vld [vmem:[#allocation3 + $0x129] sm:$0xff]  ;;  %v3142_v36 = vmul.f32 %v5375_v55, %v3109_v33  ;;  %v2330_v4 = vpop.f32.mrf.mxu2  ;;  %v2852_v39 = vmul.f32 %v3109_v33, %v5347_v13 }
 0x2a4   : > { %v3239_v0 = vmul.f32 %v5390_v18, %v3206_v17  ;;  %v3729_v59 = vmax.f32 %v3697_v45, 0.0  ;;  %v2331_v22 = vadd.f32 %v5789_v54, %v2330_v4  ;;  %4004 = vmatmul.msk.f32.gmra.mxu3 %vm756_vm2, %v3466_v24  ;;  %v3367_v19 = vadd.f32 %v3335_v2, %v3270_v37 }
 0x2a5   : > { %v3174_v7 = vadd.f32 %v3142_v36, %v3076_v9  ;;  %v2948_v24 = vmul.f32 %v5955_v47, %v5368_v28  ;;  %v3045_v9 = vmul.f32 %v3302_v63, %v5370_v29  ;;  %v2884_v4 = vadd.f32 %v2852_v39, %v2787_v50 }
 0x2a6   : > { %v3761_v49 = vmin.f32 %v3729_v59, 6.0  ;;  %v2376_v23 = vmax.f32 %v2331_v22, 0.0  ;;  %v3403_v20 = vadd.f32 %v5875_v62, %v3367_v19  ;;  %v2949_v19 = vmul.f32 %v3206_v17, %v5368_v28 }
 0x2a7   : > { %v3271_v21 = vadd.f32 %v3239_v0, %v3174_v7  ;;  %v3608_v51 = vpop.f32.mrf.mxu3  ;;  %v2980_v2 = vadd.f32 %v2948_v24, %v2883_v16  ;;  %v3046_v50 = vmul.f32 %v5978_v26, %v5370_v29 }
 0x2a8   : > { %3793 = vst.msk [vmem:[%s5930_s28 + $0x10] sm:$0xff] %vm478_vm1, %v3761_v49  ;;  %v2408_v15 = vmin.f32 %v2376_v23, 6.0  ;;  %v3609_v45 = vadd.f32 %v5895_v53, %v3608_v51  ;;  %v3435_v43 = vmax.f32 %v3403_v20, 0.0  ;;  %v2562_v49 = vmul.f32 %v5945_v35, %v5317_v25 }
 0x2a9   : > { %v3368_v37 = vadd.f32 %v3336_v31, %v3271_v21  ;;  %v5995_v36 = vld [vmem:[#allocation3 + $0x138] sm:$0xff]  ;;  %v3077_v16 = vadd.f32 %v3045_v9, %v2980_v2  ;;  %v2659_v23 = vmul.f32 %v5955_v47, %v5319_v38  ;;  %v2563_v9 = vmul.f32 %v3109_v33, %v5317_v25 }
 0x2aa   : > { %2495 = vst.msk [vmem:[#allocation3 + $0x141] sm:$0xff] %vm756_vm2, %v2408_v15  ;;  %v3698_v0 = vadd.f32 %v3609_v45, %v5065_v57  ;;  %v3467_v34 = vmin.f32 %v3435_v43, 6.0  ;;  %v3143_v60 = vmul.f32 %v5375_v55, %v5995_v36  ;;  %v6005_v39 = vld [vmem:[#allocation3 + $0x139] sm:$0xff]  ;;  %v2981_v57 = vadd.f32 %v2949_v19, %v2884_v4 }
 0x2ab   : > { %v3404_v59 = vadd.f32 %v5875_v62, %v3368_v37  ;;  %v2333_v22 = vpop.f32.mrf.mxu2  ;;  %v2756_v15 = vmul.f32 %v3302_v63, %v5330_v40  ;;  %v2660_v45 = vmul.f32 %v3206_v17, %v5319_v38  ;;  %v3240_v47 = vmul.f32 %v5390_v18, %v6005_v39 }
 0x2ac   : > { %v3730_v7 = vmax.f32 %v3698_v0, 0.0  ;;  %v2334_v31 = vadd.f32 %v5789_v54, %v2333_v22  ;;  %4005 = vmatmul.msk.f32.gmra.mxu3 %vm756_vm2, %v3467_v34  ;;  %v3175_v51 = vadd.f32 %v3143_v60, %v3077_v16  ;;  %v3078_v4 = vadd.f32 %v3046_v50, %v2981_v57 }
 0x2ad   : > { %v3436_v58 = vmax.f32 %v3404_v59, 0.0  ;;  %v2691_v59 = vadd.f32 %v2659_v23, %v2562_v49  ;;  %v2853_v63 = vmul.f32 %v5995_v36, %v5347_v13 }
 0x2ae   : > { %v3762_v20 = vmin.f32 %v3730_v7, 6.0  ;;  %v2377_v21 = vmax.f32 %v2334_v31, 0.0  ;;  %v3272_v17 = vadd.f32 %v3240_v47, %v3175_v51  ;;  %v2757_v51 = vmul.f32 %v5978_v26, %v5330_v40 }
 0x2af   : > { %v3611_v24 = vpop.f32.mrf.mxu3  ;;  %v3468_v37 = vmin.f32 %v3436_v58, 6.0  ;;  %v2788_v16 = vadd.f32 %v2756_v15, %v2691_v59  ;;  %v2692_v58 = vadd.f32 %v2660_v45, %v2563_v9 }
 0x2b0   : > { %3794 = vst.msk [vmem:[%s5930_s28 + $0x18] sm:$0xff] %vm478_vm1, %v3762_v20  ;;  %v2409_v43 = vmin.f32 %v2377_v21, 6.0  ;;  %v3612_v35 = vadd.f32 %v5895_v53, %v3611_v24 }
 0x2b1   : > { %v3304_v2 = vld [vmem:[#allocation3 + $0x13a] sm:$0xff]  ;;  %v6027_v19 = vld [vmem:[#allocation3 + $0x142] sm:$0xff]  ;;  %v2885_v21 = vadd.f32 %v2853_v63, %v2788_v16 }
 0x2b2   : > { %v3111_v0 = vld [vmem:[#allocation3 + $0x140] sm:$0xff]  ;;  %2496 = vst.msk [vmem:[#allocation3 + $0x151] sm:$0xff] %vm756_vm2, %v2409_v43  ;;  %v3699_v33 = vadd.f32 %v3612_v35, %v5094_v52  ;;  %v3337_v60 = vmul.f32 %v5398_v3, %v3304_v2  ;;  %v3338_v20 = vmul.f32 %v5398_v3, %v6027_v19  ;;  %v2950_v35 = vmul.f32 %v6005_v39, %v5368_v28 }
 0x2b3   : > { %v3208_v34 = vld [vmem:[#allocation3 + $0x141] sm:$0xff]  ;;  %v3144_v22 = vmul.f32 %v5375_v55, %v3111_v0  ;;  %v2336_v7 = vpop.f32.mrf.mxu2  ;;  %v2854_v24 = vmul.f32 %v3111_v0, %v5347_v13  ;;  %v3047_v47 = vmul.f32 %v3304_v2, %v5370_v29 }
 0x2b4   : > { %v3241_v31 = vmul.f32 %v5390_v18, %v3208_v34  ;;  %v3731_v57 = vmax.f32 %v3699_v33, 0.0  ;;  %v2337_v49 = vadd.f32 %v5789_v54, %v2336_v7  ;;  %4006 = vmatmul.msk.f32.gmra.mxu3 %vm756_vm2, %v3468_v37  ;;  %v3369_v23 = vadd.f32 %v3337_v60, %v3272_v17 }
 0x2b5   : > { %v3176_v52 = vadd.f32 %v3144_v22, %v3078_v4  ;;  %v2789_v37 = vadd.f32 %v2757_v51, %v2692_v58  ;;  %v2982_v33 = vadd.f32 %v2950_v35, %v2885_v21  ;;  %v2758_v35 = vmul.f32 %v3304_v2, %v5330_v40 }
 0x2b6   : > { %v3763_v50 = vmin.f32 %v3731_v57, 6.0  ;;  %v2378_v15 = vmax.f32 %v2337_v49, 0.0  ;;  %v3405_v9 = vadd.f32 %v5875_v62, %v3369_v23  ;;  %v2951_v57 = vmul.f32 %v3208_v34, %v5368_v28 }
 0x2b7   : > { %v3273_v45 = vadd.f32 %v3241_v31, %v3176_v52  ;;  %v3614_v43 = vpop.f32.mrf.mxu3  ;;  %v2886_v60 = vadd.f32 %v2854_v24, %v2789_v37  ;;  %v3079_v52 = vadd.f32 %v3047_v47, %v2982_v33  ;;  %v2661_v24 = vmul.f32 %v6005_v39, %v5319_v38 }
 0x2b8   : > { %3795 = vst.msk [vmem:[%s5930_s28 + $0x20] sm:$0xff] %vm478_vm1, %v3763_v50  ;;  %v2410_v4 = vmin.f32 %v2378_v15, 6.0  ;;  %v3615_v59 = vadd.f32 %v5895_v53, %v3614_v43  ;;  %v3437_v26 = vmax.f32 %v3405_v9, 0.0  ;;  %v3048_v43 = vmul.f32 %v6027_v19, %v5370_v29 }
 0x2b9   : > { %v3370_v63 = vadd.f32 %v3338_v20, %v3273_v45  ;;  %v6044_v17 = vld [vmem:[#allocation3 + $0x150] sm:$0xff]  ;;  %v2983_v51 = vadd.f32 %v2951_v57, %v2886_v60  ;;  %v2565_v47 = vmul.f32 %v3111_v0, %v5317_v25  ;;  %v2662_v37 = vmul.f32 %v3208_v34, %v5319_v38 }
 0x2ba   : > { %2497 = vst.msk [vmem:[#allocation3 + $0x159] sm:$0xff] %vm756_vm2, %v2410_v4  ;;  %v3700_v22 = vadd.f32 %v3615_v59, %v5126_v32  ;;  %v3469_v7 = vmin.f32 %v3437_v26, 6.0  ;;  %v3145_v16 = vmul.f32 %v5375_v55, %v6044_v17  ;;  %v3209_v21 = vld [vmem:[#allocation3 + $0x151] sm:$0xff]  ;;  %v2564_v32 = vmul.f32 %v5995_v36, %v5317_v25 }
 0x2bb   : > { %v3406_v31 = vadd.f32 %v5875_v62, %v3370_v63  ;;  %v2339_v58 = vpop.f32.mrf.mxu2  ;;  %v3242_v39 = vmul.f32 %v5390_v18, %v3209_v21  ;;  %v3080_v63 = vadd.f32 %v3048_v43, %v2983_v51  ;;  %v2855_v2 = vmul.f32 %v6044_v17, %v5347_v13 }
 0x2bc   : > { %v3732_v49 = vmax.f32 %v3700_v22, 0.0  ;;  %v2340_v23 = vadd.f32 %v5789_v54, %v2339_v58  ;;  %4007 = vmatmul.msk.f32.gmra.mxu3 %vm756_vm2, %v3469_v7  ;;  %v3177_v9 = vadd.f32 %v3145_v16, %v3079_v52  ;;  %v2693_v22 = vadd.f32 %v2661_v24, %v2564_v32 }
 0x2bd   : > { %v3438_v20 = vmax.f32 %v3406_v31, 0.0 }
 0x2be   : > { %v3764_v50 = vmin.f32 %v3732_v49, 6.0  ;;  %v2379_v15 = vmax.f32 %v2340_v23, 0.0  ;;  %v3274_v34 = vadd.f32 %v3242_v39, %v3177_v9  ;;  %v2790_v49 = vadd.f32 %v2758_v35, %v2693_v22 }
 0x2bf   : > { %v3617_v45 = vpop.f32.mrf.mxu3  ;;  %v3470_v59 = vmin.f32 %v3438_v20, 6.0  ;;  %v2694_v23 = vadd.f32 %v2662_v37, %v2565_v47  ;;  %v2952_v37 = vmul.f32 %v3209_v21, %v5368_v28 }
 0x2c0   : > { %3796 = vst.msk [vmem:[%s5930_s28 + $0x28] sm:$0xff] %vm478_vm1, %v3764_v50  ;;  %v2411_v4 = vmin.f32 %v2379_v15, 6.0  ;;  %v3618_v36 = vadd.f32 %v5895_v53, %v3617_v45  ;;  %v2887_v24 = vadd.f32 %v2855_v2, %v2790_v49  ;;  %v2759_v50 = vmul.f32 %v6027_v19, %v5330_v40 }
 0x2c1   : > { %v3306_v26 = vld [vmem:[#allocation3 + $0x152] sm:$0xff]  ;;  %v6078_v16 = vld [vmem:[#allocation3 + $0x15a] sm:$0xff] }
 0x2c2   : > { %v6067_v33 = vld [vmem:[#allocation3 + $0x158] sm:$0xff]  ;;  %2498 = vst.msk [vmem:[#allocation3 + $0x169] sm:$0xff] %vm756_vm2, %v2411_v4  ;;  %v3701_v0 = vadd.f32 %v3618_v36, %v5153_v48  ;;  %v3339_v7 = vmul.f32 %v5398_v3, %v3306_v26  ;;  %v3340_v32 = vmul.f32 %v5398_v3, %v6078_v16  ;;  %v3049_v4 = vmul.f32 %v3306_v26, %v5370_v29 }
 0x2c3   : > { %v6069_v60 = vld [vmem:[#allocation3 + $0x159] sm:$0xff]  ;;  %v3146_v31 = vmul.f32 %v5375_v55, %v6067_v33  ;;  %v2342_v58 = vpop.f32.mrf.mxu2  ;;  %v2856_v15 = vmul.f32 %v6067_v33, %v5347_v13  ;;  %v2791_v36 = vadd.f32 %v2759_v50, %v2694_v23  ;;  %v2984_v22 = vadd.f32 %v2952_v37, %v2887_v24 }
 0x2c4   : > { %v3243_v57 = vmul.f32 %v5390_v18, %v6069_v60  ;;  %v3733_v52 = vmax.f32 %v3701_v0, 0.0  ;;  %v2343_v20 = vadd.f32 %v5789_v54, %v2342_v58  ;;  %4008 = vmatmul.msk.f32.gmra.mxu3 %vm756_vm2, %v3470_v59  ;;  %v3371_v48 = vadd.f32 %v3339_v7, %v3274_v34 }
 0x2c5   : > { %v3178_v51 = vadd.f32 %v3146_v31, %v3080_v63  ;;  %v2888_v0 = vadd.f32 %v2856_v15, %v2791_v36  ;;  %v2566_v34 = vmul.f32 %v6044_v17, %v5317_v25  ;;  %v2663_v7 = vmul.f32 %v3209_v21, %v5319_v38 }
 0x2c6   : > { %v3765_v9 = vmin.f32 %v3733_v52, 6.0  ;;  %v2380_v45 = vmax.f32 %v2343_v20, 0.0  ;;  %v3407_v43 = vadd.f32 %v5875_v62, %v3371_v48  ;;  %v2953_v52 = vmul.f32 %v6069_v60, %v5368_v28 }
 0x2c7   : > { %v3275_v35 = vadd.f32 %v3243_v57, %v3178_v51  ;;  %v3620_v47 = vpop.f32.mrf.mxu3  ;;  %v3081_v17 = vadd.f32 %v3049_v4, %v2984_v22  ;;  %v2664_v37 = vmul.f32 %v6069_v60, %v5319_v38 }
 0x2c8   : > { %3797 = vst.msk [vmem:[%s5930_s28 + $0x30] sm:$0xff] %vm478_vm1, %v3765_v9  ;;  %v2412_v39 = vmin.f32 %v2380_v45, 6.0  ;;  %v3621_v59 = vadd.f32 %v5895_v53, %v3620_v47  ;;  %v3439_v19 = vmax.f32 %v3407_v43, 0.0  ;;  %v2695_v9 = vadd.f32 %v2663_v7, %v2566_v34 }
 0x2c9   : > { %v3372_v63 = vadd.f32 %v3340_v32, %v3275_v35  ;;  %v3114_v2 = vld [vmem:[#allocation3 + $0x168] sm:$0xff]  ;;  %v2985_v32 = vadd.f32 %v2953_v52, %v2888_v0  ;;  %v3050_v43 = vmul.f32 %v6078_v16, %v5370_v29  ;;  %v2567_v47 = vmul.f32 %v6067_v33, %v5317_v25 }
 0x2ca   : > { %2499 = vst.msk [vmem:[#allocation3 + $0x171] sm:$0xff] %vm756_vm2, %v2412_v39  ;;  %v3702_v31 = vadd.f32 %v3621_v59, %v5177_v1  ;;  %v3471_v58 = vmin.f32 %v3439_v19, 6.0  ;;  %v3147_v49 = vmul.f32 %v5375_v55, %v3114_v2  ;;  %v3211_v51 = vld [vmem:[#allocation3 + $0x169] sm:$0xff]  ;;  %v2760_v1 = vmul.f32 %v3306_v26, %v5330_v40 }
 0x2cb   : > { %v3408_v57 = vadd.f32 %v5875_v62, %v3372_v63  ;;  %v2345_v23 = vpop.f32.mrf.mxu2  ;;  %v2857_v35 = vmul.f32 %v3114_v2, %v5347_v13  ;;  %v3244_v36 = vmul.f32 %v5390_v18, %v3211_v51  ;;  %v3082_v19 = vadd.f32 %v3050_v43, %v2985_v32 }
 0x2cc   : > { %v3734_v20 = vmax.f32 %v3702_v31, 0.0  ;;  %v2346_v48 = vadd.f32 %v5789_v54, %v2345_v23  ;;  %4009 = vmatmul.msk.f32.gmra.mxu3 %vm756_vm2, %v3471_v58  ;;  %v3179_v15 = vadd.f32 %v3147_v49, %v3081_v17  ;;  %v2792_v0 = vadd.f32 %v2760_v1, %v2695_v9 }
 0x2cd   : > { %v3440_v21 = vmax.f32 %v3408_v57, 0.0  ;;  %v2696_v23 = vadd.f32 %v2664_v37, %v2567_v47  ;;  %v2761_v52 = vmul.f32 %v6078_v16, %v5330_v40  ;;  %v2568_v1 = vmul.f32 %v3114_v2, %v5317_v25 }
 0x2ce   : > { %v3766_v24 = vmin.f32 %v3734_v20, 6.0  ;;  %v2381_v50 = vmax.f32 %v2346_v48, 0.0  ;;  %v3276_v34 = vadd.f32 %v3244_v36, %v3179_v15  ;;  %v2889_v49 = vadd.f32 %v2857_v35, %v2792_v0 }
 0x2cf   : > { %v3623_v45 = vpop.f32.mrf.mxu3  ;;  %v3472_v39 = vmin.f32 %v3440_v21, 6.0  ;;  %v2793_v35 = vadd.f32 %v2761_v52, %v2696_v23 }
 0x2d0   : > { %3798 = vst.msk [vmem:[%s5930_s28 + $0x38] sm:$0xff] %vm478_vm1, %v3766_v24  ;;  %v2413_v4 = vmin.f32 %v2381_v50, 6.0  ;;  %v3624_v26 = vadd.f32 %v5895_v53, %v3623_v45  ;;  %v2665_v24 = vmul.f32 %v3211_v51, %v5319_v38  ;;  %v2954_v45 = vmul.f32 %v3211_v51, %v5368_v28 }
 0x2d1   : > { %v3308_v59 = vld [vmem:[#allocation3 + $0x16a] sm:$0xff]  ;;  %v6123_v31 = vld [vmem:[#allocation3 + $0x172] sm:$0xff] }
 0x2d2   : > { %v3115_v63 = vld [vmem:[#allocation3 + $0x170] sm:$0xff]  ;;  %2500 = vst.msk [vmem:[#allocation3 + $0x181] sm:$0xff] %vm756_vm2, %v2413_v4  ;;  %v3703_v33 = vadd.f32 %v3624_v26, %v5200_v10  ;;  %v3341_v60 = vmul.f32 %v5398_v3, %v3308_v59  ;;  %v3342_v21 = vmul.f32 %v5398_v3, %v6123_v31  ;;  %v3051_v43 = vmul.f32 %v3308_v59, %v5370_v29 }
 0x2d3   : > { %v3212_v22 = vld [vmem:[#allocation3 + $0x171] sm:$0xff]  ;;  %v3148_v7 = vmul.f32 %v5375_v55, %v3115_v63  ;;  %v2348_v58 = vpop.f32.mrf.mxu2  ;;  %v2858_v32 = vmul.f32 %v3115_v63, %v5347_v13  ;;  %v2986_v26 = vadd.f32 %v2954_v45, %v2889_v49  ;;  %v2762_v0 = vmul.f32 %v3308_v59, %v5330_v40 }
 0x2d4   : > { %v3245_v57 = vmul.f32 %v5390_v18, %v3212_v22  ;;  %v3735_v20 = vmax.f32 %v3703_v33, 0.0  ;;  %v2349_v48 = vadd.f32 %v5789_v54, %v2348_v58  ;;  %4010 = vmatmul.msk.f32.gmra.mxu3 %vm756_vm2, %v3472_v39  ;;  %v3373_v10 = vadd.f32 %v3341_v60, %v3276_v34 }
 0x2d5   : > { %v3180_v17 = vadd.f32 %v3148_v7, %v3082_v19  ;;  %v2890_v39 = vadd.f32 %v2858_v32, %v2793_v35  ;;  %v2697_v19 = vadd.f32 %v2665_v24, %v2568_v1  ;;  %v2955_v7 = vmul.f32 %v3212_v22, %v5368_v28 }
 0x2d6   : > { %v3767_v50 = vmin.f32 %v3735_v20, 6.0  ;;  %v2382_v15 = vmax.f32 %v2349_v48, 0.0  ;;  %v3409_v16 = vadd.f32 %v5875_v62, %v3373_v10  ;;  %v2666_v49 = vmul.f32 %v3212_v22, %v5319_v38  ;;  %v3118_v10 = vld [vmem:[#allocation3 + $0x198] sm:$0xff] }
 0x2d7   : > { %v3277_v9 = vadd.f32 %v3245_v57, %v3180_v17  ;;  %v3626_v54 = vpop.f32.mrf.mxu3  ;;  %v2569_v57 = vmul.f32 %v3115_v63, %v5317_v25  ;;  %v3083_v59 = vadd.f32 %v3051_v43, %v2986_v26  ;;  %v2987_v20 = vadd.f32 %v2955_v7, %v2890_v39 }
 0x2d8   : > { %3799 = vst.msk [vmem:[%s5930_s28 + $0x40] sm:$0xff] %vm478_vm1, %v3767_v50  ;;  %v2414_v47 = vmin.f32 %v2382_v15, 6.0  ;;  %v3627_v37 = vadd.f32 %v5895_v53, %v3626_v54  ;;  %v3441_v4 = vmax.f32 %v3409_v16, 0.0  ;;  %v2794_v48 = vadd.f32 %v2762_v0, %v2697_v19 }
 0x2d9   : > { %v3374_v2 = vadd.f32 %v3342_v21, %v3277_v9  ;;  %v3116_v36 = vld [vmem:[#allocation3 + $0x180] sm:$0xff]  ;;  %v3052_v1 = vmul.f32 %v6123_v31, %v5370_v29  ;;  %v2698_v25 = vadd.f32 %v2666_v49, %v2569_v57  ;;  %v3151_v22 = vmul.f32 %v5375_v55, %v3118_v10 }
 0x2da   : > { %2501 = vst.msk [vmem:[#allocation3 + $0x189] sm:$0xff] %vm756_vm2, %v2414_v47  ;;  %v3704_v51 = vadd.f32 %v3627_v37, %v5223_v5  ;;  %v3473_v33 = vmin.f32 %v3441_v4, 6.0  ;;  %v3149_v60 = vmul.f32 %v5375_v55, %v3116_v36  ;;  %v2859_v58 = vmul.f32 %v3116_v36, %v5347_v13  ;;  %v3213_v5 = vld [vmem:[#allocation3 + $0x181] sm:$0xff] }
 0x2db   : > { %v3410_v34 = vadd.f32 %v5875_v62, %v3374_v2  ;;  %v3246_v63 = vmul.f32 %v5390_v18, %v3213_v5  ;;  %v3084_v16 = vadd.f32 %v3052_v1, %v2987_v20  ;;  %v2956_v45 = vmul.f32 %v3213_v5, %v5368_v28  ;;  %v3215_v2 = vld [vmem:[#allocation3 + $0x199] sm:$0xff] }
 0x2dc   : > { %v3736_v23 = vmax.f32 %v3704_v51, 0.0  ;;  %4011 = vmatmul.msk.f32.gmra.mxu3 %vm756_vm2, %v3473_v33  ;;  %v3181_v21 = vadd.f32 %v3149_v60, %v3083_v59  ;;  %v2891_v24 = vadd.f32 %v2859_v58, %v2794_v48  ;;  %v2763_v43 = vmul.f32 %v6123_v31, %v5330_v40  ;;  %v3119_v59 = vld [vmem:[#allocation3 + $0x1a0] sm:$0xff] }
 0x2dd   : > { %v3442_v52 = vmax.f32 %v3410_v34, 0.0  ;;  %v3248_v34 = vmul.f32 %v5390_v18, %v3215_v2  ;;  %v3152_v1 = vmul.f32 %v5375_v55, %v3119_v59 }
 0x2de   : > { %v3768_v17 = vmin.f32 %v3736_v23, 6.0  ;;  %v3278_v47 = vadd.f32 %v3246_v63, %v3181_v21  ;;  %v2988_v36 = vadd.f32 %v2956_v45, %v2891_v24  ;;  %v2795_v19 = vadd.f32 %v2763_v43, %v2698_v25  ;;  %v3312_v23 = vld [vmem:[#allocation3 + $0x19a] sm:$0xff]  ;;  %v3313_v45 = vld [vmem:[#allocation3 + $0x1a2] sm:$0xff] }
 0x2df   : > { %v3629_v32 = vpop.f32.mrf.mxu3  ;;  %v3474_v50 = vmin.f32 %v3442_v52, 6.0 }
 0x2e0   : > { %3800 = vst.msk [vmem:[%s5930_s28 + $0x48] sm:$0xff] %vm478_vm1, %v3768_v17  ;;  %v3630_v38 = vadd.f32 %v5895_v53, %v3629_v32  ;;  %v3345_v32 = vmul.f32 %v5398_v3, %v3312_v23 }
 0x2e1   : > { %v3310_v15 = vld [vmem:[#allocation3 + $0x182] sm:$0xff]  ;;  %v3311_v26 = vld [vmem:[#allocation3 + $0x18a] sm:$0xff] }
 0x2e2   : > { %v3117_v9 = vld [vmem:[#allocation3 + $0x188] sm:$0xff]  ;;  %v3705_v35 = vadd.f32 %v3630_v38, %v5239_v56  ;;  %v3343_v37 = vmul.f32 %v5398_v3, %v3310_v15  ;;  %v3053_v39 = vmul.f32 %v3310_v15, %v5370_v29  ;;  %v3054_v21 = vmul.f32 %v3311_v26, %v5370_v29 }
 0x2e3   : > { %v3214_v54 = vld [vmem:[#allocation3 + $0x189] sm:$0xff]  ;;  %v3150_v4 = vmul.f32 %v5375_v55, %v3117_v9  ;;  %v2860_v0 = vmul.f32 %v3117_v9, %v5347_v13  ;;  %v3344_v13 = vmul.f32 %v5398_v3, %v3311_v26  ;;  %v3346_v55 = vmul.f32 %v5398_v3, %v3313_v45 }
 0x2e4   : > { %v3737_v51 = vmax.f32 %v3705_v35, 0.0  ;;  %4012 = vmatmul.msk.f32.gmra.mxu3 %vm756_vm2, %v3474_v50  ;;  %v3375_v33 = vadd.f32 %v3343_v37, %v3278_v47  ;;  %v3247_v56 = vmul.f32 %v5390_v18, %v3214_v54  ;;  %v3085_v31 = vadd.f32 %v3053_v39, %v2988_v36 }
 0x2e5   : > { %v3182_v40 = vadd.f32 %v3150_v4, %v3084_v16  ;;  %v2892_v60 = vadd.f32 %v2860_v0, %v2795_v19  ;;  %v2957_v7 = vmul.f32 %v3214_v54, %v5368_v28 }
 0x2e6   : > { %v3769_v58 = vmin.f32 %v3737_v51, 6.0  ;;  %v3411_v57 = vadd.f32 %v5875_v62, %v3375_v33  ;;  %v3183_v5 = vadd.f32 %v3151_v22, %v3085_v31  ;;  %v3216_v22 = vld [vmem:[#allocation3 + $0x1a1] sm:$0xff] }
 0x2e7   : > { %v3279_v49 = vadd.f32 %v3247_v56, %v3182_v40  ;;  %v3632_v52 = vpop.f32.mrf.mxu3  ;;  %v2989_v20 = vadd.f32 %v2957_v7, %v2892_v60  ;;  %v3249_v15 = vmul.f32 %v5390_v18, %v3216_v22 }
 0x2e8   : > { %3801 = vst.msk [vmem:[%s5930_s28 + $0x50] sm:$0xff] %vm478_vm1, %v3769_v58  ;;  %v3633_v48 = vadd.f32 %v5895_v53, %v3632_v52  ;;  %v3443_v10 = vmax.f32 %v3411_v57, 0.0  ;;  %v3280_v28 = vadd.f32 %v3248_v34, %v3183_v5 }
 0x2e9   : > { %v3376_v17 = vadd.f32 %v3344_v13, %v3279_v49  ;;  %v3086_v63 = vadd.f32 %v3054_v21, %v2989_v20 }
 0x2ea   : > { %v3706_v24 = vadd.f32 %v3633_v48, %v5252_v30  ;;  %v3475_v25 = vmin.f32 %v3443_v10, 6.0  ;;  %v3377_v9 = vadd.f32 %v3345_v32, %v3280_v28 }
 0x2eb   : > { %v3412_v38 = vadd.f32 %v5875_v62, %v3376_v17  ;;  %v3184_v54 = vadd.f32 %v3152_v1, %v3086_v63 }
 0x2ec   : > { %v3738_v50 = vmax.f32 %v3706_v24, 0.0  ;;  %4013 = vmatmul.msk.f32.gmra.mxu3 %vm756_vm2, %v3475_v25  ;;  %v3413_v37 = vadd.f32 %v5875_v62, %v3377_v9 }
 0x2ed   : > { %v3444_v29 = vmax.f32 %v3412_v38, 0.0  ;;  %v3281_v4 = vadd.f32 %v3249_v15, %v3184_v54  ;;  %v6300_v54 = vld [vmem:[#allocation4_spill] sm:$0xff] }
 0x2ee   : > { %v3770_v16 = vmin.f32 %v3738_v50, 6.0  ;;  %v3445_v26 = vmax.f32 %v3413_v37, 0.0 }
 0x2ef   : > { %v3635_v43 = vpop.f32.mrf.mxu3  ;;  %v3476_v47 = vmin.f32 %v3444_v29, 6.0  ;;  %v3378_v36 = vadd.f32 %v3346_v55, %v3281_v4 }
 0x2f0   : > { %3802 = vst.msk [vmem:[%s5930_s28 + $0x58] sm:$0xff] %vm478_vm1, %v3770_v16  ;;  %v3636_v30 = vadd.f32 %v5895_v53, %v3635_v43 }
 0x2f1   : > { %v3414_v0 = vadd.f32 %v5875_v62, %v3378_v36 }
 0x2f2   : > { %v3707_v35 = vadd.f32 %v3636_v30, %v5264_v27  ;;  %v3477_v27 = vmin.f32 %v3445_v26, 6.0 }
 0x2f3   : > { %v3446_v40 = vmax.f32 %v3414_v0, 0.0  ;;  %v6303_v0 = vld [vmem:[#allocation7_spill] sm:$0xff] }
 0x2f4   : > { %v3739_v18 = vmax.f32 %v3707_v35, 0.0  ;;  %4014 = vmatmul.msk.f32.gmra.mxu3 %vm756_vm2, %v3476_v47  ;;  %v6301_v35 = vld [vmem:[#allocation5_spill] sm:$0xff] }
 0x2f5   : > { %v3478_v60 = vmin.f32 %v3446_v40, 6.0 }
 0x2f6   : > { %v3771_v2 = vmin.f32 %v3739_v18, 6.0 }
 0x2f7   : > { %v3638_v39 = vpop.f32.mrf.mxu3 }
 0x2f8   : > { %3803 = vst.msk [vmem:[%s5930_s28 + $0x60] sm:$0xff] %vm478_vm1, %v3771_v2  ;;  %v3639_v19 = vadd.f32 %v5895_v53, %v3638_v39  ;;  %v6302_v2 = vld [vmem:[#allocation6_spill] sm:$0xff] }
 0x2fa   : > { %v3708_v3 = vadd.f32 %v3639_v19, %v5273_v6 }
 0x2fc   : > { %v3740_v51 = vmax.f32 %v3708_v3, 0.0  ;;  %4015 = vmatmul.msk.f32.gmra.mxu3 %vm756_vm2, %v3477_v27  ;;  %v4073_v3 = vld [vmem:[%s6280_s12] ss:$0 sm:$0xff] }
 0x2fe   : > { %v3772_v33 = vmin.f32 %v3740_v51, 6.0 }
 0x2ff   : > { %v3641_v56 = vpop.f32.mrf.mxu3 }
 0x300   : > { %3804 = vst.msk [vmem:[%s5930_s28 + $0x68] sm:$0xff] %vm478_vm1, %v3772_v33  ;;  %v3642_v31 = vadd.f32 %v5895_v53, %v3641_v56 }
 0x302   : > { %v3709_v34 = vadd.f32 %v3642_v31, %v5281_v41  ;;  %v6304_v31 = vld [vmem:[#allocation8_spill] sm:$0xff] }
 0x304   : > { %v3741_v7 = vmax.f32 %v3709_v34, 0.0  ;;  %4016 = vmatmul.msk.f32.gmra.mxu3 %vm756_vm2, %v3478_v60 }
 0x306   : > { %v3773_v6 = vmin.f32 %v3741_v7, 6.0 }
 0x307   : > { %v3644_v62 = vpop.f32.mrf.mxu3 }
 0x308   : > { %3805 = vst.msk [vmem:[%s5930_s28 + $0x70] sm:$0xff] %vm478_vm1, %v3773_v6  ;;  %v3645_v58 = vadd.f32 %v5895_v53, %v3644_v62 }
 0x30a   : > { %v3710_v57 = vadd.f32 %v3645_v58, %v5288_v61  ;;  %v6305_v58 = vld [vmem:[#allocation9_spill] sm:$0xff] }
 0x30c   : > { %v3742_v49 = vmax.f32 %v3710_v57, 0.0 }
 0x30e   : > { %v3774_v13 = vmin.f32 %v3742_v49, 6.0 }
 0x30f   : > { %v3647_v23 = vpop.f32.mrf.mxu3 }
 0x310   : > { %3806 = vst.msk [vmem:[%s5930_s28 + $0x78] sm:$0xff] %vm478_vm1, %v3774_v13  ;;  %v3648_v41 = vadd.f32 %v5895_v53, %v3647_v23 }
 0x312   : > { %v3711_v59 = vadd.f32 %v3648_v41, %v5294_v11 }
 0x314   : > { %v3743_v52 = vmax.f32 %v3711_v59, 0.0  ;;  %v6306_v59 = vld [vmem:[#allocation10_spill] sm:$0xff] }
 0x316   : > { %v3775_v5 = vmin.f32 %v3743_v52, 6.0 }
 0x317   : > { %v3650_v20 = vpop.f32.mrf.mxu3 }
 0x318   : > { %3807 = vst.msk [vmem:[%s5930_s28 + $0x80] sm:$0xff] %vm478_vm1, %v3775_v5  ;;  %v3651_v48 = vadd.f32 %v5895_v53, %v3650_v20 }
 0x31a   : > { %v3712_v61 = vadd.f32 %v3651_v48, %v5306_v44 }
 0x31c   : > { %v3744_v10 = vmax.f32 %v3712_v61, 0.0 }
 0x31e   : > { %v3776_v17 = vmin.f32 %v3744_v10, 6.0  ;;  %v6307_v10 = vld [vmem:[#allocation11_spill] sm:$0xff] }
 0x31f   : > { %v3653_v21 = vpop.f32.mrf.mxu3 }
 0x320   : > { %3808 = vst.msk [vmem:[%s5930_s28 + $0x88] sm:$0xff] %vm478_vm1, %v3776_v17  ;;  %v3654_v28 = vadd.f32 %v5895_v53, %v3653_v21 }
 0x322   : > { %v3713_v11 = vadd.f32 %v3654_v28, %v5321_v46 }
 0x324   : > { %v3745_v32 = vmax.f32 %v3713_v11, 0.0 }
 0x326   : > { %v3777_v1 = vmin.f32 %v3745_v32, 6.0 }
 0x327   : > { %v3656_v24 = vpop.f32.mrf.mxu3 }
 0x328   : > { %3809 = vst.msk [vmem:[%s5930_s28 + $0x90] sm:$0xff] %vm478_vm1, %v3777_v1  ;;  %v3657_v25 = vadd.f32 %v5895_v53, %v3656_v24  ;;  %v6308_v1 = vld [vmem:[#allocation12_spill] sm:$0xff] }
 0x32a   : > { %v3714_v44 = vadd.f32 %v3657_v25, %v5338_v14 }
 0x32c   : > { %v3746_v38 = vmax.f32 %v3714_v44, 0.0 }
 0x32e   : > { %v3778_v63 = vmin.f32 %v3746_v38, 6.0 }
 0x32f   : > { %v3659_v22 = vpop.f32.mrf.mxu3 }
 0x330   : > { %3810 = vst.msk [vmem:[%s5930_s28 + $0x98] sm:$0xff] %vm478_vm1, %v3778_v63  ;;  %v3660_v50 = vadd.f32 %v5895_v53, %v3659_v22 }
 0x332   : > { %v3715_v46 = vadd.f32 %v3660_v50, %v5373_v8 }
 0x334   : > { %v3747_v15 = vmax.f32 %v3715_v46, 0.0 }
 0x336   : > { %v3779_v16 = vmin.f32 %v3747_v15, 6.0 }
 0x337   : > { %v3662_v29 = vpop.f32.mrf.mxu3 }
 0x338   : > { %3811 = vst.msk [vmem:[%s5930_s28 + $0xa0] sm:$0xff] %vm478_vm1, %v3779_v16  ;;  %v3663_v9 = vadd.f32 %v5895_v53, %v3662_v29 }
 0x33a   : > { %v3716_v14 = vadd.f32 %v3663_v9, %v6300_v54 }
 0x33c   : > { %v3748_v45 = vmax.f32 %v3716_v14, 0.0 }
 0x33e   : > { %v3780_v43 = vmin.f32 %v3748_v45, 6.0 }
 0x33f   : > { %v3665_v30 = vpop.f32.mrf.mxu3 }
 0x340   : > { %3812 = vst.msk [vmem:[%s5930_s28 + $0xa8] sm:$0xff] %vm478_vm1, %v3780_v43  ;;  %v3666_v55 = vadd.f32 %v5895_v53, %v3665_v30 }
 0x342   : > { %v3717_v8 = vadd.f32 %v3666_v55, %v6301_v35 }
 0x344   : > { %v3749_v47 = vmax.f32 %v3717_v8, 0.0 }
 0x346   : > { %v3781_v37 = vmin.f32 %v3749_v47, 6.0 }
 0x347   : > { %v3668_v4 = vpop.f32.mrf.mxu3 }
 0x348   : > { %3813 = vst.msk [vmem:[%s5930_s28 + $0xb0] sm:$0xff] %vm478_vm1, %v3781_v37  ;;  %v3669_v18 = vadd.f32 %v5895_v53, %v3668_v4 }
 0x34a   : > { %v3718_v26 = vadd.f32 %v3669_v18, %v6302_v2 }
 0x34c   : > { %v3750_v36 = vmax.f32 %v3718_v26, 0.0 }
 0x34e   : > { %v3782_v39 = vmin.f32 %v3750_v36, 6.0 }
 0x34f   : > { %v3671_v19 = vpop.f32.mrf.mxu3 }
 0x350   : > { %3814 = vst.msk [vmem:[%s5930_s28 + $0xb8] sm:$0xff] %vm478_vm1, %v3782_v39  ;;  %v3672_v27 = vadd.f32 %v4073_v3, %v3671_v19 }
 0x352   : > { %v3719_v51 = vadd.f32 %v3672_v27, %v6303_v0 }
 0x354   : > { %v3751_v33 = vmax.f32 %v3719_v51, 0.0 }
 0x356   : > { %v3783_v40 = vmin.f32 %v3751_v33, 6.0 }
 0x357   : > { %v3674_v56 = vpop.f32.mrf.mxu3 }
 0x358   : > { %3815 = vst.msk [vmem:[%s5930_s28 + $0xc0] sm:$0xff] %vm478_vm1, %v3783_v40  ;;  %v3675_v53 = vadd.f32 %v4073_v3, %v3674_v56 }
 0x35a   : > { %v3720_v34 = vadd.f32 %v3675_v53, %v6304_v31 }
 0x35c   : > { %v3752_v60 = vmax.f32 %v3720_v34, 0.0 }
 0x35e   : > { %v3784_v7 = vmin.f32 %v3752_v60, 6.0 }
 0x35f   : > { %v3677_v6 = vpop.f32.mrf.mxu3 }
 0x360   : > { %3816 = vst.msk [vmem:[%s5930_s28 + $0xc8] sm:$0xff] %vm478_vm1, %v3784_v7  ;;  %v3678_v62 = vadd.f32 %v4073_v3, %v3677_v6 }
 0x362   : > { %v3721_v57 = vadd.f32 %v3678_v62, %v6305_v58 }
 0x364   : > { %v3753_v49 = vmax.f32 %v3721_v57, 0.0 }
 0x366   : > { %v3785_v13 = vmin.f32 %v3753_v49, 6.0 }
 0x367   : > { %v3680_v23 = vpop.f32.mrf.mxu3 }
 0x368   : > { %3817 = vst.msk [vmem:[%s5930_s28 + $0xd0] sm:$0xff] %vm478_vm1, %v3785_v13  ;;  %v3681_v41 = vadd.f32 %v4073_v3, %v3680_v23 }
 0x36a   : > { %v3722_v52 = vadd.f32 %v3681_v41, %v6306_v59 }
 0x36c   : > { %v3754_v5 = vmax.f32 %v3722_v52, 0.0 }
 0x36e   : > { %v3786_v20 = vmin.f32 %v3754_v5, 6.0 }
 0x36f   : > { %v3683_v48 = vpop.f32.mrf.mxu3 }
 0x370   : > { %3818 = vst.msk [vmem:[%s5930_s28 + $0xd8] sm:$0xff] %vm478_vm1, %v3786_v20  ;;  %v3684_v61 = vadd.f32 %v4073_v3, %v3683_v48 }
 0x372   : > { %v3723_v17 = vadd.f32 %v3684_v61, %v6307_v10 }
 0x374   : > { %v3755_v21 = vmax.f32 %v3723_v17, 0.0 }
 0x376   : > { %v3787_v28 = vmin.f32 %v3755_v21, 6.0 }
 0x377   : > { %v3686_v11 = vpop.f32.mrf.mxu3 }
 0x378   : > { %3819 = vst.msk [vmem:[%s5930_s28 + $0xe0] sm:$0xff] %vm478_vm1, %v3787_v28  ;;  %v3687_v32 = vadd.f32 %v4073_v3, %v3686_v11 }
 0x37a   : > { %v3724_v24 = vadd.f32 %v3687_v32, %v6308_v1 }
 0x37c   : > { %v3756_v25 = vmax.f32 %v3724_v24, 0.0 }
 0x37e   : > { %v3788_v44 = vmin.f32 %v3756_v25, 6.0 }
 0x37f   : > { %v3689_v38 = vpop.f32.mrf.mxu3 }
 0x380   : > { %3820 = vst.msk [vmem:[%s5930_s28 + $0xe8] sm:$0xff] %vm478_vm1, %v3788_v44  ;;  %v3690_v63 = vadd.f32 %v4073_v3, %v3689_v38 }
 0x382   : > { %v3725_v22 = vadd.f32 %v3690_v63, %v5703_v12 }
 0x384   : > { %v3757_v50 = vmax.f32 %v3725_v22, 0.0 }
 0x386   : > { %v3789_v46 = vmin.f32 %v3757_v50, 6.0 }
 0x387   : > { %v3692_v15 = vpop.f32.mrf.mxu3 }
 0x388   : > { %3821 = vst.msk [vmem:[%s5930_s28 + $0xf0] sm:$0xff] %vm478_vm1, %v3789_v46  ;;  %v3693_v16 = vadd.f32 %v4073_v3, %v3692_v15 }
 0x38a   : > { %v3726_v29 = vadd.f32 %v3693_v16, %v5729_v42 }
 0x38c   : > { %v3758_v9 = vmax.f32 %v3726_v29, 0.0 }
 0x38e   : > { %v3790_v54 = vmin.f32 %v3758_v9, 6.0 }
 0x390   : > { %3822 = vst.msk [vmem:[%s5930_s28 + $0xf8] sm:$0xff] %vm478_vm1, %v3790_v54 }
 0x391 PF: > { %s23_s25 = sadd.s32 1, %s4080_s25  }
 0x392   : > { %p20_p4 = scmp.ge.s32.totalorder %s23_s25, 4  }
 0x394   :  { %22 = sbr.rel (!%p20_p4) target bundleno = 1 (0x1), region = 106 }

</bundles_post_ra>
